<compile_context>
chip_gen: v5e
topology: v5e:2x2
jax: 0.10.0
libtpu: 0.0.40
codegen_flags: <defaults>
</compile_context>

<pallas_src>
import functools
import math

import jax
import jax.numpy as jnp
from jax.experimental import pallas as pl
from jax.experimental.pallas import tpu as pltpu

VMEM = pltpu.MemorySpace.VMEM
_VMEM_LIMIT = 32 * 1024 * 1024   # explicit scoped-VMEM budget (>> actual use)


# ----------------------------------------------------------------------------
# in-kernel math helpers
# ----------------------------------------------------------------------------
def _mxu(a, b):
    """bf16 MXU matmul, f32 accumulation (skips casts for bf16 operands)."""
    if a.dtype != jnp.bfloat16:
        a = a.astype(jnp.bfloat16)
    if b.dtype != jnp.bfloat16:
        b = b.astype(jnp.bfloat16)
    return jnp.dot(a, b, preferred_element_type=jnp.float32)


def _mxu32(a, b):
    """f32 MXU matmul (exact one-hot gathers / normalization statistics)."""
    return jnp.dot(a, b, preferred_element_type=jnp.float32)


def _mlp3(x, w1, b1, w2, b2, w3, b3):
    """MLP(in, hidden, out) with 2 hidden layers: Lin-ReLU-Lin-ReLU-Lin."""
    h = jnp.maximum(_mxu(x, w1) + b1, 0.0)
    h = jnp.maximum(_mxu(h, w2) + b2, 0.0)
    return _mxu(h, w3) + b3


# ----------------------------------------------------------------------------
# prologue kernel: all four input encoders in one call
# ----------------------------------------------------------------------------
def _encode_kernel(enc_in_ref, eaf_ref, eap_ref,
                   tn_w1, tn_b1, tn_w2, tn_b2, tn_w3, tn_b3,
                   fw1, fb1, fw2, fb2, fw3, fb3,
                   pw1, pb1, pw2, pb2, pw3, pb3,
                   nf0_ref, ee1_ref, ee2_ref):
    # time_encoder and node_encoder are packed block-diagonally, so one MLP
    # chain on [t | node_info] directly yields concat(t_enc, node_enc).
    nf0_ref[...] = _mlp3(enc_in_ref[...], tn_w1[...], tn_b1[...], tn_w2[...],
                         tn_b2[...], tn_w3[...], tn_b3[...])
    ee1_ref[...] = _mlp3(eaf_ref[...], fw1[...], fb1[...], fw2[...], fb2[...],
                         fw3[...], fb3[...])
    ee2_ref[...] = _mlp3(eap_ref[...], pw1[...], pb1[...], pw2[...], pb2[...],
                         pw3[...], pb3[...])


# ----------------------------------------------------------------------------
# one graph stream: TransformerConvEdge (1 head) + root skip + GraphNorm
# ----------------------------------------------------------------------------
def _conv_graphnorm(x, ea, src_oh, dst_oh, dst_oh_t, mem32, memt32, inv_cnt,
                    wqkvs, bqkvs, we, gn):
    """Returns (normalized node features (N,H), per-edge messages (E,H))."""
    H = we.shape[1]
    gw, gb, gms = gn[0:1, :], gn[1:2, :], gn[2:3, :]

    proj = _mxu(x, wqkvs) + bqkvs                     # (N,4H) = [q | k | v | skip]
    q = proj[:, 0:H]
    kv = proj[:, H:3 * H]                             # [k | v] already contiguous
    skip = proj[:, 3 * H:]
    e = _mxu(ea, we)                                  # (E, H)

    # fused gather of k and v for the source node of every edge (one MXU push)
    kv_e = _mxu(src_oh, kv)                           # (E, 2H)
    kk = kv_e[:, :H] + e
    vv = kv_e[:, H:] + e
    qd = _mxu(dst_oh, q)                              # (E, H)
    s = jnp.sum(qd * kk, axis=-1, keepdims=True) * (1.0 / math.sqrt(H))

    # segment softmax over destination nodes
    masked = jnp.where(dst_oh != 0, s, -1e30)         # (E, N)
    dmax = jnp.max(masked, axis=0, keepdims=True)     # (1, N) per-dst max
    max_e = jnp.sum(dst_oh * dmax, axis=1, keepdims=True)   # (E, 1)
    p = jnp.exp(s - max_e)                                   # (E, 1)
    pv = p * vv                                              # (E, H)

    # unnormalized numerator + softmax denominator scattered on the MXU
    num = _mxu(dst_oh_t, pv)                                 # (N, H)
    den = _mxu(dst_oh_t, p)                                  # (N, 1)
    h = num * pl.reciprocal(jnp.maximum(den, 1e-20), approx=True) + skip

    # per-edge messages (TransformerConvEdge.out): MXU gather of denominator
    den_e = _mxu(dst_oh, den)                                # (E, 1)
    msg = pv * pl.reciprocal(den_e, approx=True)             # (E, H)

    # GraphNorm with exact f32 per-graph statistics (one-pass mean / E[x^2])
    mean_g = _mxu32(memt32, h) * inv_cnt                     # (B, H)
    msq_g = _mxu32(memt32, h * h) * inv_cnt                  # (B, H)
    var_g = jnp.maximum(msq_g - mean_g * mean_g * gms * (2.0 - gms), 0.0)
    mean_n = _mxu32(mem32, mean_g)                           # (N, H)
    var_n = _mxu32(mem32, var_g)                             # (N, H)
    normed = (h - mean_n * gms) * jax.lax.rsqrt(var_n + 1e-5) * gw + gb
    return normed, msg


# ----------------------------------------------------------------------------
# fused layer-stack kernel: grid=(nb_layer,), state resident in VMEM scratch
# ----------------------------------------------------------------------------
def _layers_kernel(nf0_ref, ee1_0_ref, ee2_0_ref,
                   s1c_ref, d1c_ref, d1r_ref, s2c_ref, d2c_ref, d2r_ref,
                   bc_ref, br_ref, icnt_ref,
                   wqkvs1_ref, bqkvs1_ref, we1_ref, gn1_ref,
                   wqkvs2_ref, bqkvs2_ref, we2_ref, gn2_ref,
                   iw1_ref, iw2_ref, iw3_ref, ibs_ref,
                   dw1_ref, db1_ref, dw2_ref, db2_ref, dw3_ref, db3_ref,
                   eout_ref,
                   nn_st, glob_st, ee1_st, ee2_st, mem_st, memt_st,
                   s1oh_st, d1oh_st, d1oht_st, s2oh_st, d2oh_st, d2oht_st):
    l = pl.program_id(0)
    H = we1_ref.shape[1]
    N = nf0_ref.shape[0]
    B = icnt_ref.shape[0]
    E1 = ee1_0_ref.shape[0]
    E2 = ee2_0_ref.shape[0]

    @pl.when(l == 0)
    def _init():
        # carried state
        nn_st[...] = nf0_ref[...]
        glob_st[...] = jnp.zeros_like(glob_st)
        ee1_st[...] = ee1_0_ref[...]
        ee2_st[...] = ee2_0_ref[...]
        # graph membership one-hots in f32 (exact GraphNorm / pooling stats)
        mem_st[...] = (bc_ref[...] == jax.lax.broadcasted_iota(
            jnp.int32, (N, B), 1)).astype(jnp.float32)
        memt_st[...] = (br_ref[...] == jax.lax.broadcasted_iota(
            jnp.int32, (B, N), 0)).astype(jnp.float32)
        # edge incidence one-hots in bf16 (exact 0/1, MXU-ready, built once)
        s1oh_st[...] = (s1c_ref[...] == jax.lax.broadcasted_iota(
            jnp.int32, (E1, N), 1)).astype(jnp.bfloat16)
        d1oh_st[...] = (d1c_ref[...] == jax.lax.broadcasted_iota(
            jnp.int32, (E1, N), 1)).astype(jnp.bfloat16)
        d1oht_st[...] = (d1r_ref[...] == jax.lax.broadcasted_iota(
            jnp.int32, (N, E1), 0)).astype(jnp.bfloat16)
        s2oh_st[...] = (s2c_ref[...] == jax.lax.broadcasted_iota(
            jnp.int32, (E2, N), 1)).astype(jnp.bfloat16)
        d2oh_st[...] = (d2c_ref[...] == jax.lax.broadcasted_iota(
            jnp.int32, (E2, N), 1)).astype(jnp.bfloat16)
        d2oht_st[...] = (d2r_ref[...] == jax.lax.broadcasted_iota(
            jnp.int32, (N, E2), 0)).astype(jnp.bfloat16)

    inv_cnt = icnt_ref[...]                 # (B, 1)
    mem32 = mem_st[...]
    memt32 = memt_st[...]

    x2 = nn_st[...]                         # concat(out1, out2) of prev layer
    x1 = x2 + glob_st[...]                  # + gathered global features

    n1, msg1 = _conv_graphnorm(
        x1, ee1_st[...], s1oh_st[...], d1oh_st[...], d1oht_st[...],
        mem32, memt32, inv_cnt,
        wqkvs1_ref[...], bqkvs1_ref[...], we1_ref[...], gn1_ref[...])
    n2, msg2 = _conv_graphnorm(
        x2, ee2_st[...], s2oh_st[...], d2oh_st[...], d2oht_st[...],
        mem32, memt32, inv_cnt,
        wqkvs2_ref[...], bqkvs2_ref[...], we2_ref[...], gn2_ref[...])

    # next-layer node features: nn = concat(out1, out2) is staged in VMEM so
    # the two-stream global mean pool is a single fused (B,N)x(N,2H) matmul.
    nn_st[:, :H] = n1
    nn_st[:, H:] = n2
    nn = nn_st[...]
    pools = _mxu32(memt32, nn) * inv_cnt        # (B, 2H) = [pool1 | pool2]
    glob_st[...] = _mxu32(mem32, pools)         # (N, 2H) gathered per node

    # next-layer edge encodings
    ee1_st[...] = msg1
    ibs = ibs_ref[...]
    ee2_st[...] = _mlp3(msg2, iw1_ref[...], ibs[0:1, :], iw2_ref[...],
                        ibs[1:2, :], iw3_ref[...], ibs[2:3, :]) + ee2_0_ref[...]

    # final edge decoder, fused into the last grid step:
    #   MLP(concat(ee_g1_final, ee_g1_init)) without materializing the concat
    @pl.when(l == pl.num_programs(0) - 1)
    def _decode():
        w1 = dw1_ref[...]
        hdec = jnp.maximum(_mxu(msg1, w1[:H, :]) +
                           _mxu(ee1_0_ref[...], w1[H:, :]) + db1_ref[...], 0.0)
        hdec = jnp.maximum(_mxu(hdec, dw2_ref[...]) + db2_ref[...], 0.0)
        eout_ref[...] = _mxu(hdec, dw3_ref[...]) + db3_ref[...]


# ----------------------------------------------------------------------------
# BlockSpec helpers for the gridded layer call
# ----------------------------------------------------------------------------
def _fixed_spec(shape):
    n = len(shape)
    return pl.BlockSpec(tuple(shape), lambda l, _n=n: (0,) * _n)


def _stacked_spec(shape):
    rest = tuple(shape[1:])
    n = len(rest)
    return pl.BlockSpec((None,) + rest, lambda l, _n=n: (l,) + (0,) * _n)


# ----------------------------------------------------------------------------
# GraphGDP forward
# ----------------------------------------------------------------------------
@functools.partial(jax.jit, static_argnums=(0, 1))
def graphgdp_forward(nb_layer, n_graphs, params,
                     g1_x, g1_edge_index, g1_edge_attr, g1_batch,
                     g2_x, g2_edge_index, g2_edge_attr, t_value):
    del g1_x  # unused (graphs share the node set; features come from g2_x)
    B = n_graphs
    H = params["we1"].shape[-1]
    N = g2_x.shape[0]
    E1 = g1_edge_index.shape[1]
    E2 = g2_edge_index.shape[1]

    edge_attr_full = g1_edge_attr[:, 0:1]
    edge_attr_partial = g2_edge_attr

    deg = g2_x[:, -1].astype(jnp.int32)
    deg_emb = jnp.take(params["degree_embedding"], deg, axis=0)          # (N, H)
    t_nodes = jnp.take(t_value, g1_batch)[:, None]                       # (N, 1)
    enc_in = jnp.concatenate([t_nodes, g2_x[:, :-1], deg_emb], axis=1)

    # ---------------- prologue: all four encoders in one kernel -------------
    enc_args = (enc_in, edge_attr_full, edge_attr_partial,
                *params["enc_time_node"], *params["enc_edges_full"],
                *params["enc_edges_partial"])
    nf0, ee1_0, ee2_0 = pl.pallas_call(
        _encode_kernel,
        out_shape=(jax.ShapeDtypeStruct((N, 2 * H), jnp.float32),
                   jax.ShapeDtypeStruct((E1, H), jnp.float32),
                   jax.ShapeDtypeStruct((E2, H), jnp.float32)),
        in_specs=[pl.BlockSpec(memory_space=VMEM) for _ in enc_args],
        out_specs=tuple(pl.BlockSpec(memory_space=VMEM) for _ in range(3)),
        compiler_params=pltpu.CompilerParams(vmem_limit_bytes=_VMEM_LIMIT),
    )(*enc_args)

    # ---------------- index / membership tensors (built once) ---------------
    s1c = g1_edge_index[0][:, None].astype(jnp.int32)
    d1c = g1_edge_index[1][:, None].astype(jnp.int32)
    d1r = g1_edge_index[1][None, :].astype(jnp.int32)
    s2c = g2_edge_index[0][:, None].astype(jnp.int32)
    d2c = g2_edge_index[1][:, None].astype(jnp.int32)
    d2r = g2_edge_index[1][None, :].astype(jnp.int32)
    bc = g1_batch[:, None].astype(jnp.int32)
    br = g1_batch[None, :].astype(jnp.int32)
    cnt = jnp.zeros((B,), jnp.float32).at[g1_batch].add(1.0)
    inv_cnt = (1.0 / jnp.maximum(cnt, 1.0))[:, None]                     # (B, 1)

    # ---------------- fused layer stack + edge decoder ----------------------
    fixed_args = (nf0, ee1_0, ee2_0, s1c, d1c, d1r, s2c, d2c, d2r, bc, br,
                  inv_cnt)
    stacked_args = (params["wqkvs1"], params["bqkvs1"], params["we1"],
                    params["gn1"],
                    params["wqkvs2"], params["bqkvs2"], params["we2"],
                    params["gn2"],
                    params["iw1"], params["iw2"], params["iw3"], params["ibs"])
    dec_args = params["decoder"]

    grid_spec = pltpu.PrefetchScalarGridSpec(
        num_scalar_prefetch=0,
        grid=(nb_layer,),
        in_specs=([_fixed_spec(a.shape) for a in fixed_args]
                  + [_stacked_spec(a.shape) for a in stacked_args]
                  + [_fixed_spec(a.shape) for a in dec_args]),
        out_specs=pl.BlockSpec((E1, 1), lambda l: (0, 0)),
        scratch_shapes=[
            pltpu.VMEM((N, 2 * H), jnp.float32),    # nn_st  = concat(out1,out2)
            pltpu.VMEM((N, 2 * H), jnp.float32),    # glob_st = gathered pooling
            pltpu.VMEM((E1, H), jnp.float32),       # ee1_st
            pltpu.VMEM((E2, H), jnp.float32),       # ee2_st
            pltpu.VMEM((N, B), jnp.float32),        # mem
            pltpu.VMEM((B, N), jnp.float32),        # mem_t
            pltpu.VMEM((E1, N), jnp.bfloat16),      # src1 one-hot
            pltpu.VMEM((E1, N), jnp.bfloat16),      # dst1 one-hot
            pltpu.VMEM((N, E1), jnp.bfloat16),      # dst1 one-hot (transposed)
            pltpu.VMEM((E2, N), jnp.bfloat16),      # src2 one-hot
            pltpu.VMEM((E2, N), jnp.bfloat16),      # dst2 one-hot
            pltpu.VMEM((N, E2), jnp.bfloat16),      # dst2 one-hot (transposed)
        ],
    )
    edges_out = pl.pallas_call(
        _layers_kernel,
        out_shape=jax.ShapeDtypeStruct((E1, 1), jnp.float32),
        grid_spec=grid_spec,
        compiler_params=pltpu.CompilerParams(
            dimension_semantics=("arbitrary",),
            vmem_limit_bytes=_VMEM_LIMIT),
    )(*fixed_args, *stacked_args, *dec_args)
    return edges_out


# ----------------------------------------------------------------------------
# deterministic parameter init (per-layer weights pre-stacked for the grid)
# ----------------------------------------------------------------------------
def init_linear(key, din, dout):
    kw, kb = jax.random.split(key)
    scale = 1.0 / math.sqrt(max(din, 1))
    w = jax.random.normal(kw, (din, dout), jnp.float32) * scale
    b = jax.random.normal(kb, (1, dout), jnp.float32) * 0.01
    return w, b


def init_mlp(key, din, dhid, dout):
    k1, k2, k3 = jax.random.split(key, 3)
    w1, b1 = init_linear(k1, din, dhid)
    w2, b2 = init_linear(k2, dhid, dhid)
    w3, b3 = init_linear(k3, dhid, dout)
    return (w1, b1, w2, b2, w3, b3)


def _block_diag(a, b):
    ra, ca = a.shape
    rb, cb = b.shape
    top = jnp.concatenate([a, jnp.zeros((ra, cb), a.dtype)], axis=1)
    bot = jnp.concatenate([jnp.zeros((rb, ca), b.dtype), b], axis=1)
    return jnp.concatenate([top, bot], axis=0)


def _pack_parallel_mlps(pa, pb):
    """Block-diagonal packing: packed_MLP(concat(xa, xb)) == concat(A(xa), B(xb))."""
    wa1, ba1, wa2, ba2, wa3, ba3 = pa
    wb1, bb1, wb2, bb2, wb3, bb3 = pb
    return (_block_diag(wa1, wb1), jnp.concatenate([ba1, bb1], axis=1),
            _block_diag(wa2, wb2), jnp.concatenate([ba2, bb2], axis=1),
            _block_diag(wa3, wb3), jnp.concatenate([ba3, bb3], axis=1))


def init_transformer_conv(key, din, dout, dedge):
    ks = jax.random.split(key, 5)
    wq, bq = init_linear(ks[0], din, dout)
    wk, bk = init_linear(ks[1], din, dout)
    wv, bv = init_linear(ks[2], din, dout)
    we, _ = init_linear(ks[3], dedge, dout)   # lin_edge has no bias
    ws, bs = init_linear(ks[4], din, dout)
    wqkvs = jnp.concatenate([wq, wk, wv, ws], axis=1)   # (din, 4*dout)
    bqkvs = jnp.concatenate([bq, bk, bv, bs], axis=1)   # (1,   4*dout)
    return wqkvs, bqkvs, we


def init_graph_norm(hidden):
    # rows: [weight, bias, mean_scale]
    return jnp.concatenate([jnp.ones((1, hidden), jnp.float32),
                            jnp.zeros((1, hidden), jnp.float32),
                            jnp.ones((1, hidden), jnp.float32)], axis=0)


def init_graphgdp(key, nb_layer, hidden, dim_node, dim_edge, max_degree):
    keys = jax.random.split(key, 7 + 3 * nb_layer)
    time_mlp = init_mlp(keys[0], 1, hidden, hidden)
    node_mlp = init_mlp(keys[1], dim_node - 1 + hidden, hidden, hidden)
    params = {
        "enc_time_node": _pack_parallel_mlps(time_mlp, node_mlp),
        "enc_edges_full": init_mlp(keys[2], 1, hidden, hidden),
        "enc_edges_partial": init_mlp(keys[3], dim_edge, hidden, hidden),
        "decoder": init_mlp(keys[4], 2 * hidden, hidden, 1),
        "degree_embedding": jax.random.uniform(
            keys[5], (max_degree + 1, hidden), jnp.float32, -1.0, 1.0),
    }
    wq1, bq1, we1, gn1 = [], [], [], []
    wq2, bq2, we2, gn2 = [], [], [], []
    iw1, iw2, iw3, ibs = [], [], [], []
    for i in range(nb_layer):
        a, b, c = init_transformer_conv(keys[6 + 3 * i], 2 * hidden, hidden, hidden)
        wq1.append(a); bq1.append(b); we1.append(c)
        a, b, c = init_transformer_conv(keys[7 + 3 * i], 2 * hidden, hidden, hidden)
        wq2.append(a); bq2.append(b); we2.append(c)
        gn1.append(init_graph_norm(hidden))
        gn2.append(init_graph_norm(hidden))
        w1, b1, w2, b2, w3, b3 = init_mlp(keys[8 + 3 * i], hidden, hidden, hidden)
        iw1.append(w1); iw2.append(w2); iw3.append(w3)
        ibs.append(jnp.concatenate([b1, b2, b3], axis=0))
    params.update(
        wqkvs1=jnp.stack(wq1), bqkvs1=jnp.stack(bq1), we1=jnp.stack(we1),
        gn1=jnp.stack(gn1),
        wqkvs2=jnp.stack(wq2), bqkvs2=jnp.stack(bq2), we2=jnp.stack(we2),
        gn2=jnp.stack(gn2),
        iw1=jnp.stack(iw1), iw2=jnp.stack(iw2), iw3=jnp.stack(iw3),
        ibs=jnp.stack(ibs))
    return params


# ----------------------------------------------------------------------------
# main
# ----------------------------------------------------------------------------
if __name__ == "__main__":
    NB_LAYER = 2
    HIDDEN = 32
    NB_MAX_NODE = 8
    DIM_NODE = 1
    DIM_EDGE = 1
    MAX_DEGREE = 10
    B = 2
    N = B * NB_MAX_NODE

    key = jax.random.PRNGKey(0)
    k_params, k_data = jax.random.split(key)
    params = init_graphgdp(k_params, NB_LAYER, HIDDEN, DIM_NODE, DIM_EDGE,
                           MAX_DEGREE)

    # graph_1: fully-connected directed graph (no self loops) per subgraph
    src1, dst1 = [], []
    for b in range(B):
        base = b * NB_MAX_NODE
        for i in range(NB_MAX_NODE):
            for j in range(NB_MAX_NODE):
                if i != j:
                    src1.append(base + i)
                    dst1.append(base + j)
    g1_edge_index = jnp.array([src1, dst1], dtype=jnp.int32)
    E1 = g1_edge_index.shape[1]

    # graph_2: partial graph (every 3rd edge of graph_1)
    sel = jnp.arange(0, E1, 3, dtype=jnp.int32)
    g2_edge_index = g1_edge_index[:, sel]
    E2 = g2_edge_index.shape[1]

    g1_batch = jnp.repeat(jnp.arange(B, dtype=jnp.int32), NB_MAX_NODE)

    kd = jax.random.split(k_data, 4)
    g1_x = jax.random.normal(kd[0], (N, DIM_NODE), jnp.float32)
    g1_edge_attr = jax.random.normal(kd[1], (E1, 2), jnp.float32)
    g2_edge_attr = jax.random.normal(kd[2], (E2, DIM_EDGE), jnp.float32)
    t_value = jax.random.uniform(kd[3], (B,), jnp.float32)

    # graph_2 node features: last column is the node (in-)degree
    in_deg = jnp.zeros((N,), jnp.float32).at[g2_edge_index[1]].add(1.0)
    in_deg = jnp.clip(in_deg, 0, MAX_DEGREE)
    g2_x = in_deg[:, None]  # (N, DIM_NODE=1)

    out = graphgdp_forward(NB_LAYER, B, params,
                           g1_x, g1_edge_index, g1_edge_attr, g1_batch,
                           g2_x, g2_edge_index, g2_edge_attr, t_value)
    out = jax.block_until_ready(out)
    assert out.shape == (E1, 1), out.shape
    assert bool(jnp.all(jnp.isfinite(out)))
    print("KERNEL_OK")
</pallas_src>

<mosaic_0001>
module attributes {stable_mosaic.version = 11 : i64} {
  func.func @_encode_kernel(%arg0: memref<16x33xf32, #tpu.memory_space<vmem>>, %arg1: memref<112x1xf32, #tpu.memory_space<vmem>>, %arg2: memref<38x1xf32, #tpu.memory_space<vmem>>, %arg3: memref<33x64xf32, #tpu.memory_space<vmem>>, %arg4: memref<1x64xf32, #tpu.memory_space<vmem>>, %arg5: memref<64x64xf32, #tpu.memory_space<vmem>>, %arg6: memref<1x64xf32, #tpu.memory_space<vmem>>, %arg7: memref<64x64xf32, #tpu.memory_space<vmem>>, %arg8: memref<1x64xf32, #tpu.memory_space<vmem>>, %arg9: memref<1x32xf32, #tpu.memory_space<vmem>>, %arg10: memref<1x32xf32, #tpu.memory_space<vmem>>, %arg11: memref<32x32xf32, #tpu.memory_space<vmem>>, %arg12: memref<1x32xf32, #tpu.memory_space<vmem>>, %arg13: memref<32x32xf32, #tpu.memory_space<vmem>>, %arg14: memref<1x32xf32, #tpu.memory_space<vmem>>, %arg15: memref<1x32xf32, #tpu.memory_space<vmem>>, %arg16: memref<1x32xf32, #tpu.memory_space<vmem>>, %arg17: memref<32x32xf32, #tpu.memory_space<vmem>>, %arg18: memref<1x32xf32, #tpu.memory_space<vmem>>, %arg19: memref<32x32xf32, #tpu.memory_space<vmem>>, %arg20: memref<1x32xf32, #tpu.memory_space<vmem>>, %arg21: memref<16x64xf32, #tpu.memory_space<vmem>>, %arg22: memref<112x32xf32, #tpu.memory_space<vmem>>, %arg23: memref<38x32xf32, #tpu.memory_space<vmem>>) attributes {dimension_semantics = [], scalar_prefetch = 0 : i64, scratch_operands = 0 : i64, tpu.core_type = #tpu.core_type<tc>} {
    %c0 = arith.constant 0 : index
    %c0_0 = arith.constant 0 : index
    %0 = vector.load %arg0[%c0, %c0_0] : memref<16x33xf32, #tpu.memory_space<vmem>>, vector<16x33xf32>
    %c0_1 = arith.constant 0 : index
    %c0_2 = arith.constant 0 : index
    %1 = vector.load %arg3[%c0_1, %c0_2] : memref<33x64xf32, #tpu.memory_space<vmem>>, vector<33x64xf32>
    %c0_3 = arith.constant 0 : index
    %c0_4 = arith.constant 0 : index
    %2 = vector.load %arg4[%c0_3, %c0_4] : memref<1x64xf32, #tpu.memory_space<vmem>>, vector<1x64xf32>
    %c0_5 = arith.constant 0 : index
    %c0_6 = arith.constant 0 : index
    %3 = vector.load %arg5[%c0_5, %c0_6] : memref<64x64xf32, #tpu.memory_space<vmem>>, vector<64x64xf32>
    %c0_7 = arith.constant 0 : index
    %c0_8 = arith.constant 0 : index
    %4 = vector.load %arg6[%c0_7, %c0_8] : memref<1x64xf32, #tpu.memory_space<vmem>>, vector<1x64xf32>
    %c0_9 = arith.constant 0 : index
    %c0_10 = arith.constant 0 : index
    %5 = vector.load %arg7[%c0_9, %c0_10] : memref<64x64xf32, #tpu.memory_space<vmem>>, vector<64x64xf32>
    %c0_11 = arith.constant 0 : index
    %c0_12 = arith.constant 0 : index
    %6 = vector.load %arg8[%c0_11, %c0_12] : memref<1x64xf32, #tpu.memory_space<vmem>>, vector<1x64xf32>
    %7 = arith.truncf %0 : vector<16x33xf32> to vector<16x33xbf16>
    %8 = arith.truncf %1 : vector<33x64xf32> to vector<33x64xbf16>
    %cst = arith.constant dense<0.000000e+00> : vector<16x64xf32>
    %9 = tpu.matmul %7, %8, %cst {dimension_numbers = #tpu.dot_dimension_numbers<[1], [0], [0], [1], [0, 0, 1, 1], [], []>} : vector<16x33xbf16>, vector<33x64xbf16>, vector<16x64xf32> -> vector<16x64xf32>
    %10 = vector.broadcast %2 : vector<1x64xf32> to vector<16x64xf32>
    %11 = arith.addf %9, %10 : vector<16x64xf32>
    %cst_13 = arith.constant 0.000000e+00 : f32
    %12 = vector.broadcast %cst_13 : f32 to vector<16x64xf32>
    %13 = arith.maximumf %11, %12 : vector<16x64xf32>
    %14 = arith.truncf %13 : vector<16x64xf32> to vector<16x64xbf16>
    %15 = arith.truncf %3 : vector<64x64xf32> to vector<64x64xbf16>
    %cst_14 = arith.constant dense<0.000000e+00> : vector<16x64xf32>
    %16 = tpu.matmul %14, %15, %cst_14 {dimension_numbers = #tpu.dot_dimension_numbers<[1], [0], [0], [1], [0, 0, 1, 1], [], []>} : vector<16x64xbf16>, vector<64x64xbf16>, vector<16x64xf32> -> vector<16x64xf32>
    %17 = vector.broadcast %4 : vector<1x64xf32> to vector<16x64xf32>
    %18 = arith.addf %16, %17 : vector<16x64xf32>
    %cst_15 = arith.constant 0.000000e+00 : f32
    %19 = vector.broadcast %cst_15 : f32 to vector<16x64xf32>
    %20 = arith.maximumf %18, %19 : vector<16x64xf32>
    %21 = arith.truncf %20 : vector<16x64xf32> to vector<16x64xbf16>
    %22 = arith.truncf %5 : vector<64x64xf32> to vector<64x64xbf16>
    %cst_16 = arith.constant dense<0.000000e+00> : vector<16x64xf32>
    %23 = tpu.matmul %21, %22, %cst_16 {dimension_numbers = #tpu.dot_dimension_numbers<[1], [0], [0], [1], [0, 0, 1, 1], [], []>} : vector<16x64xbf16>, vector<64x64xbf16>, vector<16x64xf32> -> vector<16x64xf32>
    %24 = vector.broadcast %6 : vector<1x64xf32> to vector<16x64xf32>
    %25 = arith.addf %23, %24 : vector<16x64xf32>
    %c0_17 = arith.constant 0 : index
    %c0_18 = arith.constant 0 : index
    %26 = vector.load %arg21[%c0_17, %c0_18] : memref<16x64xf32, #tpu.memory_space<vmem>>, vector<16x64xf32>
    tpu.vector_store %arg21[%c0_17, %c0_18], %25 {strides = array<i32>} : memref<16x64xf32, #tpu.memory_space<vmem>>, vector<16x64xf32>,
    %c0_19 = arith.constant 0 : index
    %c0_20 = arith.constant 0 : index
    %27 = vector.load %arg1[%c0_19, %c0_20] : memref<112x1xf32, #tpu.memory_space<vmem>>, vector<112x1xf32>
    %c0_21 = arith.constant 0 : index
    %c0_22 = arith.constant 0 : index
    %28 = vector.load %arg9[%c0_21, %c0_22] : memref<1x32xf32, #tpu.memory_space<vmem>>, vector<1x32xf32>
    %c0_23 = arith.constant 0 : index
    %c0_24 = arith.constant 0 : index
    %29 = vector.load %arg10[%c0_23, %c0_24] : memref<1x32xf32, #tpu.memory_space<vmem>>, vector<1x32xf32>
    %c0_25 = arith.constant 0 : index
    %c0_26 = arith.constant 0 : index
    %30 = vector.load %arg11[%c0_25, %c0_26] : memref<32x32xf32, #tpu.memory_space<vmem>>, vector<32x32xf32>
    %c0_27 = arith.constant 0 : index
    %c0_28 = arith.constant 0 : index
    %31 = vector.load %arg12[%c0_27, %c0_28] : memref<1x32xf32, #tpu.memory_space<vmem>>, vector<1x32xf32>
    %c0_29 = arith.constant 0 : index
    %c0_30 = arith.constant 0 : index
    %32 = vector.load %arg13[%c0_29, %c0_30] : memref<32x32xf32, #tpu.memory_space<vmem>>, vector<32x32xf32>
    %c0_31 = arith.constant 0 : index
    %c0_32 = arith.constant 0 : index
    %33 = vector.load %arg14[%c0_31, %c0_32] : memref<1x32xf32, #tpu.memory_space<vmem>>, vector<1x32xf32>
    %34 = arith.truncf %27 : vector<112x1xf32> to vector<112x1xbf16>
    %35 = arith.truncf %28 : vector<1x32xf32> to vector<1x32xbf16>
    %cst_33 = arith.constant dense<0.000000e+00> : vector<112x32xf32>
    %36 = tpu.matmul %34, %35, %cst_33 {dimension_numbers = #tpu.dot_dimension_numbers<[1], [0], [0], [1], [0, 0, 1, 1], [], []>} : vector<112x1xbf16>, vector<1x32xbf16>, vector<112x32xf32> -> vector<112x32xf32>
    %37 = vector.broadcast %29 : vector<1x32xf32> to vector<112x32xf32>
    %38 = arith.addf %36, %37 : vector<112x32xf32>
    %cst_34 = arith.constant 0.000000e+00 : f32
    %39 = vector.broadcast %cst_34 : f32 to vector<112x32xf32>
    %40 = arith.maximumf %38, %39 : vector<112x32xf32>
    %41 = arith.truncf %40 : vector<112x32xf32> to vector<112x32xbf16>
    %42 = arith.truncf %30 : vector<32x32xf32> to vector<32x32xbf16>
    %cst_35 = arith.constant dense<0.000000e+00> : vector<112x32xf32>
    %43 = tpu.matmul %41, %42, %cst_35 {dimension_numbers = #tpu.dot_dimension_numbers<[1], [0], [0], [1], [0, 0, 1, 1], [], []>} : vector<112x32xbf16>, vector<32x32xbf16>, vector<112x32xf32> -> vector<112x32xf32>
    %44 = vector.broadcast %31 : vector<1x32xf32> to vector<112x32xf32>
    %45 = arith.addf %43, %44 : vector<112x32xf32>
    %cst_36 = arith.constant 0.000000e+00 : f32
    %46 = vector.broadcast %cst_36 : f32 to vector<112x32xf32>
    %47 = arith.maximumf %45, %46 : vector<112x32xf32>
    %48 = arith.truncf %47 : vector<112x32xf32> to vector<112x32xbf16>
    %49 = arith.truncf %32 : vector<32x32xf32> to vector<32x32xbf16>
    %cst_37 = arith.constant dense<0.000000e+00> : vector<112x32xf32>
    %50 = tpu.matmul %48, %49, %cst_37 {dimension_numbers = #tpu.dot_dimension_numbers<[1], [0], [0], [1], [0, 0, 1, 1], [], []>} : vector<112x32xbf16>, vector<32x32xbf16>, vector<112x32xf32> -> vector<112x32xf32>
    %51 = vector.broadcast %33 : vector<1x32xf32> to vector<112x32xf32>
    %52 = arith.addf %50, %51 : vector<112x32xf32>
    %c0_38 = arith.constant 0 : index
    %c0_39 = arith.constant 0 : index
    %53 = vector.load %arg22[%c0_38, %c0_39] : memref<112x32xf32, #tpu.memory_space<vmem>>, vector<112x32xf32>
    tpu.vector_store %arg22[%c0_38, %c0_39], %52 {strides = array<i32>} : memref<112x32xf32, #tpu.memory_space<vmem>>, vector<112x32xf32>,
    %c0_40 = arith.constant 0 : index
    %c0_41 = arith.constant 0 : index
    %54 = vector.load %arg2[%c0_40, %c0_41] : memref<38x1xf32, #tpu.memory_space<vmem>>, vector<38x1xf32>
    %c0_42 = arith.constant 0 : index
    %c0_43 = arith.constant 0 : index
    %55 = vector.load %arg15[%c0_42, %c0_43] : memref<1x32xf32, #tpu.memory_space<vmem>>, vector<1x32xf32>
    %c0_44 = arith.constant 0 : index
    %c0_45 = arith.constant 0 : index
    %56 = vector.load %arg16[%c0_44, %c0_45] : memref<1x32xf32, #tpu.memory_space<vmem>>, vector<1x32xf32>
    %c0_46 = arith.constant 0 : index
    %c0_47 = arith.constant 0 : index
    %57 = vector.load %arg17[%c0_46, %c0_47] : memref<32x32xf32, #tpu.memory_space<vmem>>, vector<32x32xf32>
    %c0_48 = arith.constant 0 : index
    %c0_49 = arith.constant 0 : index
    %58 = vector.load %arg18[%c0_48, %c0_49] : memref<1x32xf32, #tpu.memory_space<vmem>>, vector<1x32xf32>
    %c0_50 = arith.constant 0 : index
    %c0_51 = arith.constant 0 : index
    %59 = vector.load %arg19[%c0_50, %c0_51] : memref<32x32xf32, #tpu.memory_space<vmem>>, vector<32x32xf32>
    %c0_52 = arith.constant 0 : index
    %c0_53 = arith.constant 0 : index
    %60 = vector.load %arg20[%c0_52, %c0_53] : memref<1x32xf32, #tpu.memory_space<vmem>>, vector<1x32xf32>
    %61 = arith.truncf %54 : vector<38x1xf32> to vector<38x1xbf16>
    %62 = arith.truncf %55 : vector<1x32xf32> to vector<1x32xbf16>
    %cst_54 = arith.constant dense<0.000000e+00> : vector<38x32xf32>
    %63 = tpu.matmul %61, %62, %cst_54 {dimension_numbers = #tpu.dot_dimension_numbers<[1], [0], [0], [1], [0, 0, 1, 1], [], []>} : vector<38x1xbf16>, vector<1x32xbf16>, vector<38x32xf32> -> vector<38x32xf32>
    %64 = vector.broadcast %56 : vector<1x32xf32> to vector<38x32xf32>
    %65 = arith.addf %63, %64 : vector<38x32xf32>
    %cst_55 = arith.constant 0.000000e+00 : f32
    %66 = vector.broadcast %cst_55 : f32 to vector<38x32xf32>
    %67 = arith.maximumf %65, %66 : vector<38x32xf32>
    %68 = arith.truncf %67 : vector<38x32xf32> to vector<38x32xbf16>
    %69 = arith.truncf %57 : vector<32x32xf32> to vector<32x32xbf16>
    %cst_56 = arith.constant dense<0.000000e+00> : vector<38x32xf32>
    %70 = tpu.matmul %68, %69, %cst_56 {dimension_numbers = #tpu.dot_dimension_numbers<[1], [0], [0], [1], [0, 0, 1, 1], [], []>} : vector<38x32xbf16>, vector<32x32xbf16>, vector<38x32xf32> -> vector<38x32xf32>
    %71 = vector.broadcast %58 : vector<1x32xf32> to vector<38x32xf32>
    %72 = arith.addf %70, %71 : vector<38x32xf32>
    %cst_57 = arith.constant 0.000000e+00 : f32
    %73 = vector.broadcast %cst_57 : f32 to vector<38x32xf32>
    %74 = arith.maximumf %72, %73 : vector<38x32xf32>
    %75 = arith.truncf %74 : vector<38x32xf32> to vector<38x32xbf16>
    %76 = arith.truncf %59 : vector<32x32xf32> to vector<32x32xbf16>
    %cst_58 = arith.constant dense<0.000000e+00> : vector<38x32xf32>
    %77 = tpu.matmul %75, %76, %cst_58 {dimension_numbers = #tpu.dot_dimension_numbers<[1], [0], [0], [1], [0, 0, 1, 1], [], []>} : vector<38x32xbf16>, vector<32x32xbf16>, vector<38x32xf32> -> vector<38x32xf32>
    %78 = vector.broadcast %60 : vector<1x32xf32> to vector<38x32xf32>
    %79 = arith.addf %77, %78 : vector<38x32xf32>
    %c0_59 = arith.constant 0 : index
    %c0_60 = arith.constant 0 : index
    %80 = vector.load %arg23[%c0_59, %c0_60] : memref<38x32xf32, #tpu.memory_space<vmem>>, vector<38x32xf32>
    tpu.vector_store %arg23[%c0_59, %c0_60], %79 {strides = array<i32>} : memref<38x32xf32, #tpu.memory_space<vmem>>, vector<38x32xf32>,
    return
  }
}

module attributes {stable_mosaic.version = 11 : i64} {
  func.func @_layers_kernel(%arg0: i32, %arg1: memref<16x64xf32, #tpu.memory_space<vmem>>, %arg2: memref<112x32xf32, #tpu.memory_space<vmem>>, %arg3: memref<38x32xf32, #tpu.memory_space<vmem>>, %arg4: memref<112x1xi32, #tpu.memory_space<vmem>>, %arg5: memref<112x1xi32, #tpu.memory_space<vmem>>, %arg6: memref<1x112xi32, #tpu.memory_space<vmem>>, %arg7: memref<38x1xi32, #tpu.memory_space<vmem>>, %arg8: memref<38x1xi32, #tpu.memory_space<vmem>>, %arg9: memref<1x38xi32, #tpu.memory_space<vmem>>, %arg10: memref<16x1xi32, #tpu.memory_space<vmem>>, %arg11: memref<1x16xi32, #tpu.memory_space<vmem>>, %arg12: memref<2x1xf32, #tpu.memory_space<vmem>>, %arg13: memref<1x64x128xf32, #tpu.memory_space<vmem>>, %arg14: memref<1x1x128xf32, #tpu.memory_space<vmem>>, %arg15: memref<1x32x32xf32, #tpu.memory_space<vmem>>, %arg16: memref<1x3x32xf32, #tpu.memory_space<vmem>>, %arg17: memref<1x64x128xf32, #tpu.memory_space<vmem>>, %arg18: memref<1x1x128xf32, #tpu.memory_space<vmem>>, %arg19: memref<1x32x32xf32, #tpu.memory_space<vmem>>, %arg20: memref<1x3x32xf32, #tpu.memory_space<vmem>>, %arg21: memref<1x32x32xf32, #tpu.memory_space<vmem>>, %arg22: memref<1x32x32xf32, #tpu.memory_space<vmem>>, %arg23: memref<1x32x32xf32, #tpu.memory_space<vmem>>, %arg24: memref<1x3x32xf32, #tpu.memory_space<vmem>>, %arg25: memref<64x32xf32, #tpu.memory_space<vmem>>, %arg26: memref<1x32xf32, #tpu.memory_space<vmem>>, %arg27: memref<32x32xf32, #tpu.memory_space<vmem>>, %arg28: memref<1x32xf32, #tpu.memory_space<vmem>>, %arg29: memref<32x1xf32, #tpu.memory_space<vmem>>, %arg30: memref<1x1xf32, #tpu.memory_space<vmem>>, %arg31: memref<112x1xf32, #tpu.memory_space<vmem>>, %arg32: memref<16x64xf32, #tpu.memory_space<vmem>>, %arg33: memref<16x64xf32, #tpu.memory_space<vmem>>, %arg34: memref<112x32xf32, #tpu.memory_space<vmem>>, %arg35: memref<38x32xf32, #tpu.memory_space<vmem>>, %arg36: memref<16x2xf32, #tpu.memory_space<vmem>>, %arg37: memref<2x16xf32, #tpu.memory_space<vmem>>, %arg38: memref<112x16xbf16, #tpu.memory_space<vmem>>, %arg39: memref<112x16xbf16, #tpu.memory_space<vmem>>, %arg40: memref<16x112xbf16, #tpu.memory_space<vmem>>, %arg41: memref<38x16xbf16, #tpu.memory_space<vmem>>, %arg42: memref<38x16xbf16, #tpu.memory_space<vmem>>, %arg43: memref<16x38xbf16, #tpu.memory_space<vmem>>) attributes {dimension_semantics = [#tpu.dimension_semantics<arbitrary>], iteration_bounds = array<i64: 2>, scalar_prefetch = 0 : i64, scratch_operands = 12 : i64, tpu.core_type = #tpu.core_type<tc>, window_params = [{pipeline_mode = #tpu.pipeline_mode<synchronous>, transform_indices = @transform_0, window_bounds = array<i64: 16, 64>}, {pipeline_mode = #tpu.pipeline_mode<synchronous>, transform_indices = @transform_1, window_bounds = array<i64: 112, 32>}, {pipeline_mode = #tpu.pipeline_mode<synchronous>, transform_indices = @transform_2, window_bounds = array<i64: 38, 32>}, {pipeline_mode = #tpu.pipeline_mode<synchronous>, transform_indices = @transform_3, window_bounds = array<i64: 112, 1>}, {pipeline_mode = #tpu.pipeline_mode<synchronous>, transform_indices = @transform_4, window_bounds = array<i64: 112, 1>}, {pipeline_mode = #tpu.pipeline_mode<synchronous>, transform_indices = @transform_5, window_bounds = array<i64: 1, 112>}, {pipeline_mode = #tpu.pipeline_mode<synchronous>, transform_indices = @transform_6, window_bounds = array<i64: 38, 1>}, {pipeline_mode = #tpu.pipeline_mode<synchronous>, transform_indices = @transform_7, window_bounds = array<i64: 38, 1>}, {pipeline_mode = #tpu.pipeline_mode<synchronous>, transform_indices = @transform_8, window_bounds = array<i64: 1, 38>}, {pipeline_mode = #tpu.pipeline_mode<synchronous>, transform_indices = @transform_9, window_bounds = array<i64: 16, 1>}, {pipeline_mode = #tpu.pipeline_mode<synchronous>, transform_indices = @transform_10, window_bounds = array<i64: 1, 16>}, {pipeline_mode = #tpu.pipeline_mode<synchronous>, transform_indices = @transform_11, window_bounds = array<i64: 2, 1>}, {transform_indices = @transform_12, window_bounds = array<i64: 1, 64, 128>}, {transform_indices = @transform_13, window_bounds = array<i64: 1, 1, 128>}, {transform_indices = @transform_14, window_bounds = array<i64: 1, 32, 32>}, {transform_indices = @transform_15, window_bounds = array<i64: 1, 3, 32>}, {transform_indices = @transform_16, window_bounds = array<i64: 1, 64, 128>}, {transform_indices = @transform_17, window_bounds = array<i64: 1, 1, 128>}, {transform_indices = @transform_18, window_bounds = array<i64: 1, 32, 32>}, {transform_indices = @transform_19, window_bounds = array<i64: 1, 3, 32>}, {transform_indices = @transform_20, window_bounds = array<i64: 1, 32, 32>}, {transform_indices = @transform_21, window_bounds = array<i64: 1, 32, 32>}, {transform_indices = @transform_22, window_bounds = array<i64: 1, 32, 32>}, {transform_indices = @transform_23, window_bounds = array<i64: 1, 3, 32>}, {pipeline_mode = #tpu.pipeline_mode<synchronous>, transform_indices = @transform_24, window_bounds = array<i64: 64, 32>}, {pipeline_mode = #tpu.pipeline_mode<synchronous>, transform_indices = @transform_25, window_bounds = array<i64: 1, 32>}, {pipeline_mode = #tpu.pipeline_mode<synchronous>, transform_indices = @transform_26, window_bounds = array<i64: 32, 32>}, {pipeline_mode = #tpu.pipeline_mode<synchronous>, transform_indices = @transform_27, window_bounds = array<i64: 1, 32>}, {pipeline_mode = #tpu.pipeline_mode<synchronous>, transform_indices = @transform_28, window_bounds = array<i64: 32, 1>}, {pipeline_mode = #tpu.pipeline_mode<synchronous>, transform_indices = @transform_29, window_bounds = array<i64: 1, 1>}, {pipeline_mode = #tpu.pipeline_mode<synchronous>, transform_indices = @transform_30, window_bounds = array<i64: 112, 1>}]} {
    %c0_i32 = arith.constant 0 : i32
    %0 = arith.cmpi eq, %arg0, %c0_i32 : i32
    %1 = arith.extui %0 : i1 to i32
    %c0_i32_0 = arith.constant 0 : i32
    %2 = arith.cmpi ne, %1, %c0_i32_0 : i32
    scf.if %2 {
      %c0_124 = arith.constant 0 : index
      %c0_125 = arith.constant 0 : index
      %256 = vector.load %arg1[%c0_124, %c0_125] : memref<16x64xf32, #tpu.memory_space<vmem>>, vector<16x64xf32>
      %c0_126 = arith.constant 0 : index
      %c0_127 = arith.constant 0 : index
      %257 = vector.load %arg32[%c0_126, %c0_127] : memref<16x64xf32, #tpu.memory_space<vmem>>, vector<16x64xf32>
      tpu.vector_store %arg32[%c0_126, %c0_127], %256 {strides = array<i32>} : memref<16x64xf32, #tpu.memory_space<vmem>>, vector<16x64xf32>,
      %cst_128 = arith.constant 0.000000e+00 : f32
      %258 = vector.broadcast %cst_128 : f32 to vector<16x64xf32>
      %c0_129 = arith.constant 0 : index
      %c0_130 = arith.constant 0 : index
      %259 = vector.load %arg33[%c0_129, %c0_130] : memref<16x64xf32, #tpu.memory_space<vmem>>, vector<16x64xf32>
      tpu.vector_store %arg33[%c0_129, %c0_130], %258 {strides = array<i32>} : memref<16x64xf32, #tpu.memory_space<vmem>>, vector<16x64xf32>,
      %c0_131 = arith.constant 0 : index
      %c0_132 = arith.constant 0 : index
      %260 = vector.load %arg2[%c0_131, %c0_132] : memref<112x32xf32, #tpu.memory_space<vmem>>, vector<112x32xf32>
      %c0_133 = arith.constant 0 : index
      %c0_134 = arith.constant 0 : index
      %261 = vector.load %arg34[%c0_133, %c0_134] : memref<112x32xf32, #tpu.memory_space<vmem>>, vector<112x32xf32>
      tpu.vector_store %arg34[%c0_133, %c0_134], %260 {strides = array<i32>} : memref<112x32xf32, #tpu.memory_space<vmem>>, vector<112x32xf32>,
      %c0_135 = arith.constant 0 : index
      %c0_136 = arith.constant 0 : index
      %262 = vector.load %arg3[%c0_135, %c0_136] : memref<38x32xf32, #tpu.memory_space<vmem>>, vector<38x32xf32>
      %c0_137 = arith.constant 0 : index
      %c0_138 = arith.constant 0 : index
      %263 = vector.load %arg35[%c0_137, %c0_138] : memref<38x32xf32, #tpu.memory_space<vmem>>, vector<38x32xf32>
      tpu.vector_store %arg35[%c0_137, %c0_138], %262 {strides = array<i32>} : memref<38x32xf32, #tpu.memory_space<vmem>>, vector<38x32xf32>,
      %c0_139 = arith.constant 0 : index
      %c0_140 = arith.constant 0 : index
      %264 = vector.load %arg10[%c0_139, %c0_140] : memref<16x1xi32, #tpu.memory_space<vmem>>, vector<16x1xi32>
      %265 = tpu.iota {dimensions = array<i32: 1>} : vector<16x2xi32>
      %266 = vector.broadcast %264 : vector<16x1xi32> to vector<16x2xi32>
      %267 = arith.cmpi eq, %266, %265 : vector<16x2xi32>
      %268 = arith.extui %267 : vector<16x2xi1> to vector<16x2xi32>
      %269 = arith.sitofp %268 : vector<16x2xi32> to vector<16x2xf32>
      %c0_141 = arith.constant 0 : index
      %c0_142 = arith.constant 0 : index
      %270 = vector.load %arg36[%c0_141, %c0_142] : memref<16x2xf32, #tpu.memory_space<vmem>>, vector<16x2xf32>
      tpu.vector_store %arg36[%c0_141, %c0_142], %269 {strides = array<i32>} : memref<16x2xf32, #tpu.memory_space<vmem>>, vector<16x2xf32>,
      %c0_143 = arith.constant 0 : index
      %c0_144 = arith.constant 0 : index
      %271 = vector.load %arg11[%c0_143, %c0_144] : memref<1x16xi32, #tpu.memory_space<vmem>>, vector<1x16xi32>
      %272 = tpu.iota {dimensions = array<i32: 0>} : vector<2x16xi32>
      %273 = vector.broadcast %271 : vector<1x16xi32> to vector<2x16xi32>
      %274 = arith.cmpi eq, %273, %272 : vector<2x16xi32>
      %275 = arith.extui %274 : vector<2x16xi1> to vector<2x16xi32>
      %276 = arith.sitofp %275 : vector<2x16xi32> to vector<2x16xf32>
      %c0_145 = arith.constant 0 : index
      %c0_146 = arith.constant 0 : index
      %277 = vector.load %arg37[%c0_145, %c0_146] : memref<2x16xf32, #tpu.memory_space<vmem>>, vector<2x16xf32>
      tpu.vector_store %arg37[%c0_145, %c0_146], %276 {strides = array<i32>} : memref<2x16xf32, #tpu.memory_space<vmem>>, vector<2x16xf32>,
      %c0_147 = arith.constant 0 : index
      %c0_148 = arith.constant 0 : index
      %278 = vector.load %arg4[%c0_147, %c0_148] : memref<112x1xi32, #tpu.memory_space<vmem>>, vector<112x1xi32>
      %279 = tpu.iota {dimensions = array<i32: 1>} : vector<112x16xi32>
      %280 = vector.broadcast %278 : vector<112x1xi32> to vector<112x16xi32>
      %281 = arith.cmpi eq, %280, %279 : vector<112x16xi32>
      %282 = arith.extui %281 : vector<112x16xi1> to vector<112x16xi32>
      %283 = arith.sitofp %282 : vector<112x16xi32> to vector<112x16xf32>
      %284 = arith.truncf %283 : vector<112x16xf32> to vector<112x16xbf16>
      %c0_149 = arith.constant 0 : index
      %c0_150 = arith.constant 0 : index
      %285 = vector.load %arg38[%c0_149, %c0_150] : memref<112x16xbf16, #tpu.memory_space<vmem>>, vector<112x16xbf16>
      tpu.vector_store %arg38[%c0_149, %c0_150], %284 {strides = array<i32>} : memref<112x16xbf16, #tpu.memory_space<vmem>>, vector<112x16xbf16>,
      %c0_151 = arith.constant 0 : index
      %c0_152 = arith.constant 0 : index
      %286 = vector.load %arg5[%c0_151, %c0_152] : memref<112x1xi32, #tpu.memory_space<vmem>>, vector<112x1xi32>
      %287 = tpu.iota {dimensions = array<i32: 1>} : vector<112x16xi32>
      %288 = vector.broadcast %286 : vector<112x1xi32> to vector<112x16xi32>
      %289 = arith.cmpi eq, %288, %287 : vector<112x16xi32>
      %290 = arith.extui %289 : vector<112x16xi1> to vector<112x16xi32>
      %291 = arith.sitofp %290 : vector<112x16xi32> to vector<112x16xf32>
      %292 = arith.truncf %291 : vector<112x16xf32> to vector<112x16xbf16>
      %c0_153 = arith.constant 0 : index
      %c0_154 = arith.constant 0 : index
      %293 = vector.load %arg39[%c0_153, %c0_154] : memref<112x16xbf16, #tpu.memory_space<vmem>>, vector<112x16xbf16>
      tpu.vector_store %arg39[%c0_153, %c0_154], %292 {strides = array<i32>} : memref<112x16xbf16, #tpu.memory_space<vmem>>, vector<112x16xbf16>,
      %c0_155 = arith.constant 0 : index
      %c0_156 = arith.constant 0 : index
      %294 = vector.load %arg6[%c0_155, %c0_156] : memref<1x112xi32, #tpu.memory_space<vmem>>, vector<1x112xi32>
      %295 = tpu.iota {dimensions = array<i32: 0>} : vector<16x112xi32>
      %296 = vector.broadcast %294 : vector<1x112xi32> to vector<16x112xi32>
      %297 = arith.cmpi eq, %296, %295 : vector<16x112xi32>
      %298 = arith.extui %297 : vector<16x112xi1> to vector<16x112xi32>
      %299 = arith.sitofp %298 : vector<16x112xi32> to vector<16x112xf32>
      %300 = arith.truncf %299 : vector<16x112xf32> to vector<16x112xbf16>
      %c0_157 = arith.constant 0 : index
      %c0_158 = arith.constant 0 : index
      %301 = vector.load %arg40[%c0_157, %c0_158] : memref<16x112xbf16, #tpu.memory_space<vmem>>, vector<16x112xbf16>
      tpu.vector_store %arg40[%c0_157, %c0_158], %300 {strides = array<i32>} : memref<16x112xbf16, #tpu.memory_space<vmem>>, vector<16x112xbf16>,
      %c0_159 = arith.constant 0 : index
      %c0_160 = arith.constant 0 : index
      %302 = vector.load %arg7[%c0_159, %c0_160] : memref<38x1xi32, #tpu.memory_space<vmem>>, vector<38x1xi32>
      %303 = tpu.iota {dimensions = array<i32: 1>} : vector<38x16xi32>
      %304 = vector.broadcast %302 : vector<38x1xi32> to vector<38x16xi32>
      %305 = arith.cmpi eq, %304, %303 : vector<38x16xi32>
      %306 = arith.extui %305 : vector<38x16xi1> to vector<38x16xi32>
      %307 = arith.sitofp %306 : vector<38x16xi32> to vector<38x16xf32>
      %308 = arith.truncf %307 : vector<38x16xf32> to vector<38x16xbf16>
      %c0_161 = arith.constant 0 : index
      %c0_162 = arith.constant 0 : index
      %309 = vector.load %arg41[%c0_161, %c0_162] : memref<38x16xbf16, #tpu.memory_space<vmem>>, vector<38x16xbf16>
      tpu.vector_store %arg41[%c0_161, %c0_162], %308 {strides = array<i32>} : memref<38x16xbf16, #tpu.memory_space<vmem>>, vector<38x16xbf16>,
      %c0_163 = arith.constant 0 : index
      %c0_164 = arith.constant 0 : index
      %310 = vector.load %arg8[%c0_163, %c0_164] : memref<38x1xi32, #tpu.memory_space<vmem>>, vector<38x1xi32>
      %311 = tpu.iota {dimensions = array<i32: 1>} : vector<38x16xi32>
      %312 = vector.broadcast %310 : vector<38x1xi32> to vector<38x16xi32>
      %313 = arith.cmpi eq, %312, %311 : vector<38x16xi32>
      %314 = arith.extui %313 : vector<38x16xi1> to vector<38x16xi32>
      %315 = arith.sitofp %314 : vector<38x16xi32> to vector<38x16xf32>
      %316 = arith.truncf %315 : vector<38x16xf32> to vector<38x16xbf16>
      %c0_165 = arith.constant 0 : index
      %c0_166 = arith.constant 0 : index
      %317 = vector.load %arg42[%c0_165, %c0_166] : memref<38x16xbf16, #tpu.memory_space<vmem>>, vector<38x16xbf16>
      tpu.vector_store %arg42[%c0_165, %c0_166], %316 {strides = array<i32>} : memref<38x16xbf16, #tpu.memory_space<vmem>>, vector<38x16xbf16>,
      %c0_167 = arith.constant 0 : index
      %c0_168 = arith.constant 0 : index
      %318 = vector.load %arg9[%c0_167, %c0_168] : memref<1x38xi32, #tpu.memory_space<vmem>>, vector<1x38xi32>
      %319 = tpu.iota {dimensions = array<i32: 0>} : vector<16x38xi32>
      %320 = vector.broadcast %318 : vector<1x38xi32> to vector<16x38xi32>
      %321 = arith.cmpi eq, %320, %319 : vector<16x38xi32>
      %322 = arith.extui %321 : vector<16x38xi1> to vector<16x38xi32>
      %323 = arith.sitofp %322 : vector<16x38xi32> to vector<16x38xf32>
      %324 = arith.truncf %323 : vector<16x38xf32> to vector<16x38xbf16>
      %c0_169 = arith.constant 0 : index
      %c0_170 = arith.constant 0 : index
      %325 = vector.load %arg43[%c0_169, %c0_170] : memref<16x38xbf16, #tpu.memory_space<vmem>>, vector<16x38xbf16>
      tpu.vector_store %arg43[%c0_169, %c0_170], %324 {strides = array<i32>} : memref<16x38xbf16, #tpu.memory_space<vmem>>, vector<16x38xbf16>,
    } else {
    }
    %c0 = arith.constant 0 : index
    %c0_1 = arith.constant 0 : index
    %3 = vector.load %arg12[%c0, %c0_1] : memref<2x1xf32, #tpu.memory_space<vmem>>, vector<2x1xf32>
    %c0_2 = arith.constant 0 : index
    %c0_3 = arith.constant 0 : index
    %4 = vector.load %arg36[%c0_2, %c0_3] : memref<16x2xf32, #tpu.memory_space<vmem>>, vector<16x2xf32>
    %c0_4 = arith.constant 0 : index
    %c0_5 = arith.constant 0 : index
    %5 = vector.load %arg37[%c0_4, %c0_5] : memref<2x16xf32, #tpu.memory_space<vmem>>, vector<2x16xf32>
    %c0_6 = arith.constant 0 : index
    %c0_7 = arith.constant 0 : index
    %6 = vector.load %arg32[%c0_6, %c0_7] : memref<16x64xf32, #tpu.memory_space<vmem>>, vector<16x64xf32>
    %c0_8 = arith.constant 0 : index
    %c0_9 = arith.constant 0 : index
    %7 = vector.load %arg33[%c0_8, %c0_9] : memref<16x64xf32, #tpu.memory_space<vmem>>, vector<16x64xf32>
    %8 = arith.addf %6, %7 : vector<16x64xf32>
    %c0_10 = arith.constant 0 : index
    %c0_11 = arith.constant 0 : index
    %9 = vector.load %arg34[%c0_10, %c0_11] : memref<112x32xf32, #tpu.memory_space<vmem>>, vector<112x32xf32>
    %c0_12 = arith.constant 0 : index
    %c0_13 = arith.constant 0 : index
    %10 = vector.load %arg38[%c0_12, %c0_13] : memref<112x16xbf16, #tpu.memory_space<vmem>>, vector<112x16xbf16>
    %c0_14 = arith.constant 0 : index
    %c0_15 = arith.constant 0 : index
    %11 = vector.load %arg39[%c0_14, %c0_15] : memref<112x16xbf16, #tpu.memory_space<vmem>>, vector<112x16xbf16>
    %c0_16 = arith.constant 0 : index
    %c0_17 = arith.constant 0 : index
    %12 = vector.load %arg40[%c0_16, %c0_17] : memref<16x112xbf16, #tpu.memory_space<vmem>>, vector<16x112xbf16>
    %c0_18 = arith.constant 0 : index
    %c0_19 = arith.constant 0 : index
    %c0_20 = arith.constant 0 : index
    %13 = vector.load %arg13[%c0_18, %c0_19, %c0_20] : memref<1x64x128xf32, #tpu.memory_space<vmem>>, vector<1x64x128xf32>
    %14 = vector.shape_cast %13 : vector<1x64x128xf32> to vector<64x128xf32>
    %c0_21 = arith.constant 0 : index
    %c0_22 = arith.constant 0 : index
    %c0_23 = arith.constant 0 : index
    %15 = vector.load %arg14[%c0_21, %c0_22, %c0_23] : memref<1x1x128xf32, #tpu.memory_space<vmem>>, vector<1x1x128xf32>
    %16 = vector.shape_cast %15 : vector<1x1x128xf32> to vector<1x128xf32>
    %c0_24 = arith.constant 0 : index
    %c0_25 = arith.constant 0 : index
    %c0_26 = arith.constant 0 : index
    %17 = vector.load %arg15[%c0_24, %c0_25, %c0_26] : memref<1x32x32xf32, #tpu.memory_space<vmem>>, vector<1x32x32xf32>
    %18 = vector.shape_cast %17 : vector<1x32x32xf32> to vector<32x32xf32>
    %c0_27 = arith.constant 0 : index
    %c0_28 = arith.constant 0 : index
    %c0_29 = arith.constant 0 : index
    %19 = vector.load %arg16[%c0_27, %c0_28, %c0_29] : memref<1x3x32xf32, #tpu.memory_space<vmem>>, vector<1x3x32xf32>
    %20 = vector.shape_cast %19 : vector<1x3x32xf32> to vector<3x32xf32>
    %21 = vector.extract_strided_slice %20 {offsets = [0, 0], sizes = [1, 32], strides = [1, 1]} : vector<3x32xf32> to vector<1x32xf32>
    %22 = vector.extract_strided_slice %20 {offsets = [1, 0], sizes = [1, 32], strides = [1, 1]} : vector<3x32xf32> to vector<1x32xf32>
    %23 = vector.extract_strided_slice %20 {offsets = [2, 0], sizes = [1, 32], strides = [1, 1]} : vector<3x32xf32> to vector<1x32xf32>
    %24 = arith.truncf %8 : vector<16x64xf32> to vector<16x64xbf16>
    %25 = arith.truncf %14 : vector<64x128xf32> to vector<64x128xbf16>
    %cst = arith.constant dense<0.000000e+00> : vector<16x128xf32>
    %26 = tpu.matmul %24, %25, %cst {dimension_numbers = #tpu.dot_dimension_numbers<[1], [0], [0], [1], [0, 0, 1, 1], [], []>} : vector<16x64xbf16>, vector<64x128xbf16>, vector<16x128xf32> -> vector<16x128xf32>
    %27 = vector.broadcast %16 : vector<1x128xf32> to vector<16x128xf32>
    %28 = arith.addf %26, %27 : vector<16x128xf32>
    %29 = vector.extract_strided_slice %28 {offsets = [0, 0], sizes = [16, 32], strides = [1, 1]} : vector<16x128xf32> to vector<16x32xf32>
    %30 = vector.extract_strided_slice %28 {offsets = [0, 32], sizes = [16, 64], strides = [1, 1]} : vector<16x128xf32> to vector<16x64xf32>
    %31 = vector.extract_strided_slice %28 {offsets = [0, 96], sizes = [16, 32], strides = [1, 1]} : vector<16x128xf32> to vector<16x32xf32>
    %32 = arith.truncf %9 : vector<112x32xf32> to vector<112x32xbf16>
    %33 = arith.truncf %18 : vector<32x32xf32> to vector<32x32xbf16>
    %cst_30 = arith.constant dense<0.000000e+00> : vector<112x32xf32>
    %34 = tpu.matmul %32, %33, %cst_30 {dimension_numbers = #tpu.dot_dimension_numbers<[1], [0], [0], [1], [0, 0, 1, 1], [], []>} : vector<112x32xbf16>, vector<32x32xbf16>, vector<112x32xf32> -> vector<112x32xf32>
    %35 = arith.truncf %30 : vector<16x64xf32> to vector<16x64xbf16>
    %cst_31 = arith.constant dense<0.000000e+00> : vector<112x64xf32>
    %36 = tpu.matmul %10, %35, %cst_31 {dimension_numbers = #tpu.dot_dimension_numbers<[1], [0], [0], [1], [0, 0, 1, 1], [], []>} : vector<112x16xbf16>, vector<16x64xbf16>, vector<112x64xf32> -> vector<112x64xf32>
    %37 = vector.extract_strided_slice %36 {offsets = [0, 0], sizes = [112, 32], strides = [1, 1]} : vector<112x64xf32> to vector<112x32xf32>
    %38 = arith.addf %37, %34 : vector<112x32xf32>
    %39 = vector.extract_strided_slice %36 {offsets = [0, 32], sizes = [112, 32], strides = [1, 1]} : vector<112x64xf32> to vector<112x32xf32>
    %40 = arith.addf %39, %34 : vector<112x32xf32>
    %41 = arith.truncf %29 : vector<16x32xf32> to vector<16x32xbf16>
    %cst_32 = arith.constant dense<0.000000e+00> : vector<112x32xf32>
    %42 = tpu.matmul %11, %41, %cst_32 {dimension_numbers = #tpu.dot_dimension_numbers<[1], [0], [0], [1], [0, 0, 1, 1], [], []>} : vector<112x16xbf16>, vector<16x32xbf16>, vector<112x32xf32> -> vector<112x32xf32>
    %43 = arith.mulf %42, %38 : vector<112x32xf32>
    %cst_33 = arith.constant dense<0.000000e+00> : vector<112xf32>
    %44 = vector.multi_reduction <add>, %43, %cst_33 [1] : vector<112x32xf32> to vector<112xf32>
    %45 = vector.shape_cast %44 : vector<112xf32> to vector<112x1xf32>
    %cst_34 = arith.constant 0.176776692 : f32
    %46 = vector.broadcast %cst_34 : f32 to vector<112x1xf32>
    %47 = arith.mulf %45, %46 : vector<112x1xf32>
    %cst_35 = arith.constant 0.000000e+00 : bf16
    %48 = vector.broadcast %cst_35 : bf16 to vector<112x16xbf16>
    %49 = arith.cmpf one, %11, %48 : vector<112x16xbf16>
    %cst_36 = arith.constant -1.000000e+30 : f32
    %50 = vector.shape_cast %47 : vector<112x1xf32> to vector<112x1xf32>
    %51 = vector.broadcast %50 : vector<112x1xf32> to vector<112x16xf32>
    %52 = vector.broadcast %cst_36 : f32 to vector<112x16xf32>
    %53 = arith.select %49, %51, %52 : vector<112x16xi1>, vector<112x16xf32>
    %cst_37 = arith.constant dense<0xFF800000> : vector<16xf32>
    %54 = vector.multi_reduction <maximumf>, %53, %cst_37 [0] : vector<112x16xf32> to vector<16xf32>
    %55 = vector.shape_cast %54 : vector<16xf32> to vector<1x16xf32>
    %56 = arith.extf %11 : vector<112x16xbf16> to vector<112x16xf32>
    %57 = vector.broadcast %55 : vector<1x16xf32> to vector<112x16xf32>
    %58 = arith.mulf %56, %57 : vector<112x16xf32>
    %cst_38 = arith.constant dense<0.000000e+00> : vector<112xf32>
    %59 = vector.multi_reduction <add>, %58, %cst_38 [1] : vector<112x16xf32> to vector<112xf32>
    %60 = vector.shape_cast %59 : vector<112xf32> to vector<112x1xf32>
    %61 = arith.subf %47, %60 : vector<112x1xf32>
    %62 = math.exp %61 : vector<112x1xf32>
    %63 = vector.broadcast %62 : vector<112x1xf32> to vector<112x32xf32>
    %64 = arith.mulf %63, %40 : vector<112x32xf32>
    %65 = arith.truncf %64 : vector<112x32xf32> to vector<112x32xbf16>
    %cst_39 = arith.constant dense<0.000000e+00> : vector<16x32xf32>
    %66 = tpu.matmul %12, %65, %cst_39 {dimension_numbers = #tpu.dot_dimension_numbers<[1], [0], [0], [1], [0, 0, 1, 1], [], []>} : vector<16x112xbf16>, vector<112x32xbf16>, vector<16x32xf32> -> vector<16x32xf32>
    %67 = arith.truncf %62 : vector<112x1xf32> to vector<112x1xbf16>
    %cst_40 = arith.constant dense<0.000000e+00> : vector<16x1xf32>
    %68 = tpu.matmul %12, %67, %cst_40 {dimension_numbers = #tpu.dot_dimension_numbers<[1], [0], [0], [1], [0, 0, 1, 1], [], []>} : vector<16x112xbf16>, vector<112x1xbf16>, vector<16x1xf32> -> vector<16x1xf32>
    %cst_41 = arith.constant 9.99999968E-21 : f32
    %69 = vector.broadcast %cst_41 : f32 to vector<16x1xf32>
    %70 = arith.maximumf %68, %69 : vector<16x1xf32>
    %71 = tpu.reciprocal %70 {approx = true} : vector<16x1xf32> -> vector<16x1xf32>
    %72 = vector.broadcast %71 : vector<16x1xf32> to vector<16x32xf32>
    %73 = arith.mulf %66, %72 : vector<16x32xf32>
    %74 = arith.addf %73, %31 : vector<16x32xf32>
    %75 = arith.truncf %68 : vector<16x1xf32> to vector<16x1xbf16>
    %cst_42 = arith.constant dense<0.000000e+00> : vector<112x1xf32>
    %76 = tpu.matmul %11, %75, %cst_42 {dimension_numbers = #tpu.dot_dimension_numbers<[1], [0], [0], [1], [0, 0, 1, 1], [], []>} : vector<112x16xbf16>, vector<16x1xbf16>, vector<112x1xf32> -> vector<112x1xf32>
    %77 = tpu.reciprocal %76 {approx = true} : vector<112x1xf32> -> vector<112x1xf32>
    %78 = vector.broadcast %77 : vector<112x1xf32> to vector<112x32xf32>
    %79 = arith.mulf %64, %78 : vector<112x32xf32>
    %cst_43 = arith.constant dense<0.000000e+00> : vector<2x32xf32>
    %80 = tpu.matmul %5, %74, %cst_43 {dimension_numbers = #tpu.dot_dimension_numbers<[1], [0], [0], [1], [0, 0, 1, 1], [], []>} : vector<2x16xf32>, vector<16x32xf32>, vector<2x32xf32> -> vector<2x32xf32>
    %81 = vector.broadcast %3 : vector<2x1xf32> to vector<2x32xf32>
    %82 = arith.mulf %80, %81 : vector<2x32xf32>
    %83 = arith.mulf %74, %74 : vector<16x32xf32>
    %cst_44 = arith.constant dense<0.000000e+00> : vector<2x32xf32>
    %84 = tpu.matmul %5, %83, %cst_44 {dimension_numbers = #tpu.dot_dimension_numbers<[1], [0], [0], [1], [0, 0, 1, 1], [], []>} : vector<2x16xf32>, vector<16x32xf32>, vector<2x32xf32> -> vector<2x32xf32>
    %85 = vector.broadcast %3 : vector<2x1xf32> to vector<2x32xf32>
    %86 = arith.mulf %84, %85 : vector<2x32xf32>
    %87 = arith.mulf %82, %82 : vector<2x32xf32>
    %88 = vector.broadcast %23 : vector<1x32xf32> to vector<2x32xf32>
    %89 = arith.mulf %87, %88 : vector<2x32xf32>
    %cst_45 = arith.constant 2.000000e+00 : f32
    %90 = vector.broadcast %cst_45 : f32 to vector<1x32xf32>
    %91 = arith.subf %90, %23 : vector<1x32xf32>
    %92 = vector.broadcast %91 : vector<1x32xf32> to vector<2x32xf32>
    %93 = arith.mulf %89, %92 : vector<2x32xf32>
    %94 = arith.subf %86, %93 : vector<2x32xf32>
    %cst_46 = arith.constant 0.000000e+00 : f32
    %95 = vector.broadcast %cst_46 : f32 to vector<2x32xf32>
    %96 = arith.maximumf %94, %95 : vector<2x32xf32>
    %cst_47 = arith.constant dense<0.000000e+00> : vector<16x32xf32>
    %97 = tpu.matmul %4, %82, %cst_47 {dimension_numbers = #tpu.dot_dimension_numbers<[1], [0], [0], [1], [0, 0, 1, 1], [], []>} : vector<16x2xf32>, vector<2x32xf32>, vector<16x32xf32> -> vector<16x32xf32>
    %cst_48 = arith.constant dense<0.000000e+00> : vector<16x32xf32>
    %98 = tpu.matmul %4, %96, %cst_48 {dimension_numbers = #tpu.dot_dimension_numbers<[1], [0], [0], [1], [0, 0, 1, 1], [], []>} : vector<16x2xf32>, vector<2x32xf32>, vector<16x32xf32> -> vector<16x32xf32>
    %99 = vector.broadcast %23 : vector<1x32xf32> to vector<16x32xf32>
    %100 = arith.mulf %97, %99 : vector<16x32xf32>
    %101 = arith.subf %74, %100 : vector<16x32xf32>
    %cst_49 = arith.constant 9.99999974E-6 : f32
    %102 = vector.broadcast %cst_49 : f32 to vector<16x32xf32>
    %103 = arith.addf %98, %102 : vector<16x32xf32>
    %104 = math.rsqrt %103 : vector<16x32xf32>
    %105 = arith.mulf %101, %104 : vector<16x32xf32>
    %106 = vector.broadcast %21 : vector<1x32xf32> to vector<16x32xf32>
    %107 = arith.mulf %105, %106 : vector<16x32xf32>
    %108 = vector.broadcast %22 : vector<1x32xf32> to vector<16x32xf32>
    %109 = arith.addf %107, %108 : vector<16x32xf32>
    %c0_50 = arith.constant 0 : index
    %c0_51 = arith.constant 0 : index
    %110 = vector.load %arg35[%c0_50, %c0_51] : memref<38x32xf32, #tpu.memory_space<vmem>>, vector<38x32xf32>
    %c0_52 = arith.constant 0 : index
    %c0_53 = arith.constant 0 : index
    %111 = vector.load %arg41[%c0_52, %c0_53] : memref<38x16xbf16, #tpu.memory_space<vmem>>, vector<38x16xbf16>
    %c0_54 = arith.constant 0 : index
    %c0_55 = arith.constant 0 : index
    %112 = vector.load %arg42[%c0_54, %c0_55] : memref<38x16xbf16, #tpu.memory_space<vmem>>, vector<38x16xbf16>
    %c0_56 = arith.constant 0 : index
    %c0_57 = arith.constant 0 : index
    %113 = vector.load %arg43[%c0_56, %c0_57] : memref<16x38xbf16, #tpu.memory_space<vmem>>, vector<16x38xbf16>
    %c0_58 = arith.constant 0 : index
    %c0_59 = arith.constant 0 : index
    %c0_60 = arith.constant 0 : index
    %114 = vector.load %arg17[%c0_58, %c0_59, %c0_60] : memref<1x64x128xf32, #tpu.memory_space<vmem>>, vector<1x64x128xf32>
    %115 = vector.shape_cast %114 : vector<1x64x128xf32> to vector<64x128xf32>
    %c0_61 = arith.constant 0 : index
    %c0_62 = arith.constant 0 : index
    %c0_63 = arith.constant 0 : index
    %116 = vector.load %arg18[%c0_61, %c0_62, %c0_63] : memref<1x1x128xf32, #tpu.memory_space<vmem>>, vector<1x1x128xf32>
    %117 = vector.shape_cast %116 : vector<1x1x128xf32> to vector<1x128xf32>
    %c0_64 = arith.constant 0 : index
    %c0_65 = arith.constant 0 : index
    %c0_66 = arith.constant 0 : index
    %118 = vector.load %arg19[%c0_64, %c0_65, %c0_66] : memref<1x32x32xf32, #tpu.memory_space<vmem>>, vector<1x32x32xf32>
    %119 = vector.shape_cast %118 : vector<1x32x32xf32> to vector<32x32xf32>
    %c0_67 = arith.constant 0 : index
    %c0_68 = arith.constant 0 : index
    %c0_69 = arith.constant 0 : index
    %120 = vector.load %arg20[%c0_67, %c0_68, %c0_69] : memref<1x3x32xf32, #tpu.memory_space<vmem>>, vector<1x3x32xf32>
    %121 = vector.shape_cast %120 : vector<1x3x32xf32> to vector<3x32xf32>
    %122 = vector.extract_strided_slice %121 {offsets = [0, 0], sizes = [1, 32], strides = [1, 1]} : vector<3x32xf32> to vector<1x32xf32>
    %123 = vector.extract_strided_slice %121 {offsets = [1, 0], sizes = [1, 32], strides = [1, 1]} : vector<3x32xf32> to vector<1x32xf32>
    %124 = vector.extract_strided_slice %121 {offsets = [2, 0], sizes = [1, 32], strides = [1, 1]} : vector<3x32xf32> to vector<1x32xf32>
    %125 = arith.truncf %6 : vector<16x64xf32> to vector<16x64xbf16>
    %126 = arith.truncf %115 : vector<64x128xf32> to vector<64x128xbf16>
    %cst_70 = arith.constant dense<0.000000e+00> : vector<16x128xf32>
    %127 = tpu.matmul %125, %126, %cst_70 {dimension_numbers = #tpu.dot_dimension_numbers<[1], [0], [0], [1], [0, 0, 1, 1], [], []>} : vector<16x64xbf16>, vector<64x128xbf16>, vector<16x128xf32> -> vector<16x128xf32>
    %128 = vector.broadcast %117 : vector<1x128xf32> to vector<16x128xf32>
    %129 = arith.addf %127, %128 : vector<16x128xf32>
    %130 = vector.extract_strided_slice %129 {offsets = [0, 0], sizes = [16, 32], strides = [1, 1]} : vector<16x128xf32> to vector<16x32xf32>
    %131 = vector.extract_strided_slice %129 {offsets = [0, 32], sizes = [16, 64], strides = [1, 1]} : vector<16x128xf32> to vector<16x64xf32>
    %132 = vector.extract_strided_slice %129 {offsets = [0, 96], sizes = [16, 32], strides = [1, 1]} : vector<16x128xf32> to vector<16x32xf32>
    %133 = arith.truncf %110 : vector<38x32xf32> to vector<38x32xbf16>
    %134 = arith.truncf %119 : vector<32x32xf32> to vector<32x32xbf16>
    %cst_71 = arith.constant dense<0.000000e+00> : vector<38x32xf32>
    %135 = tpu.matmul %133, %134, %cst_71 {dimension_numbers = #tpu.dot_dimension_numbers<[1], [0], [0], [1], [0, 0, 1, 1], [], []>} : vector<38x32xbf16>, vector<32x32xbf16>, vector<38x32xf32> -> vector<38x32xf32>
    %136 = arith.truncf %131 : vector<16x64xf32> to vector<16x64xbf16>
    %cst_72 = arith.constant dense<0.000000e+00> : vector<38x64xf32>
    %137 = tpu.matmul %111, %136, %cst_72 {dimension_numbers = #tpu.dot_dimension_numbers<[1], [0], [0], [1], [0, 0, 1, 1], [], []>} : vector<38x16xbf16>, vector<16x64xbf16>, vector<38x64xf32> -> vector<38x64xf32>
    %138 = vector.extract_strided_slice %137 {offsets = [0, 0], sizes = [38, 32], strides = [1, 1]} : vector<38x64xf32> to vector<38x32xf32>
    %139 = arith.addf %138, %135 : vector<38x32xf32>
    %140 = vector.extract_strided_slice %137 {offsets = [0, 32], sizes = [38, 32], strides = [1, 1]} : vector<38x64xf32> to vector<38x32xf32>
    %141 = arith.addf %140, %135 : vector<38x32xf32>
    %142 = arith.truncf %130 : vector<16x32xf32> to vector<16x32xbf16>
    %cst_73 = arith.constant dense<0.000000e+00> : vector<38x32xf32>
    %143 = tpu.matmul %112, %142, %cst_73 {dimension_numbers = #tpu.dot_dimension_numbers<[1], [0], [0], [1], [0, 0, 1, 1], [], []>} : vector<38x16xbf16>, vector<16x32xbf16>, vector<38x32xf32> -> vector<38x32xf32>
    %144 = arith.mulf %143, %139 : vector<38x32xf32>
    %cst_74 = arith.constant dense<0.000000e+00> : vector<38xf32>
    %145 = vector.multi_reduction <add>, %144, %cst_74 [1] : vector<38x32xf32> to vector<38xf32>
    %146 = vector.shape_cast %145 : vector<38xf32> to vector<38x1xf32>
    %cst_75 = arith.constant 0.176776692 : f32
    %147 = vector.broadcast %cst_75 : f32 to vector<38x1xf32>
    %148 = arith.mulf %146, %147 : vector<38x1xf32>
    %cst_76 = arith.constant 0.000000e+00 : bf16
    %149 = vector.broadcast %cst_76 : bf16 to vector<38x16xbf16>
    %150 = arith.cmpf one, %112, %149 : vector<38x16xbf16>
    %cst_77 = arith.constant -1.000000e+30 : f32
    %151 = vector.shape_cast %148 : vector<38x1xf32> to vector<38x1xf32>
    %152 = vector.broadcast %151 : vector<38x1xf32> to vector<38x16xf32>
    %153 = vector.broadcast %cst_77 : f32 to vector<38x16xf32>
    %154 = arith.select %150, %152, %153 : vector<38x16xi1>, vector<38x16xf32>
    %cst_78 = arith.constant dense<0xFF800000> : vector<16xf32>
    %155 = vector.multi_reduction <maximumf>, %154, %cst_78 [0] : vector<38x16xf32> to vector<16xf32>
    %156 = vector.shape_cast %155 : vector<16xf32> to vector<1x16xf32>
    %157 = arith.extf %112 : vector<38x16xbf16> to vector<38x16xf32>
    %158 = vector.broadcast %156 : vector<1x16xf32> to vector<38x16xf32>
    %159 = arith.mulf %157, %158 : vector<38x16xf32>
    %cst_79 = arith.constant dense<0.000000e+00> : vector<38xf32>
    %160 = vector.multi_reduction <add>, %159, %cst_79 [1] : vector<38x16xf32> to vector<38xf32>
    %161 = vector.shape_cast %160 : vector<38xf32> to vector<38x1xf32>
    %162 = arith.subf %148, %161 : vector<38x1xf32>
    %163 = math.exp %162 : vector<38x1xf32>
    %164 = vector.broadcast %163 : vector<38x1xf32> to vector<38x32xf32>
    %165 = arith.mulf %164, %141 : vector<38x32xf32>
    %166 = arith.truncf %165 : vector<38x32xf32> to vector<38x32xbf16>
    %cst_80 = arith.constant dense<0.000000e+00> : vector<16x32xf32>
    %167 = tpu.matmul %113, %166, %cst_80 {dimension_numbers = #tpu.dot_dimension_numbers<[1], [0], [0], [1], [0, 0, 1, 1], [], []>} : vector<16x38xbf16>, vector<38x32xbf16>, vector<16x32xf32> -> vector<16x32xf32>
    %168 = arith.truncf %163 : vector<38x1xf32> to vector<38x1xbf16>
    %cst_81 = arith.constant dense<0.000000e+00> : vector<16x1xf32>
    %169 = tpu.matmul %113, %168, %cst_81 {dimension_numbers = #tpu.dot_dimension_numbers<[1], [0], [0], [1], [0, 0, 1, 1], [], []>} : vector<16x38xbf16>, vector<38x1xbf16>, vector<16x1xf32> -> vector<16x1xf32>
    %cst_82 = arith.constant 9.99999968E-21 : f32
    %170 = vector.broadcast %cst_82 : f32 to vector<16x1xf32>
    %171 = arith.maximumf %169, %170 : vector<16x1xf32>
    %172 = tpu.reciprocal %171 {approx = true} : vector<16x1xf32> -> vector<16x1xf32>
    %173 = vector.broadcast %172 : vector<16x1xf32> to vector<16x32xf32>
    %174 = arith.mulf %167, %173 : vector<16x32xf32>
    %175 = arith.addf %174, %132 : vector<16x32xf32>
    %176 = arith.truncf %169 : vector<16x1xf32> to vector<16x1xbf16>
    %cst_83 = arith.constant dense<0.000000e+00> : vector<38x1xf32>
    %177 = tpu.matmul %112, %176, %cst_83 {dimension_numbers = #tpu.dot_dimension_numbers<[1], [0], [0], [1], [0, 0, 1, 1], [], []>} : vector<38x16xbf16>, vector<16x1xbf16>, vector<38x1xf32> -> vector<38x1xf32>
    %178 = tpu.reciprocal %177 {approx = true} : vector<38x1xf32> -> vector<38x1xf32>
    %179 = vector.broadcast %178 : vector<38x1xf32> to vector<38x32xf32>
    %180 = arith.mulf %165, %179 : vector<38x32xf32>
    %cst_84 = arith.constant dense<0.000000e+00> : vector<2x32xf32>
    %181 = tpu.matmul %5, %175, %cst_84 {dimension_numbers = #tpu.dot_dimension_numbers<[1], [0], [0], [1], [0, 0, 1, 1], [], []>} : vector<2x16xf32>, vector<16x32xf32>, vector<2x32xf32> -> vector<2x32xf32>
    %182 = vector.broadcast %3 : vector<2x1xf32> to vector<2x32xf32>
    %183 = arith.mulf %181, %182 : vector<2x32xf32>
    %184 = arith.mulf %175, %175 : vector<16x32xf32>
    %cst_85 = arith.constant dense<0.000000e+00> : vector<2x32xf32>
    %185 = tpu.matmul %5, %184, %cst_85 {dimension_numbers = #tpu.dot_dimension_numbers<[1], [0], [0], [1], [0, 0, 1, 1], [], []>} : vector<2x16xf32>, vector<16x32xf32>, vector<2x32xf32> -> vector<2x32xf32>
    %186 = vector.broadcast %3 : vector<2x1xf32> to vector<2x32xf32>
    %187 = arith.mulf %185, %186 : vector<2x32xf32>
    %188 = arith.mulf %183, %183 : vector<2x32xf32>
    %189 = vector.broadcast %124 : vector<1x32xf32> to vector<2x32xf32>
    %190 = arith.mulf %188, %189 : vector<2x32xf32>
    %cst_86 = arith.constant 2.000000e+00 : f32
    %191 = vector.broadcast %cst_86 : f32 to vector<1x32xf32>
    %192 = arith.subf %191, %124 : vector<1x32xf32>
    %193 = vector.broadcast %192 : vector<1x32xf32> to vector<2x32xf32>
    %194 = arith.mulf %190, %193 : vector<2x32xf32>
    %195 = arith.subf %187, %194 : vector<2x32xf32>
    %cst_87 = arith.constant 0.000000e+00 : f32
    %196 = vector.broadcast %cst_87 : f32 to vector<2x32xf32>
    %197 = arith.maximumf %195, %196 : vector<2x32xf32>
    %cst_88 = arith.constant dense<0.000000e+00> : vector<16x32xf32>
    %198 = tpu.matmul %4, %183, %cst_88 {dimension_numbers = #tpu.dot_dimension_numbers<[1], [0], [0], [1], [0, 0, 1, 1], [], []>} : vector<16x2xf32>, vector<2x32xf32>, vector<16x32xf32> -> vector<16x32xf32>
    %cst_89 = arith.constant dense<0.000000e+00> : vector<16x32xf32>
    %199 = tpu.matmul %4, %197, %cst_89 {dimension_numbers = #tpu.dot_dimension_numbers<[1], [0], [0], [1], [0, 0, 1, 1], [], []>} : vector<16x2xf32>, vector<2x32xf32>, vector<16x32xf32> -> vector<16x32xf32>
    %200 = vector.broadcast %124 : vector<1x32xf32> to vector<16x32xf32>
    %201 = arith.mulf %198, %200 : vector<16x32xf32>
    %202 = arith.subf %175, %201 : vector<16x32xf32>
    %cst_90 = arith.constant 9.99999974E-6 : f32
    %203 = vector.broadcast %cst_90 : f32 to vector<16x32xf32>
    %204 = arith.addf %199, %203 : vector<16x32xf32>
    %205 = math.rsqrt %204 : vector<16x32xf32>
    %206 = arith.mulf %202, %205 : vector<16x32xf32>
    %207 = vector.broadcast %122 : vector<1x32xf32> to vector<16x32xf32>
    %208 = arith.mulf %206, %207 : vector<16x32xf32>
    %209 = vector.broadcast %123 : vector<1x32xf32> to vector<16x32xf32>
    %210 = arith.addf %208, %209 : vector<16x32xf32>
    %c0_91 = arith.constant 0 : index
    %c0_92 = arith.constant 0 : index
    %211 = vector.load %arg32[%c0_91, %c0_92] : memref<16x64xf32, #tpu.memory_space<vmem>>, vector<16x32xf32>
    tpu.vector_store %arg32[%c0_91, %c0_92], %109 {strides = array<i32>} : memref<16x64xf32, #tpu.memory_space<vmem>>, vector<16x32xf32>,
    %c0_93 = arith.constant 0 : index
    %c32 = arith.constant 32 : index
    %212 = vector.load %arg32[%c0_93, %c32] : memref<16x64xf32, #tpu.memory_space<vmem>>, vector<16x32xf32>
    tpu.vector_store %arg32[%c0_93, %c32], %210 {strides = array<i32>} : memref<16x64xf32, #tpu.memory_space<vmem>>, vector<16x32xf32>,
    %c0_94 = arith.constant 0 : index
    %c0_95 = arith.constant 0 : index
    %213 = vector.load %arg32[%c0_94, %c0_95] : memref<16x64xf32, #tpu.memory_space<vmem>>, vector<16x64xf32>
    %cst_96 = arith.constant dense<0.000000e+00> : vector<2x64xf32>
    %214 = tpu.matmul %5, %213, %cst_96 {dimension_numbers = #tpu.dot_dimension_numbers<[1], [0], [0], [1], [0, 0, 1, 1], [], []>} : vector<2x16xf32>, vector<16x64xf32>, vector<2x64xf32> -> vector<2x64xf32>
    %215 = vector.broadcast %3 : vector<2x1xf32> to vector<2x64xf32>
    %216 = arith.mulf %214, %215 : vector<2x64xf32>
    %cst_97 = arith.constant dense<0.000000e+00> : vector<16x64xf32>
    %217 = tpu.matmul %4, %216, %cst_97 {dimension_numbers = #tpu.dot_dimension_numbers<[1], [0], [0], [1], [0, 0, 1, 1], [], []>} : vector<16x2xf32>, vector<2x64xf32>, vector<16x64xf32> -> vector<16x64xf32>
    %c0_98 = arith.constant 0 : index
    %c0_99 = arith.constant 0 : index
    %218 = vector.load %arg33[%c0_98, %c0_99] : memref<16x64xf32, #tpu.memory_space<vmem>>, vector<16x64xf32>
    tpu.vector_store %arg33[%c0_98, %c0_99], %217 {strides = array<i32>} : memref<16x64xf32, #tpu.memory_space<vmem>>, vector<16x64xf32>,
    %c0_100 = arith.constant 0 : index
    %c0_101 = arith.constant 0 : index
    %219 = vector.load %arg34[%c0_100, %c0_101] : memref<112x32xf32, #tpu.memory_space<vmem>>, vector<112x32xf32>
    tpu.vector_store %arg34[%c0_100, %c0_101], %79 {strides = array<i32>} : memref<112x32xf32, #tpu.memory_space<vmem>>, vector<112x32xf32>,
    %c0_102 = arith.constant 0 : index
    %c0_103 = arith.constant 0 : index
    %c0_104 = arith.constant 0 : index
    %220 = vector.load %arg24[%c0_102, %c0_103, %c0_104] : memref<1x3x32xf32, #tpu.memory_space<vmem>>, vector<1x3x32xf32>
    %221 = vector.shape_cast %220 : vector<1x3x32xf32> to vector<3x32xf32>
    %c0_105 = arith.constant 0 : index
    %c0_106 = arith.constant 0 : index
    %c0_107 = arith.constant 0 : index
    %222 = vector.load %arg21[%c0_105, %c0_106, %c0_107] : memref<1x32x32xf32, #tpu.memory_space<vmem>>, vector<1x32x32xf32>
    %223 = vector.shape_cast %222 : vector<1x32x32xf32> to vector<32x32xf32>
    %224 = vector.extract_strided_slice %221 {offsets = [0, 0], sizes = [1, 32], strides = [1, 1]} : vector<3x32xf32> to vector<1x32xf32>
    %c0_108 = arith.constant 0 : index
    %c0_109 = arith.constant 0 : index
    %c0_110 = arith.constant 0 : index
    %225 = vector.load %arg22[%c0_108, %c0_109, %c0_110] : memref<1x32x32xf32, #tpu.memory_space<vmem>>, vector<1x32x32xf32>
    %226 = vector.shape_cast %225 : vector<1x32x32xf32> to vector<32x32xf32>
    %227 = vector.extract_strided_slice %221 {offsets = [1, 0], sizes = [1, 32], strides = [1, 1]} : vector<3x32xf32> to vector<1x32xf32>
    %c0_111 = arith.constant 0 : index
    %c0_112 = arith.constant 0 : index
    %c0_113 = arith.constant 0 : index
    %228 = vector.load %arg23[%c0_111, %c0_112, %c0_113] : memref<1x32x32xf32, #tpu.memory_space<vmem>>, vector<1x32x32xf32>
    %229 = vector.shape_cast %228 : vector<1x32x32xf32> to vector<32x32xf32>
    %230 = vector.extract_strided_slice %221 {offsets = [2, 0], sizes = [1, 32], strides = [1, 1]} : vector<3x32xf32> to vector<1x32xf32>
    %231 = arith.truncf %180 : vector<38x32xf32> to vector<38x32xbf16>
    %232 = arith.truncf %223 : vector<32x32xf32> to vector<32x32xbf16>
    %cst_114 = arith.constant dense<0.000000e+00> : vector<38x32xf32>
    %233 = tpu.matmul %231, %232, %cst_114 {dimension_numbers = #tpu.dot_dimension_numbers<[1], [0], [0], [1], [0, 0, 1, 1], [], []>} : vector<38x32xbf16>, vector<32x32xbf16>, vector<38x32xf32> -> vector<38x32xf32>
    %234 = vector.broadcast %224 : vector<1x32xf32> to vector<38x32xf32>
    %235 = arith.addf %233, %234 : vector<38x32xf32>
    %cst_115 = arith.constant 0.000000e+00 : f32
    %236 = vector.broadcast %cst_115 : f32 to vector<38x32xf32>
    %237 = arith.maximumf %235, %236 : vector<38x32xf32>
    %238 = arith.truncf %237 : vector<38x32xf32> to vector<38x32xbf16>
    %239 = arith.truncf %226 : vector<32x32xf32> to vector<32x32xbf16>
    %cst_116 = arith.constant dense<0.000000e+00> : vector<38x32xf32>
    %240 = tpu.matmul %238, %239, %cst_116 {dimension_numbers = #tpu.dot_dimension_numbers<[1], [0], [0], [1], [0, 0, 1, 1], [], []>} : vector<38x32xbf16>, vector<32x32xbf16>, vector<38x32xf32> -> vector<38x32xf32>
    %241 = vector.broadcast %227 : vector<1x32xf32> to vector<38x32xf32>
    %242 = arith.addf %240, %241 : vector<38x32xf32>
    %cst_117 = arith.constant 0.000000e+00 : f32
    %243 = vector.broadcast %cst_117 : f32 to vector<38x32xf32>
    %244 = arith.maximumf %242, %243 : vector<38x32xf32>
    %245 = arith.truncf %244 : vector<38x32xf32> to vector<38x32xbf16>
    %246 = arith.truncf %229 : vector<32x32xf32> to vector<32x32xbf16>
    %cst_118 = arith.constant dense<0.000000e+00> : vector<38x32xf32>
    %247 = tpu.matmul %245, %246, %cst_118 {dimension_numbers = #tpu.dot_dimension_numbers<[1], [0], [0], [1], [0, 0, 1, 1], [], []>} : vector<38x32xbf16>, vector<32x32xbf16>, vector<38x32xf32> -> vector<38x32xf32>
    %248 = vector.broadcast %230 : vector<1x32xf32> to vector<38x32xf32>
    %249 = arith.addf %247, %248 : vector<38x32xf32>
    %c0_119 = arith.constant 0 : index
    %c0_120 = arith.constant 0 : index
    %250 = vector.load %arg3[%c0_119, %c0_120] : memref<38x32xf32, #tpu.memory_space<vmem>>, vector<38x32xf32>
    %251 = arith.addf %249, %250 : vector<38x32xf32>
    %c0_121 = arith.constant 0 : index
    %c0_122 = arith.constant 0 : index
    %252 = vector.load %arg35[%c0_121, %c0_122] : memref<38x32xf32, #tpu.memory_space<vmem>>, vector<38x32xf32>
    tpu.vector_store %arg35[%c0_121, %c0_122], %251 {strides = array<i32>} : memref<38x32xf32, #tpu.memory_space<vmem>>, vector<38x32xf32>,
    %c1_i32 = arith.constant 1 : i32
    %253 = arith.cmpi eq, %arg0, %c1_i32 : i32
    %254 = arith.extui %253 : i1 to i32
    %c0_i32_123 = arith.constant 0 : i32
    %255 = arith.cmpi ne, %254, %c0_i32_123 : i32
    scf.if %255 {
      %c0_124 = arith.constant 0 : index
      %c0_125 = arith.constant 0 : index
      %256 = vector.load %arg25[%c0_124, %c0_125] : memref<64x32xf32, #tpu.memory_space<vmem>>, vector<64x32xf32>
      %257 = vector.extract_strided_slice %256 {offsets = [0, 0], sizes = [32, 32], strides = [1, 1]} : vector<64x32xf32> to vector<32x32xf32>
      %258 = arith.truncf %79 : vector<112x32xf32> to vector<112x32xbf16>
      %259 = arith.truncf %257 : vector<32x32xf32> to vector<32x32xbf16>
      %cst_126 = arith.constant dense<0.000000e+00> : vector<112x32xf32>
      %260 = tpu.matmul %258, %259, %cst_126 {dimension_numbers = #tpu.dot_dimension_numbers<[1], [0], [0], [1], [0, 0, 1, 1], [], []>} : vector<112x32xbf16>, vector<32x32xbf16>, vector<112x32xf32> -> vector<112x32xf32>
      %c0_127 = arith.constant 0 : index
      %c0_128 = arith.constant 0 : index
      %261 = vector.load %arg2[%c0_127, %c0_128] : memref<112x32xf32, #tpu.memory_space<vmem>>, vector<112x32xf32>
      %262 = vector.extract_strided_slice %256 {offsets = [32, 0], sizes = [32, 32], strides = [1, 1]} : vector<64x32xf32> to vector<32x32xf32>
      %263 = arith.truncf %261 : vector<112x32xf32> to vector<112x32xbf16>
      %264 = arith.truncf %262 : vector<32x32xf32> to vector<32x32xbf16>
      %cst_129 = arith.constant dense<0.000000e+00> : vector<112x32xf32>
      %265 = tpu.matmul %263, %264, %cst_129 {dimension_numbers = #tpu.dot_dimension_numbers<[1], [0], [0], [1], [0, 0, 1, 1], [], []>} : vector<112x32xbf16>, vector<32x32xbf16>, vector<112x32xf32> -> vector<112x32xf32>
      %266 = arith.addf %260, %265 : vector<112x32xf32>
      %c0_130 = arith.constant 0 : index
      %c0_131 = arith.constant 0 : index
      %267 = vector.load %arg26[%c0_130, %c0_131] : memref<1x32xf32, #tpu.memory_space<vmem>>, vector<1x32xf32>
      %268 = vector.broadcast %267 : vector<1x32xf32> to vector<112x32xf32>
      %269 = arith.addf %266, %268 : vector<112x32xf32>
      %cst_132 = arith.constant 0.000000e+00 : f32
      %270 = vector.broadcast %cst_132 : f32 to vector<112x32xf32>
      %271 = arith.maximumf %269, %270 : vector<112x32xf32>
      %c0_133 = arith.constant 0 : index
      %c0_134 = arith.constant 0 : index
      %272 = vector.load %arg27[%c0_133, %c0_134] : memref<32x32xf32, #tpu.memory_space<vmem>>, vector<32x32xf32>
      %273 = arith.truncf %271 : vector<112x32xf32> to vector<112x32xbf16>
      %274 = arith.truncf %272 : vector<32x32xf32> to vector<32x32xbf16>
      %cst_135 = arith.constant dense<0.000000e+00> : vector<112x32xf32>
      %275 = tpu.matmul %273, %274, %cst_135 {dimension_numbers = #tpu.dot_dimension_numbers<[1], [0], [0], [1], [0, 0, 1, 1], [], []>} : vector<112x32xbf16>, vector<32x32xbf16>, vector<112x32xf32> -> vector<112x32xf32>
      %c0_136 = arith.constant 0 : index
      %c0_137 = arith.constant 0 : index
      %276 = vector.load %arg28[%c0_136, %c0_137] : memref<1x32xf32, #tpu.memory_space<vmem>>, vector<1x32xf32>
      %277 = vector.broadcast %276 : vector<1x32xf32> to vector<112x32xf32>
      %278 = arith.addf %275, %277 : vector<112x32xf32>
      %cst_138 = arith.constant 0.000000e+00 : f32
      %279 = vector.broadcast %cst_138 : f32 to vector<112x32xf32>
      %280 = arith.maximumf %278, %279 : vector<112x32xf32>
      %c0_139 = arith.constant 0 : index
      %c0_140 = arith.constant 0 : index
      %281 = vector.load %arg29[%c0_139, %c0_140] : memref<32x1xf32, #tpu.memory_space<vmem>>, vector<32x1xf32>
      %282 = arith.truncf %280 : vector<112x32xf32> to vector<112x32xbf16>
      %283 = arith.truncf %281 : vector<32x1xf32> to vector<32x1xbf16>
      %cst_141 = arith.constant dense<0.000000e+00> : vector<112x1xf32>
      %284 = tpu.matmul %282, %283, %cst_141 {dimension_numbers = #tpu.dot_dimension_numbers<[1], [0], [0], [1], [0, 0, 1, 1], [], []>} : vector<112x32xbf16>, vector<32x1xbf16>, vector<112x1xf32> -> vector<112x1xf32>
      %c0_142 = arith.constant 0 : index
      %c0_143 = arith.constant 0 : index
      %285 = vector.load %arg30[%c0_142, %c0_143] : memref<1x1xf32, #tpu.memory_space<vmem>>, vector<1x1xf32>
      %286 = vector.broadcast %285 : vector<1x1xf32> to vector<112x1xf32>
      %287 = arith.addf %284, %286 : vector<112x1xf32>
      %c0_144 = arith.constant 0 : index
      %c0_145 = arith.constant 0 : index
      %288 = vector.load %arg31[%c0_144, %c0_145] : memref<112x1xf32, #tpu.memory_space<vmem>>, vector<112x1xf32>
      tpu.vector_store %arg31[%c0_144, %c0_145], %287 {strides = array<i32>} : memref<112x1xf32, #tpu.memory_space<vmem>>, vector<112x1xf32>,
    } else {
    }
    return
  }
  func.func @transform_0(%arg0: i32) -> (i32, i32) {
    %c0_i32 = arith.constant 0 : i32
    %c0_i32_0 = arith.constant 0 : i32
    %c0_i32_1 = arith.constant 0 : i32
    return %c0_i32, %c0_i32_0 : i32, i32
  }
  func.func @transform_1(%arg0: i32) -> (i32, i32) {
    %c0_i32 = arith.constant 0 : i32
    %c0_i32_0 = arith.constant 0 : i32
    %c0_i32_1 = arith.constant 0 : i32
    return %c0_i32, %c0_i32_0 : i32, i32
  }
  func.func @transform_2(%arg0: i32) -> (i32, i32) {
    %c0_i32 = arith.constant 0 : i32
    %c0_i32_0 = arith.constant 0 : i32
    %c0_i32_1 = arith.constant 0 : i32
    return %c0_i32, %c0_i32_0 : i32, i32
  }
  func.func @transform_3(%arg0: i32) -> (i32, i32) {
    %c0_i32 = arith.constant 0 : i32
    %c0_i32_0 = arith.constant 0 : i32
    %c0_i32_1 = arith.constant 0 : i32
    return %c0_i32, %c0_i32_0 : i32, i32
  }
  func.func @transform_4(%arg0: i32) -> (i32, i32) {
    %c0_i32 = arith.constant 0 : i32
    %c0_i32_0 = arith.constant 0 : i32
    %c0_i32_1 = arith.constant 0 : i32
    return %c0_i32, %c0_i32_0 : i32, i32
  }
  func.func @transform_5(%arg0: i32) -> (i32, i32) {
    %c0_i32 = arith.constant 0 : i32
    %c0_i32_0 = arith.constant 0 : i32
    %c0_i32_1 = arith.constant 0 : i32
    return %c0_i32, %c0_i32_0 : i32, i32
  }
  func.func @transform_6(%arg0: i32) -> (i32, i32) {
    %c0_i32 = arith.constant 0 : i32
    %c0_i32_0 = arith.constant 0 : i32
    %c0_i32_1 = arith.constant 0 : i32
    return %c0_i32, %c0_i32_0 : i32, i32
  }
  func.func @transform_7(%arg0: i32) -> (i32, i32) {
    %c0_i32 = arith.constant 0 : i32
    %c0_i32_0 = arith.constant 0 : i32
    %c0_i32_1 = arith.constant 0 : i32
    return %c0_i32, %c0_i32_0 : i32, i32
  }
  func.func @transform_8(%arg0: i32) -> (i32, i32) {
    %c0_i32 = arith.constant 0 : i32
    %c0_i32_0 = arith.constant 0 : i32
    %c0_i32_1 = arith.constant 0 : i32
    return %c0_i32, %c0_i32_0 : i32, i32
  }
  func.func @transform_9(%arg0: i32) -> (i32, i32) {
    %c0_i32 = arith.constant 0 : i32
    %c0_i32_0 = arith.constant 0 : i32
    %c0_i32_1 = arith.constant 0 : i32
    return %c0_i32, %c0_i32_0 : i32, i32
  }
  func.func @transform_10(%arg0: i32) -> (i32, i32) {
    %c0_i32 = arith.constant 0 : i32
    %c0_i32_0 = arith.constant 0 : i32
    %c0_i32_1 = arith.constant 0 : i32
    return %c0_i32, %c0_i32_0 : i32, i32
  }
  func.func @transform_11(%arg0: i32) -> (i32, i32) {
    %c0_i32 = arith.constant 0 : i32
    %c0_i32_0 = arith.constant 0 : i32
    %c0_i32_1 = arith.constant 0 : i32
    return %c0_i32, %c0_i32_0 : i32, i32
  }
  func.func @transform_12(%arg0: i32) -> (i32, i32, i32) {
    %c0_i32 = arith.constant 0 : i32
    %c0_i32_0 = arith.constant 0 : i32
    %c0_i32_1 = arith.constant 0 : i32
    return %arg0, %c0_i32, %c0_i32_0 : i32, i32, i32
  }
  func.func @transform_13(%arg0: i32) -> (i32, i32, i32) {
    %c0_i32 = arith.constant 0 : i32
    %c0_i32_0 = arith.constant 0 : i32
    %c0_i32_1 = arith.constant 0 : i32
    return %arg0, %c0_i32, %c0_i32_0 : i32, i32, i32
  }
  func.func @transform_14(%arg0: i32) -> (i32, i32, i32) {
    %c0_i32 = arith.constant 0 : i32
    %c0_i32_0 = arith.constant 0 : i32
    %c0_i32_1 = arith.constant 0 : i32
    return %arg0, %c0_i32, %c0_i32_0 : i32, i32, i32
  }
  func.func @transform_15(%arg0: i32) -> (i32, i32, i32) {
    %c0_i32 = arith.constant 0 : i32
    %c0_i32_0 = arith.constant 0 : i32
    %c0_i32_1 = arith.constant 0 : i32
    return %arg0, %c0_i32, %c0_i32_0 : i32, i32, i32
  }
  func.func @transform_16(%arg0: i32) -> (i32, i32, i32) {
    %c0_i32 = arith.constant 0 : i32
    %c0_i32_0 = arith.constant 0 : i32
    %c0_i32_1 = arith.constant 0 : i32
    return %arg0, %c0_i32, %c0_i32_0 : i32, i32, i32
  }
  func.func @transform_17(%arg0: i32) -> (i32, i32, i32) {
    %c0_i32 = arith.constant 0 : i32
    %c0_i32_0 = arith.constant 0 : i32
    %c0_i32_1 = arith.constant 0 : i32
    return %arg0, %c0_i32, %c0_i32_0 : i32, i32, i32
  }
  func.func @transform_18(%arg0: i32) -> (i32, i32, i32) {
    %c0_i32 = arith.constant 0 : i32
    %c0_i32_0 = arith.constant 0 : i32
    %c0_i32_1 = arith.constant 0 : i32
    return %arg0, %c0_i32, %c0_i32_0 : i32, i32, i32
  }
  func.func @transform_19(%arg0: i32) -> (i32, i32, i32) {
    %c0_i32 = arith.constant 0 : i32
    %c0_i32_0 = arith.constant 0 : i32
    %c0_i32_1 = arith.constant 0 : i32
    return %arg0, %c0_i32, %c0_i32_0 : i32, i32, i32
  }
  func.func @transform_20(%arg0: i32) -> (i32, i32, i32) {
    %c0_i32 = arith.constant 0 : i32
    %c0_i32_0 = arith.constant 0 : i32
    %c0_i32_1 = arith.constant 0 : i32
    return %arg0, %c0_i32, %c0_i32_0 : i32, i32, i32
  }
  func.func @transform_21(%arg0: i32) -> (i32, i32, i32) {
    %c0_i32 = arith.constant 0 : i32
    %c0_i32_0 = arith.constant 0 : i32
    %c0_i32_1 = arith.constant 0 : i32
    return %arg0, %c0_i32, %c0_i32_0 : i32, i32, i32
  }
  func.func @transform_22(%arg0: i32) -> (i32, i32, i32) {
    %c0_i32 = arith.constant 0 : i32
    %c0_i32_0 = arith.constant 0 : i32
    %c0_i32_1 = arith.constant 0 : i32
    return %arg0, %c0_i32, %c0_i32_0 : i32, i32, i32
  }
  func.func @transform_23(%arg0: i32) -> (i32, i32, i32) {
    %c0_i32 = arith.constant 0 : i32
    %c0_i32_0 = arith.constant 0 : i32
    %c0_i32_1 = arith.constant 0 : i32
    return %arg0, %c0_i32, %c0_i32_0 : i32, i32, i32
  }
  func.func @transform_24(%arg0: i32) -> (i32, i32) {
    %c0_i32 = arith.constant 0 : i32
    %c0_i32_0 = arith.constant 0 : i32
    %c0_i32_1 = arith.constant 0 : i32
    return %c0_i32, %c0_i32_0 : i32, i32
  }
  func.func @transform_25(%arg0: i32) -> (i32, i32) {
    %c0_i32 = arith.constant 0 : i32
    %c0_i32_0 = arith.constant 0 : i32
    %c0_i32_1 = arith.constant 0 : i32
    return %c0_i32, %c0_i32_0 : i32, i32
  }
  func.func @transform_26(%arg0: i32) -> (i32, i32) {
    %c0_i32 = arith.constant 0 : i32
    %c0_i32_0 = arith.constant 0 : i32
    %c0_i32_1 = arith.constant 0 : i32
    return %c0_i32, %c0_i32_0 : i32, i32
  }
  func.func @transform_27(%arg0: i32) -> (i32, i32) {
    %c0_i32 = arith.constant 0 : i32
    %c0_i32_0 = arith.constant 0 : i32
    %c0_i32_1 = arith.constant 0 : i32
    return %c0_i32, %c0_i32_0 : i32, i32
  }
  func.func @transform_28(%arg0: i32) -> (i32, i32) {
    %c0_i32 = arith.constant 0 : i32
    %c0_i32_0 = arith.constant 0 : i32
    %c0_i32_1 = arith.constant 0 : i32
    return %c0_i32, %c0_i32_0 : i32, i32
  }
  func.func @transform_29(%arg0: i32) -> (i32, i32) {
    %c0_i32 = arith.constant 0 : i32
    %c0_i32_0 = arith.constant 0 : i32
    %c0_i32_1 = arith.constant 0 : i32
    return %c0_i32, %c0_i32_0 : i32, i32
  }
  func.func @transform_30(%arg0: i32) -> (i32, i32) {
    %c0_i32 = arith.constant 0 : i32
    %c0_i32_0 = arith.constant 0 : i32
    %c0_i32_1 = arith.constant 0 : i32
    return %c0_i32, %c0_i32_0 : i32, i32
  }
}

</mosaic_0001>

<bundles_post_ra>
// kernel: graphgdp_forward.2
= control target key start
LH: loop header
LB: loop body
LE: loop exit
PB: predicated region body
PF: predicated region fallthrough
CT: control target
= control target key end

     0   :  { %s1256_s0 = inlined_call_operand.vmem [shape: f32[16,33], index: 0, kind: input, shape index: {}]   ;;  %s1257_s1 = inlined_call_operand.vmem [shape: f32[112,1], index: 1, kind: input, shape index: {}]   ;;  %s1258_s2 = inlined_call_operand.vmem [shape: f32[38,1], index: 2, kind: input, shape index: {}]   ;;  %s1259_s3 = inlined_call_operand.vmem [shape: f32[33,64], index: 3, kind: input, shape index: {}]   ;;  %s1260_s4 = inlined_call_operand.vmem [shape: f32[1,64], index: 4, kind: input, shape index: {}]   ;;  %s1261_s5 = inlined_call_operand.vmem [shape: f32[64,64], index: 5, kind: input, shape index: {}]   ;;  %s1262_s6 = inlined_call_operand.vmem [shape: f32[1,64], index: 6, kind: input, shape index: {}]   ;;  %s1263_s7 = inlined_call_operand.vmem [shape: f32[64,64], index: 7, kind: input, shape index: {}]   ;;  %s1264_s8 = inlined_call_operand.vmem [shape: f32[1,64], index: 8, kind: input, shape index: {}]   ;;  %s1265_s9 = inlined_call_operand.vmem [shape: f32[1,32], index: 9, kind: input, shape index: {}]   ;;  %s1266_s10 = inlined_call_operand.vmem [shape: f32[1,32], index: 10, kind: input, shape index: {}]   ;;  %s1267_s11 = inlined_call_operand.vmem [shape: f32[32,32], index: 11, kind: input, shape index: {}]   ;;  %s1268_s12 = inlined_call_operand.vmem [shape: f32[1,32], index: 12, kind: input, shape index: {}]   ;;  %s1269_s13 = inlined_call_operand.vmem [shape: f32[32,32], index: 13, kind: input, shape index: {}]   ;;  %s1270_s14 = inlined_call_operand.vmem [shape: f32[1,32], index: 14, kind: input, shape index: {}]   ;;  %s1271_s15 = inlined_call_operand.vmem [shape: f32[1,32], index: 15, kind: input, shape index: {}]   ;;  %s1272_s16 = inlined_call_operand.vmem [shape: f32[1,32], index: 16, kind: input, shape index: {}]   ;;  %s1273_s17 = inlined_call_operand.hbm [shape: f32[32,32], index: 17, kind: input, shape index: {}]   ;;  %s1274_s18 = inlined_call_operand.vmem [shape: f32[1,32], index: 18, kind: input, shape index: {}]   ;;  %s1275_s19 = inlined_call_operand.hbm [shape: f32[32,32], index: 19, kind: input, shape index: {}]   ;;  %s1276_s20 = inlined_call_operand.vmem [shape: f32[1,32], index: 20, kind: input, shape index: {}]   ;;  %s1277_s21 = inlined_call_operand.vmem [shape: f32[16,64], index: 21, kind: output, shape index: {0}]   ;;  %s1278_s22 = inlined_call_operand.vmem [shape: f32[112,32], index: 22, kind: output, shape index: {1}]   ;;  %s1279_s23 = inlined_call_operand.vmem [shape: f32[38,32], index: 23, kind: output, shape index: {2}]  }
   0x1   :  { %1286 = sst [smem:[#allocation8_spill]] %s1256_s0 }
   0x2   :  { %1287 = sst [smem:[#allocation9_spill]] %s1257_s1 }
   0x3   :  { %1288 = sst [smem:[#allocation10_spill]] %s1258_s2 }
   0x4   :  { %1289 = sst [smem:[#allocation11_spill]] %s1259_s3 }
   0x5   :  { %1290 = sst [smem:[#allocation12_spill]] %s1260_s4 }
   0x6   :  { %1291 = sst [smem:[#allocation13_spill]] %s1261_s5 }
   0x7   :  { %1292 = sst [smem:[#allocation14_spill]] %s1262_s6 }
   0x8   :  { %1293 = sst [smem:[#allocation15_spill]] %s1263_s7 }
   0x9   :  { %29 = vsyncpa [#allocation3], 0  ;;  %s69_s24 = sshll.u32 %s1273_s17, 4  ;;  %s70_s24 = int_to_ptr.hbm [resolvable:$true] %s69_s24 }
   0xa   :  { %30 = vsyncpa [#allocation5], 0  ;;  %s790_s25 = smov [#allocation2]   ;;  %s84_s2 = sshll.u32 %s1275_s19, 4  ;;  %s85_s2 = int_to_ptr.hbm [resolvable:$true] %s84_s2 }
   0xb   :  { %s71_s5 = sshll.u32 %s790_s25, 4  ;;  %s791_s6 = smov 128   ;;  %s72_s5 = int_to_ptr.vmem [resolvable:$true] %s71_s5 }
   0xc   :  { %s792_s27 = smov 8   ;;  %s793_s7 = smov [#allocation4]  }
   0xd   :  { %77 = dma.hbm_to_vmem [thread:$0]  %s70_s24, 512, %s72_s5, [#allocation3], %s791_s6, %s791_s6, %s792_s27  }
   0xe   :  { %s86_s28 = sshll.u32 %s793_s7, 4  ;;  %s87_s28 = int_to_ptr.vmem [resolvable:$true] %s86_s28 }
   0xf   :  { %92 = dma.hbm_to_vmem [thread:$0]  %s85_s2, 512, %s87_s28, [#allocation5], %s791_s6, %s791_s6, %s792_s27  }
  0x10   :  { %786 = dma.done.wait [#allocation3], 512  }
  0x11   :  { %787 = vsyncadd [#allocation3], 4294966784 }
  0x12   :  { %788 = dma.done.wait [#allocation5], 512  }
  0x13   :  { %789 = vsyncadd [#allocation5], 4294966784  ;;  %vm141_vm0 = vcmask 1040384   ;;  %s1294_s3 = sld [smem:[#allocation11_spill]]  ;;  %v794_v1 = vmov 0   ;;  %vm137_vm1 = vcmask 269312  }
  0x14   :  { %v924_v2 = vsel %vm141_vm0, 65535, %v794_v1  ;;  %s1295_s6 = sld [smem:[#allocation8_spill]]  ;;  %vm171_vm2 = vcmask 523264   ;;  %v232_v46 = vld [vmem:[%s1265_s9] sm:$0x1]  ;;  %vm255_vm3 = vcmask 7168  }
  0x15   :  { %s1296_s29 = sld [smem:[#allocation13_spill]]  ;;  %v251_v47 = vpack.c.bf16 %v232_v46, %v232_v46  ;;  %v526_v54 = vld [vmem:[%s1271_s15] sm:$0x1]  ;;  %vm350_vm4 = vcmask 261120   ;;  %vm674_vm5 = vcmask 259072  }
  0x16   :  { %s1297_s19 = sld [smem:[#allocation12_spill]]  ;;  %v541_v56 = vpack.c.bf16 %v526_v54, %v526_v54  ;;  %v733_v54 = vld [vmem:[%s1272_s16] ss:$0 sm:$0xff] }
  0x17   :  { %s1298_s4 = sld [smem:[#allocation15_spill]]  ;;  %v278_v48 = vand.u32 %v251_v47, %v924_v2 }
  0x18   :  { %s1299_s24 = sld [smem:[#allocation9_spill]]  ;;  %v555_v63 = vand.u32 %v541_v56, %v924_v2 }
  0x19   :  { %v110_v0 = vld [vmem:[%s1294_s3 + $0x20] sm:$0x1]  ;;  %v108_v4 = vld [vmem:[%s1294_s3 + $0x10] sm:$0xff]  ;;  %v109_v5 = vld [vmem:[%s1294_s3 + $0x18] sm:$0xff]  ;;  %723 = vmatpush.bf16.msra.mxu3 %v278_v48  ;;  %s1300_s1 = sld [smem:[#allocation14_spill]] }
  0x1a   :  { %v133_v3 = vpack.c.bf16 %v110_v0, %v110_v0  ;;  %v132_v7 = vpack.c.bf16 %v109_v5, %v108_v4  ;;  %v106_v8 = vld [vmem:[%s1294_s3] sm:$0xff]  ;;  %v107_v9 = vld [vmem:[%s1294_s3 + $0x8] sm:$0xff]  ;;  %s1301_s9 = sld [smem:[#allocation10_spill]] }
  0x1b   :  { %v131_v10 = vpack.c.bf16 %v107_v9, %v106_v8  ;;  %v104_v11 = vld [vmem:[%s1295_s6] sm:$0xff]  ;;  %v105_v12 = vld [vmem:[%s1295_s6 + $0x8] sm:$0xff]  ;;  %v118_v14 = vld [vmem:[%s1296_s29 + $0x30] sm:$0xff] }
  0x1c   :  { %v145_v6 = vand.u32 %v924_v2, %v133_v3  ;;  %v130_v13 = vpack.c.bf16 %v105_v12, %v104_v11  ;;  %v119_v15 = vld [vmem:[%s1296_s29 + $0x38] sm:$0xff]  ;;  %v116_v17 = vld [vmem:[%s1296_s29 + $0x20] sm:$0xff]  ;;  %v117_v18 = vld [vmem:[%s1296_s29 + $0x28] sm:$0xff] }
  0x1d   :  { %v167_v16 = vpack.c.bf16 %v119_v15, %v118_v14  ;;  %v166_v19 = vpack.c.bf16 %v117_v18, %v116_v17  ;;  %v114_v20 = vld [vmem:[%s1296_s29 + $0x10] sm:$0xff]  ;;  %v115_v21 = vld [vmem:[%s1296_s29 + $0x18] sm:$0xff]  ;;  %v112_v23 = vld [vmem:[%s1296_s29] sm:$0xff] }
  0x1e   :  { %152 = vmatpush.bf16.msra.mxu0 %v145_v6  ;;  %v165_v22 = vpack.c.bf16 %v115_v21, %v114_v20  ;;  %v113_v24 = vld [vmem:[%s1296_s29 + $0x8] sm:$0xff]  ;;  %v729_v27 = vld [vmem:[%s1297_s19] ss:$0 sm:$0xff]  ;;  %v127_v34 = vld [vmem:[%s1298_s4 + $0x30] sm:$0xff] }
  0x1f   :  { %179 = vmatpush.bf16.msra.mxu1 %v167_v16  ;;  %v164_v25 = vpack.c.bf16 %v113_v24, %v112_v23  ;;  %v128_v35 = vld [vmem:[%s1298_s4 + $0x38] sm:$0xff]  ;;  %v125_v37 = vld [vmem:[%s1298_s4 + $0x20] sm:$0xff]  ;;  %v126_v38 = vld [vmem:[%s1298_s4 + $0x28] sm:$0xff] }
  0x20   :  { %v195_v36 = vpack.c.bf16 %v128_v35, %v127_v34  ;;  %v194_v39 = vpack.c.bf16 %v126_v38, %v125_v37  ;;  %v123_v40 = vld [vmem:[%s1298_s4 + $0x10] sm:$0xff]  ;;  %v124_v41 = vld [vmem:[%s1298_s4 + $0x18] sm:$0xff]  ;;  %v121_v43 = vld [vmem:[%s1298_s4] sm:$0xff] }
  0x21   :  { %v193_v42 = vpack.c.bf16 %v124_v41, %v123_v40  ;;  %v122_v44 = vld [vmem:[%s1298_s4 + $0x8] sm:$0xff]  ;;  %v220_v49 = vld [vmem:[%s1299_s24 + $0x10] sm:$0xff]  ;;  %v221_v50 = vld [vmem:[%s1299_s24 + $0x18] sm:$0xff] }
  0x22   :  { %153 = vmatpush.bf16.msra.mxu0 %v132_v7  ;;  %206 = vmatpush.bf16.msra.mxu2 %v195_v36  ;;  %v192_v45 = vpack.c.bf16 %v122_v44, %v121_v43  ;;  %v245_v52 = vpack.c.bf16 %v221_v50, %v220_v49  ;;  %v730_v53 = vld [vmem:[%s1300_s1] ss:$0 sm:$0xff]  ;;  %v223_v62 = vld [vmem:[%s1299_s24 + $0x28] sm:$0xff]  ;;  %v224_v2 = vld [vmem:[%s1299_s24 + $0x30] sm:$0xff] }
  0x23   :  { %180 = vmatpush.bf16.msra.mxu1 %v166_v19  ;;  %v222_v61 = vld [vmem:[%s1299_s24 + $0x20] sm:$0xff]  ;;  %v219_v4 = vld [vmem:[%s1299_s24 + $0x8] sm:$0xff]  ;;  %v225_v6 = vld [vmem:[%s1299_s24 + $0x38] sm:$0xff] }
  0x24   :  { %694 = vmatmul.msk.bf16.vlgmr.msra.gmra.mxu3 %vm255_vm3, %v245_v52  ;;  %v246_v1 = vpack.c.bf16 %v223_v62, %v222_v61  ;;  %v218_v3 = vld [vmem:[%s1299_s24] sm:$0xff]  ;;  %v247_v7 = vpack.c.bf16 %v225_v6, %v224_v2  ;;  %v522_v9 = vld [vmem:[%s1301_s9 + $0x8] sm:$0xff]  ;;  %v523_v14 = vld [vmem:[%s1301_s9 + $0x10] sm:$0xff] }
  0x25   :  { %v244_v5 = vpack.c.bf16 %v219_v4, %v218_v3  ;;  %v521_v8 = vld [vmem:[%s1301_s9] sm:$0xff]  ;;  %v227_v12 = vld [vmem:[%s1299_s24 + $0x48] sm:$0xff]  ;;  %v524_v15 = vld [vmem:[%s1301_s9 + $0x18] sm:$0xff] }
  0x26   :  { %154 = vmatpush.bf16.msra.mxu0 %v131_v10  ;;  %207 = vmatpush.bf16.msra.mxu2 %v194_v39  ;;  %v538_v10 = vpack.c.bf16 %v522_v9, %v521_v8  ;;  %v226_v11 = vld [vmem:[%s1299_s24 + $0x40] sm:$0xff]  ;;  %v539_v16 = vpack.c.bf16 %v524_v15, %v523_v14  ;;  %v228_v17 = vld [vmem:[%s1299_s24 + $0x50] sm:$0xff]  ;;  %v229_v18 = vld [vmem:[%s1299_s24 + $0x58] sm:$0xff] }
  0x27   :  { %181 = vmatpush.bf16.msra.mxu1 %v165_v22  ;;  %v249_v19 = vpack.c.bf16 %v229_v18, %v228_v17  ;;  %v525_v20 = vld [vmem:[%s1301_s9 + $0x20] sm:$0x3f]  ;;  %v231_v22 = vld [vmem:[%s1299_s24 + $0x68] sm:$0xff] }
  0x28   :  { %v230_v21 = vld [vmem:[%s1299_s24 + $0x60] sm:$0xff]  ;;  %v540_v23 = vpack.c.bf16 %v525_v20, %v525_v20 }
  0x29   :  { %690 = vmatmul.msk.bf16.vlgmr.msra.gmra.mxu0 %vm137_vm1, %v130_v13  ;;  %v248_v13 = vpack.c.bf16 %v227_v12, %v226_v11  ;;  %v250_v24 = vpack.c.bf16 %v231_v22, %v230_v21  ;;  %v528_v41 = vld [vmem:[#allocation2] sm:$0xff] }
  0x2a   :  { %208 = vmatpush.bf16.msra.mxu2 %v193_v42  ;;  %v529_v42 = vld [vmem:[#allocation2 + $0x8] sm:$0xff] }
  0x2b   :  { %182 = vmatpush.bf16.msra.mxu1 %v164_v25  ;;  %v236_v25 = vld [vmem:[%s1267_s11 + $0x10] sm:$0xff]  ;;  %v588_v44 = vpack.c.bf16 %v529_v42, %v528_v41 }
  0x2e   :  { %209 = vmatpush.bf16.msra.mxu2 %v192_v45  ;;  %v1102_v45 = vld [vmem:[%s1266_s10] ss:$0 sm:$0xff] }
  0x32   :  { %287 = vmatpush.bf16.msrb.mxu2 %v278_v48 }
  0x34   :  { %695 = vmatmul.msk.bf16.gmra.mxu3 %vm255_vm3, %v246_v1 }
  0x44   :  { %696 = vmatmul.msk.bf16.gmra.mxu3 %vm255_vm3, %v247_v7 }
  0x54   :  { %697 = vmatmul.msk.bf16.gmra.mxu3 %vm255_vm3, %v248_v13 }
  0x64   :  { %698 = vmatmul.msk.bf16.gmra.mxu3 %vm255_vm3, %v249_v19 }
  0x74   :  { %699 = vmatmul.msk.bf16.gmra.mxu3 %vm255_vm3, %v250_v24 }
  0xa6   :  { %v156_v26 = vpop.f32.mrf.mxu0 }
  0xa7   :  { %v157_v28 = vadd.f32 %v729_v27, %v156_v26  ;;  %v237_v26 = vld [vmem:[%s1267_s11 + $0x18] sm:$0xff]  ;;  %v294_v37 = vpop.f32.mrf.mxu3 }
  0xa8   :  { %v295_v56 = vadd.f32 %v1102_v45, %v294_v37  ;;  %v536_v37 = vld [vmem:[#allocation4 + $0x18] sm:$0xff] }
  0xa9   :  { %v161_v31 = vmax.f32 %v157_v28, 0.0  ;;  %v234_v28 = vld [vmem:[%s1267_s11] sm:$0xff] }
  0xae   :  { %v158_v29 = vpop.f32.mrf.mxu0 }
  0xaf   :  { %v159_v30 = vadd.f32 %v729_v27, %v158_v29  ;;  %v346_v27 = vpack.c.bf16 %v237_v26, %v236_v25  ;;  %v235_v29 = vld [vmem:[%s1267_s11 + $0x8] sm:$0xff]  ;;  %v296_v40 = vpop.f32.mrf.mxu3 }
  0xb1   :  { %v162_v32 = vmax.f32 %v159_v30, 0.0  ;;  %378 = vmatpush.bf16.msrb.mxu0 %v346_v27  ;;  %v345_v30 = vpack.c.bf16 %v235_v29, %v234_v28 }
  0xb3   :  { %v163_v33 = vpack.c.bf16 %v162_v32, %v161_v31  ;;  %v731_v31 = vld [vmem:[%s1264_s8] ss:$0 sm:$0xff]  ;;  %v530_v32 = vld [vmem:[#allocation2 + $0x10] sm:$0xff] }
  0xb5   :  { %691 = vmatmul.msk.bf16.vlgmr.msra.gmra.mxu1 %vm171_vm2, %v163_v33  ;;  %379 = vmatpush.bf16.msrb.mxu0 %v345_v30  ;;  %v531_v33 = vld [vmem:[#allocation2 + $0x18] sm:$0xff] }
  0xb6   :  { %v589_v35 = vpack.c.bf16 %v531_v33, %v530_v32 }
  0xb7   :  { %v299_v48 = vpop.f32.mrf.mxu3 }
  0xb8   :  { %v300_v2 = vadd.f32 %v1102_v45, %v299_v48 }
 0x132   :  { %v184_v51 = vpop.f32.mrf.mxu1 }
 0x133   :  { %v185_v55 = vadd.f32 %v730_v53, %v184_v51 }
 0x135   :  { %v189_v59 = vmax.f32 %v185_v55, 0.0  ;;  %v301_v55 = vpop.f32.mrf.mxu3 }
 0x136   :  { %v302_v6 = vadd.f32 %v1102_v45, %v301_v55  ;;  %v239_v55 = vld [vmem:[%s1269_s13] sm:$0xff] }
 0x138   :  { %v329_v11 = vmax.f32 %v302_v6, 0.0 }
 0x13a   :  { %v186_v57 = vpop.f32.mrf.mxu1 }
 0x13b   :  { %v187_v58 = vadd.f32 %v730_v53, %v186_v57  ;;  %v297_v57 = vadd.f32 %v1102_v45, %v296_v40  ;;  %v242_v40 = vld [vmem:[%s1269_s13 + $0x18] sm:$0xff] }
 0x13d   :  { %v190_v60 = vmax.f32 %v187_v58, 0.0  ;;  %v327_v61 = vmax.f32 %v297_v57, 0.0  ;;  %v304_v1 = vpop.f32.mrf.mxu3 }
 0x13e   :  { %v305_v18 = vadd.f32 %v1102_v45, %v304_v1 }
 0x13f   :  { %v191_v0 = vpack.c.bf16 %v190_v60, %v189_v59  ;;  %v326_v60 = vmax.f32 %v295_v56, 0.0  ;;  %v240_v56 = vld [vmem:[%s1269_s13 + $0x8] sm:$0xff] }
 0x140   :  { %v330_v20 = vmax.f32 %v305_v18, 0.0  ;;  %v437_v57 = vpack.c.bf16 %v240_v56, %v239_v55 }
 0x141   :  { %692 = vmatmul.msk.bf16.vlgmr.msra.gmra.mxu2 %vm171_vm2, %v191_v0  ;;  %v339_v3 = vpack.c.bf16 %v327_v61, %v326_v60 }
 0x142   :  { %564 = vmatpush.bf16.msra.mxu2 %v555_v63 }
 0x145   :  { %v306_v8 = vpop.f32.mrf.mxu3 }
 0x146   :  { %v307_v19 = vadd.f32 %v1102_v45, %v306_v8 }
 0x148   :  { %v331_v21 = vmax.f32 %v307_v19, 0.0 }
 0x14d   :  { %v309_v17 = vpop.f32.mrf.mxu3 }
 0x14e   :  { %v310_v29 = vadd.f32 %v1102_v45, %v309_v17 }
 0x150   :  { %v332_v32 = vmax.f32 %v310_v29, 0.0 }
 0x151   :  { %693 = vmatmul.msk.bf16.vlgmr.msrb.gmra.mxu2 %vm255_vm3, %v244_v5 }
 0x152   :  { %608 = vmatpush.bf16.msrb.mxu2 %v589_v35 }
 0x155   :  { %v311_v22 = vpop.f32.mrf.mxu3 }
 0x156   :  { %609 = vmatpush.bf16.msrb.mxu2 %v588_v44  ;;  %v312_v30 = vadd.f32 %v1102_v45, %v311_v22 }
 0x158   :  { %v333_v33 = vmax.f32 %v312_v30, 0.0 }
 0x15d   :  { %v314_v27 = vpop.f32.mrf.mxu3 }
 0x15e   :  { %v315_v42 = vadd.f32 %v1102_v45, %v314_v27 }
 0x161   :  { %714 = vmatmul.msk.bf16.vlgmr.msra.gmra.mxu2 %vm255_vm3, %v538_v10  ;;  %v328_v10 = vmax.f32 %v300_v2, 0.0 }
 0x163   :  { %v340_v15 = vpack.c.bf16 %v329_v11, %v328_v10 }
 0x165   :  { %v316_v35 = vpop.f32.mrf.mxu3 }
 0x16d   :  { %v319_v44 = vpop.f32.mrf.mxu3 }
 0x171   :  { %715 = vmatmul.msk.bf16.gmra.mxu2 %vm255_vm3, %v539_v16 }
 0x181   :  { %716 = vmatmul.msk.bf16.gmra.mxu2 %vm255_vm3, %v540_v23  ;;  %v341_v23 = vpack.c.bf16 %v331_v21, %v330_v20 }
 0x1c4   :  { %v211_v34 = vpop.f32.mrf.mxu2 }
 0x1c5   :  { %v212_v36 = vadd.f32 %v731_v31, %v211_v34  ;;  %v342_v34 = vpack.c.bf16 %v333_v33, %v332_v32 }
 0x1c7   :  { %216 = vst.msk [vmem:[%s1277_s21] sm:$0xff] %vm171_vm2, %v212_v36  ;;  %v535_v36 = vld [vmem:[#allocation4 + $0x10] sm:$0xff] }
 0x1cc   :  { %v213_v38 = vpop.f32.mrf.mxu2 }
 0x1cd   :  { %v214_v39 = vadd.f32 %v731_v31, %v213_v38  ;;  %v241_v38 = vld [vmem:[%s1269_s13 + $0x10] sm:$0xff] }
 0x1ce   :  { %v438_v41 = vpack.c.bf16 %v242_v40, %v241_v38 }
 0x1cf   :  { %217 = vst.msk [vmem:[%s1277_s21 + $0x8] sm:$0xff] %vm171_vm2, %v214_v39  ;;  %v634_v39 = vpack.c.bf16 %v536_v37, %v535_v36 }
 0x1d0   :  { %469 = vmatpush.bf16.msrb.mxu1 %v438_v41 }
 0x1d1   :  { %653 = vmatpush.bf16.msrb.mxu3 %v634_v39 }
 0x1d4   :  { %v289_v43 = vpop.f32.mrf.mxu2  ;;  %470 = vmatpush.bf16.msrb.mxu1 %v437_v57 }
 0x1d5   :  { %v290_v46 = vadd.f32 %v1102_v45, %v289_v43  ;;  %v317_v43 = vadd.f32 %v1102_v45, %v316_v35 }
 0x1d7   :  { %v324_v50 = vmax.f32 %v290_v46, 0.0  ;;  %v334_v46 = vmax.f32 %v315_v42, 0.0 }
 0x1dc   :  { %v291_v47 = vpop.f32.mrf.mxu2 }
 0x1dd   :  { %v292_v49 = vadd.f32 %v1102_v45, %v291_v47  ;;  %v335_v47 = vmax.f32 %v317_v43, 0.0 }
 0x1df   :  { %v325_v51 = vmax.f32 %v292_v49, 0.0  ;;  %v343_v48 = vpack.c.bf16 %v335_v47, %v334_v46  ;;  %v321_v49 = vpop.f32.mrf.mxu3 }
 0x1e1   :  { %v338_v52 = vpack.c.bf16 %v325_v51, %v324_v50  ;;  %v320_v50 = vadd.f32 %v1102_v45, %v319_v44  ;;  %v322_v51 = vadd.f32 %v1102_v45, %v321_v49  ;;  %v1146_v45 = vld [vmem:[%s1268_s12] ss:$0 sm:$0xff] }
 0x1e3   :  { %700 = vmatmul.msk.bf16.vlgmr.msrb.gmra.mxu0 %vm350_vm4, %v338_v52  ;;  %v336_v52 = vmax.f32 %v320_v50, 0.0 }
 0x1e4   :  { %v566_v53 = vpop.f32.mrf.mxu2 }
 0x1e5   :  { %v567_v58 = vadd.f32 %v733_v54, %v566_v53  ;;  %v337_v53 = vmax.f32 %v322_v51, 0.0 }
 0x1e7   :  { %v580_v62 = vmax.f32 %v567_v58, 0.0  ;;  %v533_v58 = vld [vmem:[#allocation4] sm:$0xff] }
 0x1ec   :  { %v568_v59 = vpop.f32.mrf.mxu2 }
 0x1ed   :  { %v569_v63 = vadd.f32 %v733_v54, %v568_v59  ;;  %v534_v59 = vld [vmem:[#allocation4 + $0x8] sm:$0xff] }
 0x1ee   :  { %v633_v60 = vpack.c.bf16 %v534_v59, %v533_v58 }
 0x1ef   :  { %v581_v0 = vmax.f32 %v569_v63, 0.0 }
 0x1f0   :  { %654 = vmatpush.bf16.msrb.mxu3 %v633_v60 }
 0x1f1   :  { %v585_v4 = vpack.c.bf16 %v581_v0, %v580_v62 }
 0x1f3   :  { %701 = vmatmul.msk.bf16.gmra.mxu0 %vm350_vm4, %v339_v3  ;;  %717 = vmatmul.msk.bf16.vlgmr.msrb.gmra.mxu2 %vm350_vm4, %v585_v4 }
 0x1f4   :  { %v571_v5 = vpop.f32.mrf.mxu2 }
 0x1f5   :  { %v572_v7 = vadd.f32 %v733_v54, %v571_v5 }
 0x1f7   :  { %v582_v12 = vmax.f32 %v572_v7, 0.0  ;;  %v735_v7 = vld [vmem:[%s1274_s18] ss:$0 sm:$0xff] }
 0x1fc   :  { %v573_v9 = vpop.f32.mrf.mxu2 }
 0x1fd   :  { %v574_v13 = vadd.f32 %v733_v54, %v573_v9 }
 0x1ff   :  { %v583_v14 = vmax.f32 %v574_v13, 0.0 }
 0x201   :  { %v586_v16 = vpack.c.bf16 %v583_v14, %v582_v12 }
 0x203   :  { %702 = vmatmul.msk.bf16.gmra.mxu0 %vm350_vm4, %v340_v15  ;;  %718 = vmatmul.msk.bf16.gmra.mxu2 %vm350_vm4, %v586_v16 }
 0x204   :  { %v576_v24 = vpop.f32.mrf.mxu2 }
 0x205   :  { %v577_v25 = vadd.f32 %v733_v54, %v576_v24  ;;  %v344_v54 = vpack.c.bf16 %v337_v53, %v336_v52 }
 0x207   :  { %v584_v26 = vmax.f32 %v577_v25, 0.0 }
 0x209   :  { %v587_v28 = vpack.c.bf16 %v584_v26, %v584_v26 }
 0x20c   :  { %v578_v31 = vpop.f32.mrf.mxu2 }
 0x213   :  { %703 = vmatmul.msk.bf16.gmra.mxu0 %vm350_vm4, %v341_v23  ;;  %719 = vmatmul.msk.bf16.gmra.mxu2 %vm350_vm4, %v587_v28 }
 0x223   :  { %704 = vmatmul.msk.bf16.gmra.mxu0 %vm350_vm4, %v342_v34 }
 0x233   :  { %705 = vmatmul.msk.bf16.gmra.mxu0 %vm350_vm4, %v343_v48 }
 0x243   :  { %706 = vmatmul.msk.bf16.gmra.mxu0 %vm350_vm4, %v344_v54 }
 0x260   :  { %v381_v61 = vpop.f32.mrf.mxu0 }
 0x261   :  { %v382_v62 = vadd.f32 %v1146_v45, %v381_v61 }
 0x263   :  { %v416_v1 = vmax.f32 %v382_v62, 0.0 }
 0x268   :  { %v383_v63 = vpop.f32.mrf.mxu0 }
 0x269   :  { %v384_v0 = vadd.f32 %v1146_v45, %v383_v63 }
 0x26b   :  { %v417_v3 = vmax.f32 %v384_v0, 0.0 }
 0x26d   :  { %v430_v4 = vpack.c.bf16 %v417_v3, %v416_v1 }
 0x26f   :  { %707 = vmatmul.msk.bf16.vlgmr.msrb.gmra.mxu1 %vm350_vm4, %v430_v4  ;;  %v736_v4 = vld [vmem:[%s1270_s14] ss:$0 sm:$0xff] }
 0x270   :  { %v386_v5 = vpop.f32.mrf.mxu0 }
 0x271   :  { %v387_v6 = vadd.f32 %v1146_v45, %v386_v5 }
 0x273   :  { %v418_v10 = vmax.f32 %v387_v6, 0.0 }
 0x276   :  { %v611_v2 = vpop.f32.mrf.mxu2 }
 0x277   :  { %v612_v12 = vadd.f32 %v735_v7, %v611_v2 }
 0x278   :  { %v388_v8 = vpop.f32.mrf.mxu0 }
 0x279   :  { %v389_v9 = vadd.f32 %v1146_v45, %v388_v8  ;;  %v625_v15 = vmax.f32 %v612_v12, 0.0 }
 0x27b   :  { %v419_v11 = vmax.f32 %v389_v9, 0.0 }
 0x27d   :  { %v431_v13 = vpack.c.bf16 %v419_v11, %v418_v10  ;;  %v737_v11 = vld [vmem:[%s1276_s20] ss:$0 sm:$0xff] }
 0x27e   :  { %v613_v14 = vpop.f32.mrf.mxu2 }
 0x27f   :  { %708 = vmatmul.msk.bf16.gmra.mxu1 %vm350_vm4, %v431_v13  ;;  %v614_v16 = vadd.f32 %v735_v7, %v613_v14 }
 0x280   :  { %v391_v17 = vpop.f32.mrf.mxu0 }
 0x281   :  { %v626_v18 = vmax.f32 %v614_v16, 0.0  ;;  %v392_v21 = vadd.f32 %v1146_v45, %v391_v17 }
 0x283   :  { %v630_v19 = vpack.c.bf16 %v626_v18, %v625_v15  ;;  %v420_v24 = vmax.f32 %v392_v21, 0.0 }
 0x285   :  { %720 = vmatmul.msk.bf16.vlgmr.msrb.gmra.mxu3 %vm350_vm4, %v630_v19 }
 0x286   :  { %v616_v20 = vpop.f32.mrf.mxu2 }
 0x287   :  { %v617_v26 = vadd.f32 %v735_v7, %v616_v20 }
 0x288   :  { %v393_v22 = vpop.f32.mrf.mxu0 }
 0x289   :  { %v394_v23 = vadd.f32 %v1146_v45, %v393_v22  ;;  %v627_v29 = vmax.f32 %v617_v26, 0.0 }
 0x28b   :  { %v421_v25 = vmax.f32 %v394_v23, 0.0 }
 0x28d   :  { %v432_v27 = vpack.c.bf16 %v421_v25, %v420_v24 }
 0x28e   :  { %v618_v28 = vpop.f32.mrf.mxu2 }
 0x28f   :  { %709 = vmatmul.msk.bf16.gmra.mxu1 %vm350_vm4, %v432_v27  ;;  %v619_v30 = vadd.f32 %v735_v7, %v618_v28 }
 0x290   :  { %v396_v31 = vpop.f32.mrf.mxu0 }
 0x291   :  { %v628_v32 = vmax.f32 %v619_v30, 0.0  ;;  %v397_v34 = vadd.f32 %v1146_v45, %v396_v31 }
 0x293   :  { %v631_v33 = vpack.c.bf16 %v628_v32, %v627_v29  ;;  %v422_v37 = vmax.f32 %v397_v34, 0.0 }
 0x295   :  { %721 = vmatmul.msk.bf16.gmra.mxu3 %vm350_vm4, %v631_v33 }
 0x296   :  { %v621_v40 = vpop.f32.mrf.mxu2 }
 0x297   :  { %v622_v41 = vadd.f32 %v735_v7, %v621_v40 }
 0x298   :  { %v398_v35 = vpop.f32.mrf.mxu0 }
 0x299   :  { %v399_v36 = vadd.f32 %v1146_v45, %v398_v35  ;;  %v629_v43 = vmax.f32 %v622_v41, 0.0 }
 0x29b   :  { %v423_v38 = vmax.f32 %v399_v36, 0.0  ;;  %v632_v44 = vpack.c.bf16 %v629_v43, %v629_v43 }
 0x29d   :  { %v433_v39 = vpack.c.bf16 %v423_v38, %v422_v37 }
 0x29e   :  { %v623_v46 = vpop.f32.mrf.mxu2 }
 0x29f   :  { %710 = vmatmul.msk.bf16.gmra.mxu1 %vm350_vm4, %v433_v39 }
 0x2a0   :  { %v401_v42 = vpop.f32.mrf.mxu0 }
 0x2a1   :  { %v402_v47 = vadd.f32 %v1146_v45, %v401_v42 }
 0x2a3   :  { %v424_v50 = vmax.f32 %v402_v47, 0.0 }
 0x2a5   :  { %722 = vmatmul.msk.bf16.gmra.mxu3 %vm350_vm4, %v632_v44 }
 0x2a8   :  { %v403_v48 = vpop.f32.mrf.mxu0 }
 0x2a9   :  { %v404_v49 = vadd.f32 %v1146_v45, %v403_v48 }
 0x2ab   :  { %v425_v51 = vmax.f32 %v404_v49, 0.0 }
 0x2ad   :  { %v434_v52 = vpack.c.bf16 %v425_v51, %v424_v50 }
 0x2af   :  { %711 = vmatmul.msk.bf16.gmra.mxu1 %vm350_vm4, %v434_v52 }
 0x2b0   :  { %v406_v53 = vpop.f32.mrf.mxu0 }
 0x2b1   :  { %v407_v54 = vadd.f32 %v1146_v45, %v406_v53 }
 0x2b3   :  { %v426_v57 = vmax.f32 %v407_v54, 0.0 }
 0x2b8   :  { %v408_v55 = vpop.f32.mrf.mxu0 }
 0x2b9   :  { %v409_v56 = vadd.f32 %v1146_v45, %v408_v55 }
 0x2bb   :  { %v427_v58 = vmax.f32 %v409_v56, 0.0 }
 0x2bd   :  { %v435_v59 = vpack.c.bf16 %v427_v58, %v426_v57 }
 0x2bf   :  { %712 = vmatmul.msk.bf16.gmra.mxu1 %vm350_vm4, %v435_v59 }
 0x2c0   :  { %v411_v60 = vpop.f32.mrf.mxu0 }
 0x2c1   :  { %v412_v61 = vadd.f32 %v1146_v45, %v411_v60 }
 0x2c3   :  { %v428_v0 = vmax.f32 %v412_v61, 0.0 }
 0x2c8   :  { %v413_v62 = vpop.f32.mrf.mxu0 }
 0x2c9   :  { %v414_v63 = vadd.f32 %v1146_v45, %v413_v62 }
 0x2cb   :  { %v429_v1 = vmax.f32 %v414_v63, 0.0 }
 0x2cd   :  { %v436_v3 = vpack.c.bf16 %v429_v1, %v428_v0 }
 0x2cf   :  { %713 = vmatmul.msk.bf16.gmra.mxu1 %vm350_vm4, %v436_v3 }
 0x2ec   :  { %v472_v5 = vpop.f32.mrf.mxu1 }
 0x2ed   :  { %v473_v2 = vadd.f32 %v736_v4, %v472_v5 }
 0x2ef   :  { %507 = vst.msk [vmem:[%s1278_s22] sm:$0xff] %vm350_vm4, %v473_v2 }
 0x2f4   :  { %v474_v6 = vpop.f32.mrf.mxu1 }
 0x2f5   :  { %v475_v7 = vadd.f32 %v736_v4, %v474_v6 }
 0x2f7   :  { %508 = vst.msk [vmem:[%s1278_s22 + $0x8] sm:$0xff] %vm350_vm4, %v475_v7 }
 0x2fc   :  { %v477_v45 = vpop.f32.mrf.mxu1 }
 0x2fd   :  { %v478_v8 = vadd.f32 %v736_v4, %v477_v45 }
 0x2ff   :  { %509 = vst.msk [vmem:[%s1278_s22 + $0x10] sm:$0xff] %vm350_vm4, %v478_v8 }
 0x304   :  { %v479_v9 = vpop.f32.mrf.mxu1 }
 0x305   :  { %v480_v10 = vadd.f32 %v736_v4, %v479_v9 }
 0x307   :  { %510 = vst.msk [vmem:[%s1278_s22 + $0x18] sm:$0xff] %vm350_vm4, %v480_v10 }
 0x308   :  { %v656_v12 = vpop.f32.mrf.mxu3 }
 0x309   :  { %v657_v13 = vadd.f32 %v737_v11, %v656_v12 }
 0x30b   :  { %670 = vst.msk [vmem:[%s1279_s23] sm:$0xff] %vm350_vm4, %v657_v13 }
 0x30c   :  { %v482_v14 = vpop.f32.mrf.mxu1 }
 0x30d   :  { %v483_v15 = vadd.f32 %v736_v4, %v482_v14 }
 0x30f   :  { %511 = vst.msk [vmem:[%s1278_s22 + $0x20] sm:$0xff] %vm350_vm4, %v483_v15 }
 0x310   :  { %v658_v16 = vpop.f32.mrf.mxu3 }
 0x311   :  { %v659_v17 = vadd.f32 %v737_v11, %v658_v16 }
 0x313   :  { %671 = vst.msk [vmem:[%s1279_s23 + $0x8] sm:$0xff] %vm350_vm4, %v659_v17 }
 0x314   :  { %v484_v18 = vpop.f32.mrf.mxu1 }
 0x315   :  { %v485_v19 = vadd.f32 %v736_v4, %v484_v18 }
 0x317   :  { %512 = vst.msk [vmem:[%s1278_s22 + $0x28] sm:$0xff] %vm350_vm4, %v485_v19 }
 0x318   :  { %v661_v20 = vpop.f32.mrf.mxu3 }
 0x319   :  { %v662_v21 = vadd.f32 %v737_v11, %v661_v20 }
 0x31b   :  { %672 = vst.msk [vmem:[%s1279_s23 + $0x10] sm:$0xff] %vm350_vm4, %v662_v21 }
 0x31c   :  { %v487_v22 = vpop.f32.mrf.mxu1 }
 0x31d   :  { %v488_v23 = vadd.f32 %v736_v4, %v487_v22 }
 0x31f   :  { %513 = vst.msk [vmem:[%s1278_s22 + $0x30] sm:$0xff] %vm350_vm4, %v488_v23 }
 0x320   :  { %v663_v24 = vpop.f32.mrf.mxu3 }
 0x321   :  { %v664_v25 = vadd.f32 %v737_v11, %v663_v24 }
 0x323   :  { %673 = vst.msk [vmem:[%s1279_s23 + $0x18] sm:$0xff] %vm350_vm4, %v664_v25 }
 0x324   :  { %v489_v26 = vpop.f32.mrf.mxu1 }
 0x325   :  { %v490_v27 = vadd.f32 %v736_v4, %v489_v26 }
 0x327   :  { %514 = vst.msk [vmem:[%s1278_s22 + $0x38] sm:$0xff] %vm350_vm4, %v490_v27 }
 0x328   :  { %v666_v28 = vpop.f32.mrf.mxu3 }
 0x329   :  { %v667_v29 = vadd.f32 %v737_v11, %v666_v28 }
 0x32b   :  { %675 = vst.msk [vmem:[%s1279_s23 + $0x20] sm:$0x3f] %vm674_vm5, %v667_v29 }
 0x32c   :  { %v492_v30 = vpop.f32.mrf.mxu1 }
 0x32d   :  { %v493_v31 = vadd.f32 %v736_v4, %v492_v30 }
 0x32f   :  { %515 = vst.msk [vmem:[%s1278_s22 + $0x40] sm:$0xff] %vm350_vm4, %v493_v31 }
 0x330   :  { %v668_v32 = vpop.f32.mrf.mxu3 }
 0x334   :  { %v494_v33 = vpop.f32.mrf.mxu1 }
 0x335   :  { %v495_v34 = vadd.f32 %v736_v4, %v494_v33 }
 0x337   :  { %516 = vst.msk [vmem:[%s1278_s22 + $0x48] sm:$0xff] %vm350_vm4, %v495_v34 }
 0x33c   :  { %v497_v35 = vpop.f32.mrf.mxu1 }
 0x33d   :  { %v498_v36 = vadd.f32 %v736_v4, %v497_v35 }
 0x33f   :  { %517 = vst.msk [vmem:[%s1278_s22 + $0x50] sm:$0xff] %vm350_vm4, %v498_v36 }
 0x344   :  { %v499_v37 = vpop.f32.mrf.mxu1 }
 0x345   :  { %v500_v38 = vadd.f32 %v736_v4, %v499_v37 }
 0x347   :  { %518 = vst.msk [vmem:[%s1278_s22 + $0x58] sm:$0xff] %vm350_vm4, %v500_v38 }
 0x34c   :  { %v502_v39 = vpop.f32.mrf.mxu1 }
 0x34d   :  { %v503_v40 = vadd.f32 %v736_v4, %v502_v39 }
 0x34f   :  { %519 = vst.msk [vmem:[%s1278_s22 + $0x60] sm:$0xff] %vm350_vm4, %v503_v40 }
 0x354   :  { %v504_v41 = vpop.f32.mrf.mxu1 }
 0x355   :  { %v505_v42 = vadd.f32 %v736_v4, %v504_v41 }
 0x357   :  { %520 = vst.msk [vmem:[%s1278_s22 + $0x68] sm:$0xff] %vm350_vm4, %v505_v42 }
 0x358   :  { %688 = vsyncpa [#allocation3], 1 }
 0x359   :  { %689 = vsyncpa [#allocation5], 1 }

// kernel: graphgdp_forward.3
= control target key start
LH: loop header
LB: loop body
LE: loop exit
PB: predicated region body
PF: predicated region fallthrough
CT: control target
= control target key end

     0   :  { %s4701_s6 = smov 1   ;;  %s4702_s10 = smov 2   ;;  %s6280_s0 = inlined_call_operand.smem [shape: u32[31], index: -1, kind: input, shape index: {}] }
   0x1   :  { %s4748_s5 = sld [smem:[%s6280_s0]]   ;;  %s4703_s14 = smov 3  }
   0x2   :  { %s4753_s9 = sld [smem:[%s6280_s0 + %s4701_s6]]   ;;  %s4704_s18 = smov 4  }
   0x3   :  { %s4758_s13 = sld [smem:[%s6280_s0 + %s4702_s10]]   ;;  %s4705_s22 = smov 5  }
   0x4   :  { %s4763_s17 = sld [smem:[%s6280_s0 + %s4703_s14]]   ;;  %s4706_s26 = smov 6  }
   0x5   :  { %s4768_s21 = sld [smem:[%s6280_s0 + %s4704_s18]]   ;;  %s4707_s30 = smov 7  }
   0x6   :  { %s4773_s25 = sld [smem:[%s6280_s0 + %s4705_s22]]   ;;  %s4708_s4 = smov 8  }
   0x7   :  { %6319 = sst [smem:[#allocation18_spill]] %s4748_s5  ;;  %s4709_s10 = smov 9  }
   0x8   :  { %6320 = sst [smem:[#allocation19_spill]] %s4753_s9  ;;  %s4710_s15 = smov 10  }
   0x9   :  { %6321 = sst [smem:[#allocation20_spill]] %s4758_s13  ;;  %s4711_s20 = smov 11  }
   0xa   :  { %s4778_s29 = sld [smem:[%s6280_s0 + %s4706_s26]]   ;;  %s4712_s26 = smov 12  }
   0xb   :  { %6322 = sst [smem:[#allocation21_spill]] %s4768_s21  ;;  %s4713_s1 = smov 13  }
   0xc   :  { %6323 = sst [smem:[#allocation22_spill]] %s4773_s25  ;;  %s4714_s7 = smov 14  }
   0xd   :  { %s4783_s3 = sld [smem:[%s6280_s0 + %s4707_s30]]   ;;  %s4716_s22 = smov 16  }
   0xe   :  { %s4788_s8 = sld [smem:[%s6280_s0 + %s4708_s4]]   ;;  %s4717_s28 = smov 17  }
   0xf   :  { %s4793_s14 = sld [smem:[%s6280_s0 + %s4709_s10]]   ;;  %s4730_s10 = smov 30  }
  0x10   :  { %6324 = sst [smem:[#allocation23_spill]] %s4778_s29 }
  0x11   :  { %s4798_s19 = sld [smem:[%s6280_s0 + %s4710_s15]]   ;;  %s4715_s15 = smov 15  }
  0x12   :  { %s4803_s24 = sld [smem:[%s6280_s0 + %s4711_s20]]  }
  0x13   :  { %6325 = sst [smem:[#allocation24_spill]] %s4783_s3 }
  0x14   :  { %6326 = sst [smem:[#allocation25_spill]] %s4788_s8 }
  0x15   :  { %6327 = sst [smem:[#allocation26_spill]] %s4793_s14 }
  0x16   :  { %s4808_s30 = sld [smem:[%s6280_s0 + %s4712_s26]]  }
  0x17   :  { %6328 = sst [smem:[#allocation27_spill]] %s4798_s19 }
  0x18   :  { %6329 = sst [smem:[#allocation28_spill]] %s4803_s24 }
  0x19   :  { %s4813_s6 = sld [smem:[%s6280_s0 + %s4713_s1]]  }
  0x1a   :  { %s4818_s12 = sld [smem:[%s6280_s0 + %s4714_s7]]   ;;  %s4718_s7 = smov 18  }
  0x1b   :  { %s4823_s20 = sld [smem:[%s6280_s0 + %s4715_s15]]   ;;  %s4719_s15 = smov 19  }
  0x1c   :  { %6330 = sst [smem:[#allocation29_spill]] %s4808_s30 }
  0x1d   :  { %s4828_s27 = sld [smem:[%s6280_s0 + %s4716_s22]]   ;;  %s4720_s22 = smov 20  }
  0x1e   :  { %s4833_s4 = sld [smem:[%s6280_s0 + %s4717_s28]]   ;;  %s4721_s28 = smov 21  }
  0x1f   :  { %s4838_s24 = sld [smem:[%s6280_s0 + %s4718_s7]]   ;;  %s4722_s7 = smov 22  }
  0x20   :  { %6331 = sst [smem:[#allocation30_spill]] %s4818_s12 }
  0x21   :  { %s4843_s13 = sld [smem:[%s6280_s0 + %s4719_s15]]   ;;  %s4723_s15 = smov 23  }
  0x22   :  { %s4848_s9 = sld [smem:[%s6280_s0 + %s4720_s22]]   ;;  %s4724_s22 = smov 24  }
  0x23   :  { %s4853_s5 = sld [smem:[%s6280_s0 + %s4721_s28]]   ;;  %s4725_s28 = smov 25  }
  0x24   :  { %s4858_s3 = sld [smem:[%s6280_s0 + %s4722_s7]]   ;;  %s4726_s7 = smov 26  }
  0x25   :  { %s4863_s29 = sld [smem:[%s6280_s0 + %s4723_s15]]   ;;  %s4727_s15 = smov 27  }
  0x26   :  { %s4868_s8 = sld [smem:[%s6280_s0 + %s4724_s22]]   ;;  %s4728_s22 = smov 28  }
  0x27   :  { %s4873_s25 = sld [smem:[%s6280_s0 + %s4725_s28]]   ;;  %s4729_s28 = smov 29  }
  0x28   :  { %s4878_s19 = sld [smem:[%s6280_s0 + %s4726_s7]]  }
  0x29   :  { %s4883_s21 = sld [smem:[%s6280_s0 + %s4727_s15]]  }
  0x2a   :  { %s4896_s14 = sld [smem:[%s6280_s0 + %s4730_s10]]  }
  0x2c   :  { %6332 = sst [smem:[#allocation31_spill]] %s4868_s8 }
  0x2d   :  { %6333 = sst [smem:[#allocation32_spill]] %s4873_s25 }
  0x2e   :  { %6334 = sst [smem:[#allocation33_spill]] %s4878_s19 }
  0x2f   :  { %s4888_s8 = sld [smem:[%s6280_s0 + %s4728_s22]]  }
  0x30   :  { %s4207_s25 = sld [smem:[%s6280_s0 + %s4729_s28]]  }
  0x31   :  { %6335 = sst [smem:[#allocation34_spill]] %s4896_s14 }
  0x36   :  { %v66_v0 = vstv %s4207_s25 }
  0x37   :  { %67 = vst [vmem:[#allocation14] sm:$0x1] %v66_v0 }
  0x38   :  { %68 = vsyncpa [#allocation16], 0  ;;  %s4898_s15 = smov 0  }
  0x39 LB: > { %s6336_s19 = sld [smem:[#allocation33_spill]]  ;;  %s4905_s18 = sadd.s32 4294967295, %s4699_s15   ;;  %s4699_s15 = sphi %s4898_s15, %s74_s15  }
  0x3a   : > { %6337 = sst [smem:[#allocation35_spill]] %s4699_s15  ;;  %p4210_p0 = scmp.ge.s32.totalorder %s4699_s15, 1 }
  0x3b   : > { %p790_p1 = scmp.lt.s32.totalorder %s4699_s15, 3  ;;  %p4211_p2 = scmp.ne.s32.totalorder %s4905_s18, 0 }
  0x3c   : > { %p4499_p3 = scmp.eq.s32.totalorder %s4905_s18, 0  ;;  %s4731_s25 = smov [#allocation15]  }
  0x3d   : > { %p4911_p4 = pnand %p4210_p0, %p790_p1  ;;  %s845_s22 = sshll.u32 %s4731_s25, 4  ;;  %s846_s22 = int_to_ptr.vmem [resolvable:$true] %s845_s22 }
  0x3f   : > { %s843_s16 = sshll.u32 %s6336_s19, 4  ;;  %p4495_p5 = pneg %p4911_p4  ;;  %s844_s16 = int_to_ptr.hbm [resolvable:$true] %s843_s16 }
  0x40   : > { %s4659_s26 = sshra.s32 %s844_s16, 4  ;;  %s4666_s1 = scalar_lea.hbm %s6336_s19, 32  ;;  %s4660_s26 = int_to_ptr.hbm [resolvable:$true] %s4659_s26 }
  0x41   : > { %p4919_p6 = pnand %p4499_p3, %p4495_p5  ;;  %s4661_s28 = scalar_lea.hbm %s4660_s26, 32 }
  0x42   : > { %p4662_p7 = scmp.ne.s32.totalorder %s4660_s26, %s4661_s28  ;;  %p4667_p11 = scmp.lt.s32.totalorder %s4660_s26, %s6336_s19 }
  0x43   : > { %p4663_p8 = pneg %p4919_p6  ;;  %p4668_p12 = scmp.lt.s32.totalorder %s4666_s1, %s4661_s28 }
  0x45   : > { %p4664_p9 = pnand %p4663_p8, %p4662_p7  ;;  %p4669_p13 = por %p4668_p12, %p4667_p11 }
  0x47   : > { %p4665_p10 = pneg %p4664_p9 }
  0x49   : > { %p4670_p0 = pnand %p4669_p13, %p4665_p10 }
  0x4b   : > { %4673 = shalt.err (!%p4670_p0)
}
  0x4c   : > { %s4732_s2 = smov 128   ;;  %s4733_s10 = smov 8  }
  0x4d   : > { %4498 = dma.hbm_to_vmem [thread:$0]  (!%p4919_p6), %s844_s16, 512, %s846_s22, [#allocation16], %s4732_s2, %s4732_s2, %s4733_s10  }
  0x4e   : > { %959 = sbr.rel (%p4911_p4) target bundleno = 4146 (0x1032), region = 140 }
  0x53   : > { %4694 = dma.done.wait (%p4499_p3), [#allocation16], 512  }
  0x54   : > { %4696 = vsyncadd (%p4499_p3), [#allocation16], 4294966784  ;;  %s6340_s30 = sld [smem:[#allocation29_spill]]  ;;  %p1081_p1 = scmp.lt.s32.totalorder %s4905_s18, 1 }
  0x55   : > { %s6341_s12 = sld [smem:[#allocation30_spill]] }
  0x56   : > { %s4937_s7 = scalar_select %p1081_p1, %s4905_s18, 1 }
  0x57   : > { %s6342_s15 = sld [smem:[#allocation26_spill]] (!%p4211_p2) }
  0x58   : > { %s4464_s11 = sshll.u32 %s4937_s7, 6  ;;  %s4465_s25 = sshll.u32 %s4937_s7, 5 }
  0x59   : > { %s4950_s23 = sshll.u32 %s4937_s7, 2  ;;  %s4955_s28 = scalar_lea.vmem %s4828_s27, %s4464_s11 }
  0x5a   : > { %s4943_s0 = scalar_lea.vmem %s6340_s30, %s4464_s11  ;;  %s1097_s26 = scalar_lea.vmem %s4823_s20, %s4950_s23 }
  0x5b   : > { %s4947_s22 = scalar_lea.vmem %s6341_s12, %s4465_s25  ;;  %s4960_s2 = scalar_lea.vmem %s4838_s24, %s4465_s25 }
  0x5c   : > { %s4965_s19 = scalar_lea.vmem %s4848_s9, %s4465_s25  ;;  %s4968_s16 = scalar_lea.vmem %s4853_s5, %s4465_s25 }
  0x5d   : > { %s4971_s30 = scalar_lea.vmem %s4858_s3, %s4465_s25  ;;  %1138 = sbr.rel (%p4211_p2) target bundleno = 325 (0x145), region = 148 }
  0x5e   : > { %s6343_s14 = smov (!%p4211_p2), %s6342_s15  ;;  %s6346_s25 = sld [smem:[#allocation27_spill]] (!%p4211_p2) }
  0x5f   : > { %s6348_s12 = sld [smem:[#allocation25_spill]] (!%p4211_p2) }
  0x60   : > { %s6349_s10 = sld [smem:[#allocation23_spill]] (!%p4211_p2) }
  0x61   : > { %s6350_s1 = sld [smem:[#allocation24_spill]] (!%p4211_p2) }
  0x62   : > { %v1216_v1 = vld [vmem:[%s4763_s17 + $0x10] sm:$0xff]  ;;  %v1214_v2 = vld [vmem:[%s4763_s17] sm:$0xff]  ;;  %v4734_v4 = vmov 0   ;;  %v1217_v5 = vld [vmem:[%s4763_s17 + $0x18] sm:$0xff]  ;;  %v1188_v32 = vlaneseq  ;;  %vm1212_vm0 = vcmask 123904   ;;  %v4735_v38 = vmov 0.0  }
  0x63   : > { %v1186_v3 = vld [vmem:[%s6342_s15] sm:$0xff]  ;;  %4550 = vset.pattern.permute.xlu2 %v4734_v4  ;;  %4549 = vset.pattern.permute.xlu1 %v4734_v4  ;;  %v1215_v6 = vld [vmem:[%s4763_s17 + $0x8] sm:$0xff]  ;;  %v1220_v8 = vld [vmem:[%s4763_s17 + $0x30] sm:$0xff]  ;;  %s6344_s15 = sld [smem:[#allocation21_spill]]  ;;  %vm1478_vm4 = vcmask 912384   ;;  %vm1582_vm5 = vcmask 306176  }
  0x64   : > { %4548 = vset.pattern.permute.xlu0 %v4734_v4  ;;  %1235 = vperm.xlu2 %4550, %v1216_v1   ;;  %v1187_v7 = vld [vmem:[%s6343_s14 + $0x8] sm:$0xff]  ;;  %v1218_v10 = vld [vmem:[%s4763_s17 + $0x20] sm:$0xff]  ;;  %v1221_v13 = vld [vmem:[%s4763_s17 + $0x38] sm:$0xff]  ;;  %v1207_v34 = vshrl.u32 %v1188_v32, 7  ;;  %v5023_v54 = vand.u32 127, %v1188_v32  ;;  %vm1326_vm9 = vcmask 125952  }
  0x65   : > { %1229 = vperm.xlu1 %4549, %v1214_v2   ;;  %1191 = vperm.xlu0 %4548, %v1186_v3   ;;  %v1219_v9 = vld [vmem:[%s4763_s17 + $0x28] sm:$0xff]  ;;  %v1222_v12 = vld [vmem:[%s4763_s17 + $0x40] sm:$0xff]  ;;  %v1225_v15 = vld [vmem:[%s4763_s17 + $0x58] sm:$0xff]  ;;  %vm1202_vm13 = vcmask 15360  }
  0x66   : > { %v1223_v11 = vld [vmem:[%s4763_s17 + $0x48] sm:$0xff]  ;;  %v1226_v14 = vld [vmem:[%s4763_s17 + $0x60] sm:$0xff]  ;;  %v1224_v16 = vld [vmem:[%s4763_s17 + $0x50] sm:$0xff]  ;;  %v1468_v42 = vadd.s32 8, %v1207_v34 }
  0x67   : > { %v1227_v19 = vld [vmem:[%s4763_s17 + $0x68] sm:$0xff]  ;;  %v4551_v33 = vld [vmem:[%s6346_s25] ss:$0 sm:$0xff]  ;;  %v1483_v37 = vld [vmem:[%s6349_s10 + $0x10] sm:$0xff]  ;;  %s6352_s25 = sld [smem:[#allocation19_spill]] }
  0x68   : > { %v4553_v36 = vld [vmem:[%s6348_s12] ss:$0 sm:$0xff]  ;;  %vm1209_vm1 = vcmp.eq.s32.totalorder %v4551_v33, %v1207_v34  ;;  %v1482_v40 = vld [vmem:[%s6349_s10 + $0x8] sm:$0xff]  ;;  %v1484_v53 = vld [vmem:[%s6349_s10 + $0x18] sm:$0xff]  ;;  %s6351_s12 = sld [smem:[#allocation18_spill]] }
  0x69   : > { %s6345_s11 = smov %s6344_s15  ;;  %v1342_v17 = vld [vmem:[%s6344_s15 + $0x8] sm:$0xff]  ;;  %s6347_s15 = sld [smem:[#allocation22_spill]]  ;;  %v4235_v39 = vsel %vm1209_vm1, 1.0, %v4735_v38  ;;  %v1481_v41 = vld [vmem:[%s6349_s10] sm:$0xff]  ;;  %vm1574_vm3 = vcmp.eq.s32.totalorder %v4553_v36, %v1207_v34  ;;  %vm1575_vm7 = vcmp.eq.s32.totalorder %v4553_v36, %v1468_v42  ;;  %v1530_v58 = vld [vmem:[%s6350_s1 + $0x18] sm:$0xff] }
  0x6a   : > { %v1341_v18 = vld [vmem:[%s6345_s11] sm:$0xff]  ;;  %v1344_v21 = vld [vmem:[%s6345_s11 + $0x18] sm:$0xff]  ;;  %v1343_v22 = vld [vmem:[%s6345_s11 + $0x10] sm:$0xff]  ;;  %1213 = vst.msk [vmem:[#allocation7] sm:$0x3] %vm1212_vm0, %v4235_v39  ;;  %v4276_v44 = vsel %vm1574_vm3, 1.0, %v4735_v38 }
  0x6b   : > { %v1345_v20 = vld [vmem:[%s6345_s11 + $0x20] sm:$0xff]  ;;  %v1348_v23 = vld [vmem:[%s6345_s11 + $0x38] sm:$0xff]  ;;  %v1347_v24 = vld [vmem:[%s6345_s11 + $0x30] sm:$0xff]  ;;  %v4277_v47 = vsel %vm1575_vm7, 1.0, %v4735_v38  ;;  %v1580_v48 = vpack.c.bf16 %v4276_v44, %v4276_v44 }
  0x6c   : > { %1238 = vperm.xlu2 %4550, %v1217_v5   ;;  %v1346_v25 = vld [vmem:[%s6345_s11 + $0x28] sm:$0xff]  ;;  %v1351_v26 = vld [vmem:[%s6345_s11 + $0x50] sm:$0xff]  ;;  %v1349_v28 = vld [vmem:[%s6345_s11 + $0x40] sm:$0xff]  ;;  %v1581_v50 = vpack.c.bf16 %v4277_v47, %v4277_v47 }
  0x6d   : > { %1232 = vperm.xlu1 %4549, %v1215_v6   ;;  %1194 = vperm.xlu0 %4548, %v1187_v7   ;;  %v1350_v27 = vld [vmem:[%s6345_s11 + $0x48] sm:$0xff]  ;;  %v1353_v30 = vld [vmem:[%s6345_s11 + $0x60] sm:$0xff]  ;;  %v1352_v31 = vld [vmem:[%s6345_s11 + $0x58] sm:$0xff]  ;;  %1583 = vst.msk [vmem:[#allocation13] sm:$0xf] %vm1582_vm5, %v1580_v48 }
  0x6e   : > { %v1354_v29 = vld [vmem:[%s6345_s11 + $0x68] sm:$0xff]  ;;  %v1527_v51 = vld [vmem:[%s6350_s1] sm:$0xff]  ;;  %1584 = vst.msk [vmem:[#allocation13 + $0x4] sm:$0xf] %vm1582_vm5, %v1581_v50  ;;  %v1529_v59 = vld [vmem:[%s6350_s1 + $0x10] sm:$0xff] }
  0x6f   : > { %v4552_v35 = vld [vmem:[%s6347_s15] ss:$0 sm:$0xff]  ;;  %v1528_v60 = vld [vmem:[%s6350_s1 + $0x8] sm:$0xff]  ;;  %s6353_s15 = sld [smem:[#allocation20_spill]] }
  0x70   : > { %vm1470_vm2 = vcmp.eq.s32.totalorder %v4552_v35, %v1207_v34  ;;  %vm1471_vm6 = vcmp.eq.s32.totalorder %v4552_v35, %v1468_v42  ;;  %v1485_v52 = vld [vmem:[%s6349_s10 + $0x20] sm:$0x3f] }
  0x71   : > { %v4264_v43 = vsel %vm1470_vm2, 1.0, %v4735_v38  ;;  %v4265_v46 = vsel %vm1471_vm6, 1.0, %v4735_v38  ;;  %v1531_v0 = vld [vmem:[%s6350_s1 + $0x20] sm:$0x3f] }
  0x72   : > { %v1476_v45 = vpack.c.bf16 %v4264_v43, %v4264_v43  ;;  %v1477_v49 = vpack.c.bf16 %v4265_v46, %v4265_v46 }
  0x74   : > { %1247 = vperm.xlu2 %4550, %v1220_v8   ;;  %1479 = vst.msk [vmem:[#allocation10] sm:$0xf] %vm1478_vm4, %v1476_v45 }
  0x75   : > { %1244 = vperm.xlu1 %4549, %v1219_v9   ;;  %1241 = vperm.xlu0 %4548, %v1218_v10   ;;  %1480 = vst.msk [vmem:[#allocation10 + $0x4] sm:$0xf] %vm1478_vm4, %v1477_v49 }
  0x7c   : > { %1256 = vperm.xlu2 %4550, %v1223_v11  }
  0x7d   : > { %1253 = vperm.xlu1 %4549, %v1222_v12   ;;  %1250 = vperm.xlu0 %4548, %v1221_v13  }
  0x84   : > { %1265 = vperm.xlu2 %4550, %v1226_v14  }
  0x85   : > { %1262 = vperm.xlu1 %4549, %v1225_v15   ;;  %1259 = vperm.xlu0 %4548, %v1224_v16  }
  0x8c   : > { %1359 = vperm.xlu2 %4550, %v1342_v17  }
  0x8d   : > { %1356 = vperm.xlu1 %4549, %v1341_v18   ;;  %1268 = vperm.xlu0 %4548, %v1227_v19  }
  0x94   : > { %1368 = vperm.xlu2 %4550, %v1345_v20  }
  0x95   : > { %1365 = vperm.xlu1 %4549, %v1344_v21   ;;  %1362 = vperm.xlu0 %4548, %v1343_v22  }
  0x9c   : > { %1377 = vperm.xlu2 %4550, %v1348_v23  }
  0x9d   : > { %1374 = vperm.xlu1 %4549, %v1347_v24   ;;  %1371 = vperm.xlu0 %4548, %v1346_v25  }
  0xa4   : > { %1386 = vperm.xlu2 %4550, %v1351_v26  }
  0xa5   : > { %1383 = vperm.xlu1 %4549, %v1350_v27   ;;  %1380 = vperm.xlu0 %4548, %v1349_v28  }
  0xac   : > { %1395 = vperm.xlu2 %4550, %v1354_v29  }
  0xad   : > { %1392 = vperm.xlu1 %4549, %v1353_v30   ;;  %1389 = vperm.xlu0 %4548, %v1352_v31  }
  0xb4   : > { %1493 = vperm.xlu2 %4550, %v1483_v37  }
  0xb5   : > { %1490 = vperm.xlu1 %4549, %v1482_v40   ;;  %1487 = vperm.xlu0 %4548, %v1481_v41  }
  0xbc   : > { %1533 = vperm.xlu2 %4550, %v1527_v51  }
  0xbd   : > { %1499 = vperm.xlu1 %4549, %v1485_v52   ;;  %1496 = vperm.xlu0 %4548, %v1484_v53  }
  0xbe   : > { %v1236_v55 = vpop.permute.xlu2 %1235 }
  0xbf   : > { %vm1272_vm8 = vcmp.eq.s32.totalorder %v1236_v55, %v5023_v54 }
  0xc0   : > { %v4238_v56 = vsel %vm1272_vm8, 1.0, %v4735_v38 }
  0xc1   : > { %v1314_v57 = vpack.c.bf16 %v4238_v56, %v4238_v56 }
  0xc3   : > { %1329 = vst.msk [vmem:[#allocation8 + $0x8] sm:$0xf] %vm1326_vm9, %v1314_v57 }
  0xc4   : > { %1542 = vperm.xlu2 %4550, %v1530_v58  }
  0xc5   : > { %1539 = vperm.xlu1 %4549, %v1529_v59   ;;  %1536 = vperm.xlu0 %4548, %v1528_v60  }
  0xc6   : > { %v1239_v61 = vpop.permute.xlu2 %1238 }
  0xc7   : > { %vm1273_vm10 = vcmp.eq.s32.totalorder %v1239_v61, %v5023_v54 }
  0xc8   : > { %v4239_v62 = vsel %vm1273_vm10, 1.0, %v4735_v38 }
  0xc9   : > { %v1315_v63 = vpack.c.bf16 %v4239_v62, %v4239_v62 }
  0xcb   : > { %1330 = vst.msk [vmem:[#allocation8 + $0xc] sm:$0xf] %vm1326_vm9, %v1315_v63 }
  0xcd   : > { %1545 = vperm.xlu0 %4548, %v1531_v0  }
  0xce   : > { %v1248_v1 = vpop.permute.xlu2 %1247 }
  0xcf   : > { %vm1276_vm11 = vcmp.eq.s32.totalorder %v1248_v1, %v5023_v54 }
  0xd0   : > { %v4242_v2 = vsel %vm1276_vm11, 1.0, %v4735_v38 }
  0xd1   : > { %v1318_v3 = vpack.c.bf16 %v4242_v2, %v4242_v2 }
  0xd3   : > { %1333 = vst.msk [vmem:[#allocation8 + $0x18] sm:$0xf] %vm1326_vm9, %v1318_v3 }
  0xd6   : > { %v1257_v4 = vpop.permute.xlu2 %1256 }
  0xd7   : > { %vm1279_vm12 = vcmp.eq.s32.totalorder %v1257_v4, %v5023_v54  ;;  %v1230_v5 = vpop.permute.xlu1 %1229  ;;  %v1192_v6 = vpop.permute.xlu0 %1191 }
  0xd8   : > { %v4245_v7 = vsel %vm1279_vm12, 1.0, %v4735_v38  ;;  %vm1270_vm14 = vcmp.eq.s32.totalorder %v1230_v5, %v5023_v54  ;;  %vm1196_vm15 = vcmp.eq.s32.totalorder %v1192_v6, %v5023_v54 }
  0xd9   : > { %v1321_v8 = vpack.c.bf16 %v4245_v7, %v4245_v7  ;;  %v4236_v9 = vsel %vm1270_vm14, 1.0, %v4735_v38  ;;  %v4233_v10 = vsel %vm1196_vm15, 1.0, %v4735_v38 }
  0xda   : > { %v1312_v11 = vpack.c.bf16 %v4236_v9, %v4236_v9  ;;  %1203 = vst.msk [vmem:[#allocation6] sm:$0xff] %vm1202_vm13, %v4233_v10 }
  0xdb   : > { %1336 = vst.msk [vmem:[#allocation8 + $0x24] sm:$0xf] %vm1326_vm9, %v1321_v8 }
  0xdc   : > { %1327 = vst.msk [vmem:[#allocation8] sm:$0xf] %vm1326_vm9, %v1312_v11 }
  0xde   : > { %v1266_v12 = vpop.permute.xlu2 %1265 }
  0xdf   : > { %vm1282_vm0 = vcmp.eq.s32.totalorder %v1266_v12, %v5023_v54  ;;  %v1233_v13 = vpop.permute.xlu1 %1232  ;;  %v1195_v14 = vpop.permute.xlu0 %1194 }
  0xe0   : > { %v4248_v15 = vsel %vm1282_vm0, 1.0, %v4735_v38  ;;  %vm1271_vm1 = vcmp.eq.s32.totalorder %v1233_v13, %v5023_v54  ;;  %vm1197_vm2 = vcmp.eq.s32.totalorder %v1195_v14, %v5023_v54 }
  0xe1   : > { %v1324_v16 = vpack.c.bf16 %v4248_v15, %v4248_v15  ;;  %v4237_v17 = vsel %vm1271_vm1, 1.0, %v4735_v38  ;;  %v4234_v18 = vsel %vm1197_vm2, 1.0, %v4735_v38 }
  0xe2   : > { %v1313_v19 = vpack.c.bf16 %v4237_v17, %v4237_v17  ;;  %1204 = vst.msk [vmem:[#allocation6 + $0x8] sm:$0xff] %vm1202_vm13, %v4234_v18 }
  0xe3   : > { %1339 = vst.msk [vmem:[#allocation8 + $0x30] sm:$0xf] %vm1326_vm9, %v1324_v16 }
  0xe4   : > { %1328 = vst.msk [vmem:[#allocation8 + $0x4] sm:$0xf] %vm1326_vm9, %v1313_v19 }
  0xe6   : > { %v1360_v20 = vpop.permute.xlu2 %1359 }
  0xe7   : > { %vm1398_vm3 = vcmp.eq.s32.totalorder %v1360_v20, %v5023_v54  ;;  %v1245_v21 = vpop.permute.xlu1 %1244  ;;  %v1242_v22 = vpop.permute.xlu0 %1241 }
  0xe8   : > { %v4251_v23 = vsel %vm1398_vm3, 1.0, %v4735_v38  ;;  %vm1275_vm4 = vcmp.eq.s32.totalorder %v1245_v21, %v5023_v54  ;;  %vm1274_vm5 = vcmp.eq.s32.totalorder %v1242_v22, %v5023_v54 }
  0xe9   : > { %v1440_v24 = vpack.c.bf16 %v4251_v23, %v4251_v23  ;;  %v4241_v25 = vsel %vm1275_vm4, 1.0, %v4735_v38  ;;  %v4240_v26 = vsel %vm1274_vm5, 1.0, %v4735_v38 }
  0xea   : > { %v1317_v27 = vpack.c.bf16 %v4241_v25, %v4241_v25  ;;  %v1316_v28 = vpack.c.bf16 %v4240_v26, %v4240_v26 }
  0xeb   : > { %1454 = vst.msk [vmem:[#allocation9 + $0x4] sm:$0xf] %vm1326_vm9, %v1440_v24 }
  0xec   : > { %1332 = vst.msk [vmem:[#allocation8 + $0x14] sm:$0xf] %vm1326_vm9, %v1317_v27 }
  0xed   : > { %1331 = vst.msk [vmem:[#allocation8 + $0x10] sm:$0xf] %vm1326_vm9, %v1316_v28 }
  0xee   : > { %v1369_v29 = vpop.permute.xlu2 %1368 }
  0xef   : > { %vm1401_vm6 = vcmp.eq.s32.totalorder %v1369_v29, %v5023_v54  ;;  %v1254_v30 = vpop.permute.xlu1 %1253  ;;  %v1251_v31 = vpop.permute.xlu0 %1250 }
  0xf0   : > { %v4254_v32 = vsel %vm1401_vm6, 1.0, %v4735_v38  ;;  %vm1278_vm7 = vcmp.eq.s32.totalorder %v1254_v30, %v5023_v54  ;;  %vm1277_vm8 = vcmp.eq.s32.totalorder %v1251_v31, %v5023_v54  ;;  %v1139_v30 = vld [vmem:[%s6351_s12] sm:$0xff]  ;;  %v1140_v31 = vld [vmem:[%s6351_s12 + $0x8] sm:$0xff] }
  0xf1   : > { %v1443_v33 = vpack.c.bf16 %v4254_v32, %v4254_v32  ;;  %v4244_v34 = vsel %vm1278_vm7, 1.0, %v4735_v38  ;;  %v4243_v35 = vsel %vm1277_vm8, 1.0, %v4735_v38 }
  0xf2   : > { %v1320_v36 = vpack.c.bf16 %v4244_v34, %v4244_v34  ;;  %v1319_v37 = vpack.c.bf16 %v4243_v35, %v4243_v35  ;;  %v1146_v34 = vld [vmem:[%s6352_s25] sm:$0xff]  ;;  %v1147_v35 = vld [vmem:[%s6352_s25 + $0x8] sm:$0xff] }
  0xf3   : > { %1457 = vst.msk [vmem:[#allocation9 + $0x10] sm:$0xf] %vm1326_vm9, %v1443_v33 }
  0xf4   : > { %1335 = vst.msk [vmem:[#allocation8 + $0x20] sm:$0xf] %vm1326_vm9, %v1320_v36 }
  0xf5   : > { %1334 = vst.msk [vmem:[#allocation8 + $0x1c] sm:$0xf] %vm1326_vm9, %v1319_v37 }
  0xf6   : > { %v1378_v39 = vpop.permute.xlu2 %1377 }
  0xf7   : > { %vm1404_vm10 = vcmp.eq.s32.totalorder %v1378_v39, %v5023_v54  ;;  %v1263_v40 = vpop.permute.xlu1 %1262  ;;  %v1260_v41 = vpop.permute.xlu0 %1259 }
  0xf8   : > { %v4257_v42 = vsel %vm1404_vm10, 1.0, %v4735_v38  ;;  %vm1281_vm11 = vcmp.eq.s32.totalorder %v1263_v40, %v5023_v54  ;;  %vm1280_vm12 = vcmp.eq.s32.totalorder %v1260_v41, %v5023_v54  ;;  %v1148_v41 = vld [vmem:[%s6352_s25 + $0x10] sm:$0xff] }
  0xf9   : > { %v1446_v43 = vpack.c.bf16 %v4257_v42, %v4257_v42  ;;  %v4247_v44 = vsel %vm1281_vm11, 1.0, %v4735_v38  ;;  %v4246_v45 = vsel %vm1280_vm12, 1.0, %v4735_v38  ;;  %v1149_v42 = vld [vmem:[%s6352_s25 + $0x18] sm:$0xff] }
  0xfa   : > { %v1323_v46 = vpack.c.bf16 %v4247_v44, %v4247_v44  ;;  %v1322_v47 = vpack.c.bf16 %v4246_v45, %v4246_v45  ;;  %v1151_v44 = vld [vmem:[%s6352_s25 + $0x28] sm:$0xff] }
  0xfb   : > { %1460 = vst.msk [vmem:[#allocation9 + $0x1c] sm:$0xf] %vm1326_vm9, %v1446_v43  ;;  %v1150_v43 = vld [vmem:[%s6352_s25 + $0x20] sm:$0xff] }
  0xfc   : > { %1338 = vst.msk [vmem:[#allocation8 + $0x2c] sm:$0xf] %vm1326_vm9, %v1323_v46 }
  0xfd   : > { %1337 = vst.msk [vmem:[#allocation8 + $0x28] sm:$0xf] %vm1326_vm9, %v1322_v47  ;;  %v1152_v47 = vld [vmem:[%s6352_s25 + $0x30] sm:$0xff] }
  0xfe   : > { %v1387_v48 = vpop.permute.xlu2 %1386 }
  0xff   : > { %vm1407_vm13 = vcmp.eq.s32.totalorder %v1387_v48, %v5023_v54  ;;  %v1357_v49 = vpop.permute.xlu1 %1356  ;;  %v1269_v50 = vpop.permute.xlu0 %1268  ;;  %v1153_v48 = vld [vmem:[%s6352_s25 + $0x38] sm:$0xff] }
 0x100   : > { %v4260_v51 = vsel %vm1407_vm13, 1.0, %v4735_v38  ;;  %vm1397_vm14 = vcmp.eq.s32.totalorder %v1357_v49, %v5023_v54  ;;  %vm1283_vm15 = vcmp.eq.s32.totalorder %v1269_v50, %v5023_v54  ;;  %vm1141_vm13 = vcmask 523264  }
 0x101   : > { %v1449_v52 = vpack.c.bf16 %v4260_v51, %v4260_v51  ;;  %v4250_v53 = vsel %vm1397_vm14, 1.0, %v4735_v38  ;;  %v4249_v55 = vsel %vm1283_vm15, 1.0, %v4735_v38  ;;  %1142 = vst.msk [vmem:[#allocation2] sm:$0xff] %vm1141_vm13, %v1139_v30  ;;  %vm1160_vm14 = vcmask 261120  }
 0x102   : > { %v1439_v56 = vpack.c.bf16 %v4250_v53, %v4250_v53  ;;  %v1325_v57 = vpack.c.bf16 %v4249_v55, %v4249_v55  ;;  %1143 = vst.msk [vmem:[#allocation2 + $0x8] sm:$0xff] %vm1141_vm13, %v1140_v31  ;;  %v1154_v53 = vld [vmem:[%s6352_s25 + $0x40] sm:$0xff]  ;;  %v1155_v55 = vld [vmem:[%s6352_s25 + $0x48] sm:$0xff] }
 0x103   : > { %1463 = vst.msk [vmem:[#allocation9 + $0x28] sm:$0xf] %vm1326_vm9, %v1449_v52 }
 0x104   : > { %1453 = vst.msk [vmem:[#allocation9] sm:$0xf] %vm1326_vm9, %v1439_v56  ;;  %v1156_v56 = vld [vmem:[%s6352_s25 + $0x50] sm:$0xff] }
 0x105   : > { %1340 = vst.msk [vmem:[#allocation8 + $0x34] sm:$0xf] %vm1326_vm9, %v1325_v57  ;;  %v1157_v57 = vld [vmem:[%s6352_s25 + $0x58] sm:$0xff] }
 0x106   : > { %v1396_v58 = vpop.permute.xlu2 %1395  ;;  %1144 = vst.msk [vmem:[#allocation3] sm:$0xff] %vm1141_vm13, %v4735_v38 }
 0x107   : > { %vm1410_vm0 = vcmp.eq.s32.totalorder %v1396_v58, %v5023_v54  ;;  %v1366_v59 = vpop.permute.xlu1 %1365  ;;  %v1363_v60 = vpop.permute.xlu0 %1362  ;;  %1145 = vst.msk [vmem:[#allocation3 + $0x8] sm:$0xff] %vm1141_vm13, %v4735_v38 }
 0x108   : > { %v4263_v61 = vsel %vm1410_vm0, 1.0, %v4735_v38  ;;  %vm1400_vm1 = vcmp.eq.s32.totalorder %v1366_v59, %v5023_v54  ;;  %vm1399_vm2 = vcmp.eq.s32.totalorder %v1363_v60, %v5023_v54  ;;  %1161 = vst.msk [vmem:[#allocation4] sm:$0xff] %vm1160_vm14, %v1146_v34  ;;  %v1158_v60 = vld [vmem:[%s6352_s25 + $0x60] sm:$0xff] }
 0x109   : > { %v1452_v62 = vpack.c.bf16 %v4263_v61, %v4263_v61  ;;  %v4253_v63 = vsel %vm1400_vm1, 1.0, %v4735_v38  ;;  %v4252_v0 = vsel %vm1399_vm2, 1.0, %v4735_v38  ;;  %1162 = vst.msk [vmem:[#allocation4 + $0x8] sm:$0xff] %vm1160_vm14, %v1147_v35  ;;  %v1159_v61 = vld [vmem:[%s6352_s25 + $0x68] sm:$0xff] }
 0x10a   : > { %v1442_v1 = vpack.c.bf16 %v4253_v63, %v4253_v63  ;;  %v1441_v2 = vpack.c.bf16 %v4252_v0, %v4252_v0  ;;  %1163 = vst.msk [vmem:[#allocation4 + $0x10] sm:$0xff] %vm1160_vm14, %v1148_v41 }
 0x10b   : > { %1466 = vst.msk [vmem:[#allocation9 + $0x34] sm:$0xf] %vm1326_vm9, %v1452_v62 }
 0x10c   : > { %1456 = vst.msk [vmem:[#allocation9 + $0xc] sm:$0xf] %vm1326_vm9, %v1442_v1 }
 0x10d   : > { %1455 = vst.msk [vmem:[#allocation9 + $0x8] sm:$0xf] %vm1326_vm9, %v1441_v2  ;;  %v1175_v2 = vld [vmem:[%s6353_s15] sm:$0xff] }
 0x10e   : > { %v1494_v3 = vpop.permute.xlu2 %1493  ;;  %1164 = vst.msk [vmem:[#allocation4 + $0x18] sm:$0xff] %vm1160_vm14, %v1149_v42 }
 0x10f   : > { %vm1503_vm3 = vcmp.eq.s32.totalorder %v1494_v3, %v5023_v54  ;;  %v1375_v4 = vpop.permute.xlu1 %1374  ;;  %v1372_v5 = vpop.permute.xlu0 %1371  ;;  %1165 = vst.msk [vmem:[#allocation4 + $0x20] sm:$0xff] %vm1160_vm14, %v1150_v43  ;;  %v1176_v3 = vld [vmem:[%s6353_s15 + $0x8] sm:$0xff] }
 0x110   : > { %v4268_v6 = vsel %vm1503_vm3, 1.0, %v4735_v38  ;;  %vm1403_vm4 = vcmp.eq.s32.totalorder %v1375_v4, %v5023_v54  ;;  %vm1402_vm5 = vcmp.eq.s32.totalorder %v1372_v5, %v5023_v54  ;;  %vm1525_vm3 = vcmask 124928   ;;  %1166 = vst.msk [vmem:[#allocation4 + $0x28] sm:$0xff] %vm1160_vm14, %v1151_v44  ;;  %v1177_v4 = vld [vmem:[%s6353_s15 + $0x10] sm:$0xff]  ;;  %v1178_v5 = vld [vmem:[%s6353_s15 + $0x18] sm:$0xff] }
 0x111   : > { %v1518_v7 = vpack.c.bf16 %v4268_v6, %v4268_v6  ;;  %v4256_v8 = vsel %vm1403_vm4, 1.0, %v4735_v38  ;;  %v4255_v9 = vsel %vm1402_vm5, 1.0, %v4735_v38  ;;  %1167 = vst.msk [vmem:[#allocation4 + $0x30] sm:$0xff] %vm1160_vm14, %v1152_v47 }
 0x112   : > { %v1445_v10 = vpack.c.bf16 %v4256_v8, %v4256_v8  ;;  %v1444_v11 = vpack.c.bf16 %v4255_v9, %v4255_v9  ;;  %1168 = vst.msk [vmem:[#allocation4 + $0x38] sm:$0xff] %vm1160_vm14, %v1153_v48 }
 0x113   : > { %1523 = vst.msk [vmem:[#allocation11 + $0x8] sm:$0xf] %vm1326_vm9, %v1518_v7  ;;  %v1179_v7 = vld [vmem:[%s6353_s15 + $0x20] sm:$0x3f] }
 0x114   : > { %1459 = vst.msk [vmem:[#allocation9 + $0x18] sm:$0xf] %vm1326_vm9, %v1445_v10 }
 0x115   : > { %1458 = vst.msk [vmem:[#allocation9 + $0x14] sm:$0xf] %vm1326_vm9, %v1444_v11 }
 0x116   : > { %v1534_v12 = vpop.permute.xlu2 %1533  ;;  %1169 = vst.msk [vmem:[#allocation4 + $0x40] sm:$0xff] %vm1160_vm14, %v1154_v53 }
 0x117   : > { %vm1547_vm6 = vcmp.eq.s32.totalorder %v1534_v12, %v5023_v54  ;;  %v1384_v13 = vpop.permute.xlu1 %1383  ;;  %v1381_v14 = vpop.permute.xlu0 %1380  ;;  %1170 = vst.msk [vmem:[#allocation4 + $0x48] sm:$0xff] %vm1160_vm14, %v1155_v55 }
 0x118   : > { %v4271_v15 = vsel %vm1547_vm6, 1.0, %v4735_v38  ;;  %vm1406_vm7 = vcmp.eq.s32.totalorder %v1384_v13, %v5023_v54  ;;  %vm1405_vm8 = vcmp.eq.s32.totalorder %v1381_v14, %v5023_v54  ;;  %1171 = vst.msk [vmem:[#allocation4 + $0x50] sm:$0xff] %vm1160_vm14, %v1156_v56  ;;  %vm1184_vm6 = vcmask 259072  }
 0x119   : > { %v1562_v16 = vpack.c.bf16 %v4271_v15, %v4271_v15  ;;  %v4259_v17 = vsel %vm1406_vm7, 1.0, %v4735_v38  ;;  %v4258_v18 = vsel %vm1405_vm8, 1.0, %v4735_v38  ;;  %1172 = vst.msk [vmem:[#allocation4 + $0x58] sm:$0xff] %vm1160_vm14, %v1157_v57 }
 0x11a   : > { %v1448_v19 = vpack.c.bf16 %v4259_v17, %v4259_v17  ;;  %v1447_v20 = vpack.c.bf16 %v4258_v18, %v4258_v18  ;;  %1173 = vst.msk [vmem:[#allocation4 + $0x60] sm:$0xff] %vm1160_vm14, %v1158_v60 }
 0x11b   : > { %1567 = vst.msk [vmem:[#allocation12] sm:$0xf] %vm1326_vm9, %v1562_v16 }
 0x11c   : > { %1462 = vst.msk [vmem:[#allocation9 + $0x24] sm:$0xf] %vm1326_vm9, %v1448_v19 }
 0x11d   : > { %1461 = vst.msk [vmem:[#allocation9 + $0x20] sm:$0xf] %vm1326_vm9, %v1447_v20 }
 0x11e   : > { %v1543_v21 = vpop.permute.xlu2 %1542  ;;  %1174 = vst.msk [vmem:[#allocation4 + $0x68] sm:$0xff] %vm1160_vm14, %v1159_v61 }
 0x11f   : > { %vm1550_vm10 = vcmp.eq.s32.totalorder %v1543_v21, %v5023_v54  ;;  %v1393_v22 = vpop.permute.xlu1 %1392  ;;  %v1390_v23 = vpop.permute.xlu0 %1389  ;;  %1180 = vst.msk [vmem:[#allocation5] sm:$0xff] %vm1160_vm14, %v1175_v2 }
 0x120   : > { %v4274_v24 = vsel %vm1550_vm10, 1.0, %v4735_v38  ;;  %vm1409_vm11 = vcmp.eq.s32.totalorder %v1393_v22, %v5023_v54  ;;  %vm1408_vm12 = vcmp.eq.s32.totalorder %v1390_v23, %v5023_v54  ;;  %1181 = vst.msk [vmem:[#allocation5 + $0x8] sm:$0xff] %vm1160_vm14, %v1176_v3 }
 0x121   : > { %v1565_v25 = vpack.c.bf16 %v4274_v24, %v4274_v24  ;;  %v4262_v26 = vsel %vm1409_vm11, 1.0, %v4735_v38  ;;  %v4261_v27 = vsel %vm1408_vm12, 1.0, %v4735_v38  ;;  %1182 = vst.msk [vmem:[#allocation5 + $0x10] sm:$0xff] %vm1160_vm14, %v1177_v4 }
 0x122   : > { %v1451_v28 = vpack.c.bf16 %v4262_v26, %v4262_v26  ;;  %v1450_v29 = vpack.c.bf16 %v4261_v27, %v4261_v27  ;;  %1183 = vst.msk [vmem:[#allocation5 + $0x18] sm:$0xff] %vm1160_vm14, %v1178_v5 }
 0x123   : > { %1570 = vst.msk [vmem:[#allocation12 + $0xc] sm:$0xf] %vm1326_vm9, %v1565_v25 }
 0x124   : > { %1465 = vst.msk [vmem:[#allocation9 + $0x30] sm:$0xf] %vm1326_vm9, %v1451_v28 }
 0x125   : > { %1464 = vst.msk [vmem:[#allocation9 + $0x2c] sm:$0xf] %vm1326_vm9, %v1450_v29 }
 0x126   : > { %1185 = vst.msk [vmem:[#allocation5 + $0x20] sm:$0x3f] %vm1184_vm6, %v1179_v7 }
 0x127   : > { %v1491_v32 = vpop.permute.xlu1 %1490  ;;  %v1488_v33 = vpop.permute.xlu0 %1487 }
 0x128   : > { %vm1502_vm15 = vcmp.eq.s32.totalorder %v1491_v32, %v5023_v54  ;;  %vm1501_vm0 = vcmp.eq.s32.totalorder %v1488_v33, %v5023_v54 }
 0x129   : > { %v4267_v36 = vsel %vm1502_vm15, 1.0, %v4735_v38  ;;  %v4266_v37 = vsel %vm1501_vm0, 1.0, %v4735_v38 }
 0x12a   : > { %v1517_v39 = vpack.c.bf16 %v4267_v36, %v4267_v36  ;;  %v1516_v40 = vpack.c.bf16 %v4266_v37, %v4266_v37 }
 0x12c   : > { %1522 = vst.msk [vmem:[#allocation11 + $0x4] sm:$0xf] %vm1326_vm9, %v1517_v39 }
 0x12d   : > { %1521 = vst.msk [vmem:[#allocation11] sm:$0xf] %vm1326_vm9, %v1516_v40 }
 0x12f   : > { %v1500_v45 = vpop.permute.xlu1 %1499  ;;  %v1497_v46 = vpop.permute.xlu0 %1496 }
 0x130   : > { %vm1505_vm1 = vcmp.eq.s32.totalorder %v1500_v45, %v5023_v54  ;;  %vm1504_vm2 = vcmp.eq.s32.totalorder %v1497_v46, %v5023_v54 }
 0x131   : > { %v4270_v49 = vsel %vm1505_vm1, 1.0, %v4735_v38  ;;  %v4269_v50 = vsel %vm1504_vm2, 1.0, %v4735_v38 }
 0x132   : > { %v1520_v51 = vpack.c.bf16 %v4270_v49, %v4270_v49  ;;  %v1519_v52 = vpack.c.bf16 %v4269_v50, %v4269_v50 }
 0x134   : > { %1526 = vst.msk [vmem:[#allocation11 + $0x10] sm:$0x7] %vm1525_vm3, %v1520_v51 }
 0x135   : > { %1524 = vst.msk [vmem:[#allocation11 + $0xc] sm:$0xf] %vm1326_vm9, %v1519_v52 }
 0x137   : > { %v1540_v58 = vpop.permute.xlu1 %1539  ;;  %v1537_v59 = vpop.permute.xlu0 %1536 }
 0x138   : > { %vm1549_vm4 = vcmp.eq.s32.totalorder %v1540_v58, %v5023_v54  ;;  %vm1548_vm5 = vcmp.eq.s32.totalorder %v1537_v59, %v5023_v54 }
 0x139   : > { %v4273_v62 = vsel %vm1549_vm4, 1.0, %v4735_v38  ;;  %v4272_v63 = vsel %vm1548_vm5, 1.0, %v4735_v38 }
 0x13a   : > { %v1564_v0 = vpack.c.bf16 %v4273_v62, %v4273_v62  ;;  %v1563_v1 = vpack.c.bf16 %v4272_v63, %v4272_v63 }
 0x13c   : > { %1569 = vst.msk [vmem:[#allocation12 + $0x8] sm:$0xf] %vm1326_vm9, %v1564_v0 }
 0x13d   : > { %1568 = vst.msk [vmem:[#allocation12 + $0x4] sm:$0xf] %vm1326_vm9, %v1563_v1 }
 0x13f   : > { %v1546_v6 = vpop.permute.xlu0 %1545 }
 0x140   : > { %vm1551_vm7 = vcmp.eq.s32.totalorder %v1546_v6, %v5023_v54 }
 0x141   : > { %v4275_v8 = vsel %vm1551_vm7, 1.0, %v4735_v38 }
 0x142   : > { %v1566_v9 = vpack.c.bf16 %v4275_v8, %v4275_v8 }
 0x144   : > { %1571 = vst.msk [vmem:[#allocation12 + $0x10] sm:$0x7] %vm1525_vm3, %v1566_v9 }
 0x145 PF: > { %v1645_v54 = vld [vmem:[%s4943_s0 + $0x30] sm:$0xff]  ;;  %v1646_v10 = vld [vmem:[%s4943_s0 + $0x38] sm:$0xff]  ;;  %v1643_v38 = vld [vmem:[%s4943_s0 + $0x20] sm:$0xff]  ;;  %vm1688_vm9 = vcmask 261120   ;;  %vm1661_vm8 = vcmask 523264   ;;  %vm1794_vm10 = vcmask 130048  }
 0x146   : > { %v1657_v11 = vpack.c.bf16 %v1646_v10, %v1645_v54  ;;  %v1644_v12 = vld [vmem:[%s4943_s0 + $0x28] sm:$0xff]  ;;  %v1641_v14 = vld [vmem:[%s4943_s0 + $0x10] sm:$0xff]  ;;  %v1642_v15 = vld [vmem:[%s4943_s0 + $0x18] sm:$0xff]  ;;  %s4737_s25 = smov 32   ;;  %s6420_s15 = sld [smem:[#allocation28_spill]] }
 0x147   : > { %v1656_v13 = vpack.c.bf16 %v1644_v12, %v1643_v38  ;;  %v1650_v16 = vld [vmem:[%s4947_s22 + $0x10] sm:$0xff]  ;;  %v1651_v17 = vld [vmem:[%s4947_s22 + $0x18] sm:$0xff]  ;;  %v1648_v18 = vld [vmem:[%s4947_s22] sm:$0xff]  ;;  %v1655_v24 = vpack.c.bf16 %v1642_v15, %v1641_v14  ;;  %p4433_p2 = scmp.ne.s32.totalorder %s4905_s18, 1 }
 0x148   : > { %1669 = vmatpush.bf16.msra.mxu0 %v1657_v11  ;;  %v1589_v19 = vld [vmem:[#allocation2] sm:$0xff]  ;;  %v1590_v20 = vld [vmem:[#allocation2 + $0x8] sm:$0xff]  ;;  %v1687_v21 = vpack.c.bf16 %v1651_v17, %v1650_v16  ;;  %v1591_v23 = vld [vmem:[#allocation3] sm:$0xff]  ;;  %s4739_s18 = smov (!%p4433_p2), 96  }
 0x149   : > { %v1649_v22 = vld [vmem:[%s4947_s22 + $0x8] sm:$0xff]  ;;  %v1592_v25 = vld [vmem:[#allocation3 + $0x8] sm:$0xff]  ;;  %v1595_v27 = vld [vmem:[#allocation4] sm:$0xff]  ;;  %v1593_v31 = vadd.f32 %v1591_v23, %v1589_v19  ;;  %s4736_s22 = smov 96  }
 0x14a   : > { %1716 = vmatpush.bf16.msra.mxu1 %v1687_v21  ;;  %v1686_v26 = vpack.c.bf16 %v1649_v22, %v1648_v18  ;;  %v1596_v28 = vld [vmem:[#allocation4 + $0x8] sm:$0xff]  ;;  %v1639_v29 = vld [vmem:[%s4943_s0] sm:$0xff]  ;;  %v1594_v32 = vadd.f32 %v1592_v25, %v1590_v20  ;;  %v1597_v36 = vld [vmem:[#allocation4 + $0x10] sm:$0xff] }
 0x14b   : > { %v1640_v30 = vld [vmem:[%s4943_s0 + $0x8] sm:$0xff]  ;;  %v1679_v33 = vpack.c.bf16 %v1596_v28, %v1595_v27  ;;  %v1598_v37 = vld [vmem:[#allocation4 + $0x18] sm:$0xff]  ;;  %v1599_v40 = vld [vmem:[#allocation4 + $0x20] sm:$0xff]  ;;  %s6354_s0 = scalar_lea.vmem %s4813_s6, %s4937_s7 }
 0x14c   : > { %1670 = vmatpush.bf16.msra.mxu0 %v1656_v13  ;;  %v1654_v34 = vpack.c.bf16 %v1640_v30, %v1639_v29  ;;  %v1653_v35 = vpack.c.bf16 %v1594_v32, %v1593_v31  ;;  %v1680_v39 = vpack.c.bf16 %v1598_v37, %v1597_v36  ;;  %v1600_v41 = vld [vmem:[#allocation4 + $0x28] sm:$0xff]  ;;  %v4557_v44 = vld [vmem:[%s6354_s0] ss:$0 sm:$0xff]  ;;  %v1601_v45 = vld [vmem:[#allocation4 + $0x30] sm:$0xff] }
 0x14d   : > { %v1681_v42 = vpack.c.bf16 %v1600_v41, %v1599_v40  ;;  %v1602_v46 = vld [vmem:[#allocation4 + $0x38] sm:$0xff]  ;;  %v1603_v52 = vld [vmem:[#allocation4 + $0x40] sm:$0xff]  ;;  %v1604_v53 = vld [vmem:[#allocation4 + $0x48] sm:$0xff] }
 0x14e   : > { %1717 = vmatpush.bf16.msra.mxu1 %v1686_v26  ;;  %v1682_v48 = vpack.c.bf16 %v1602_v46, %v1601_v45  ;;  %v1683_v55 = vpack.c.bf16 %v1604_v53, %v1603_v52  ;;  %v5218_v56 = vld [vmem:[#allocation9] sm:$0xff]  ;;  %v1605_v57 = vld [vmem:[#allocation4 + $0x50] sm:$0xff]  ;;  %v1606_v58 = vld [vmem:[#allocation4 + $0x58] sm:$0xff] }
 0x14f   : > { %6357 = vst [vmem:[#allocation38_spill] sm:$0xff] %v5218_v56  ;;  %v1684_v59 = vpack.c.bf16 %v1606_v58, %v1605_v57  ;;  %v1607_v60 = vld [vmem:[#allocation4 + $0x60] sm:$0xff]  ;;  %v1608_v61 = vld [vmem:[#allocation4 + $0x68] sm:$0xff]  ;;  %v5236_v4 = vld [vmem:[#allocation9 + $0x10] sm:$0xff] }
 0x150   : > { %1671 = vmatpush.bf16.msra.mxu0 %v1655_v24  ;;  %v1685_v62 = vpack.c.bf16 %v1608_v61, %v1607_v60  ;;  %v5228_v1 = vld [vmem:[#allocation9 + $0x8] sm:$0xff]  ;;  %6359 = vst [vmem:[#allocation40_spill] sm:$0xff] %v5236_v4  ;;  %v5245_v9 = vld [vmem:[#allocation9 + $0x18] sm:$0xff]  ;;  %v4472_v10 = vld [vmem:[#allocation8 + $0x8] sm:$0xff] }
 0x151   : > { %4279 = vmatmul.msk.bf16.vlgmr.msra.gmra.mxu1 %vm1688_vm9, %v1679_v33  ;;  %6358 = vst [vmem:[#allocation39_spill] sm:$0xff] %v5228_v1  ;;  %v4471_v7 = vld [vmem:[#allocation8] sm:$0xff]  ;;  %v5256_v11 = vld [vmem:[#allocation9 + $0x20] sm:$0xff]  ;;  %v4473_v13 = vld [vmem:[#allocation8 + $0x10] sm:$0xff] }
 0x152   : > { %6360 = vst [vmem:[#allocation41_spill] sm:$0xff] %v5245_v9  ;;  %v5269_v15 = vld [vmem:[#allocation9 + $0x28] sm:$0xff]  ;;  %v4474_v17 = vld [vmem:[#allocation8 + $0x18] sm:$0xff]  ;;  %v5291_v22 = vld [vmem:[#allocation9 + $0x30] sm:$0xff] }
 0x153   : > { %6361 = vst [vmem:[#allocation42_spill] sm:$0xff] %v5256_v11  ;;  %v4475_v20 = vld [vmem:[#allocation8 + $0x20] sm:$0xff]  ;;  %v4476_v23 = vld [vmem:[#allocation8 + $0x28] sm:$0xff]  ;;  %v4477_v24 = vld [vmem:[#allocation8 + $0x30] sm:$0xff] }
 0x154   : > { %1672 = vmatpush.bf16.msra.mxu0 %v1654_v34  ;;  %6362 = vst [vmem:[#allocation43_spill] sm:$0xff] %v5269_v15 }
 0x155   : > { %6363 = vst [vmem:[#allocation44_spill] sm:$0xff] %v5291_v22 }
 0x157   : > { %4278 = vmatmul.msk.bf16.vlgmr.msra.gmra.mxu0 %vm1661_vm8, %v1653_v35 }
 0x161   : > { %4280 = vmatmul.msk.bf16.gmra.mxu1 %vm1688_vm9, %v1680_v39 }
 0x171   : > { %4281 = vmatmul.msk.bf16.gmra.mxu1 %vm1688_vm9, %v1681_v42 }
 0x181   : > { %4282 = vmatmul.msk.bf16.gmra.mxu1 %vm1688_vm9, %v1682_v48 }
 0x191   : > { %4283 = vmatmul.msk.bf16.gmra.mxu1 %vm1688_vm9, %v1683_v55 }
 0x1a1   : > { %4284 = vmatmul.msk.bf16.gmra.mxu1 %vm1688_vm9, %v1684_v59 }
 0x1b1   : > { %4285 = vmatmul.msk.bf16.gmra.mxu1 %vm1688_vm9, %v1685_v62 }
 0x1ce   : > { %v5224_v63 = vpop.f32.mrf.mxu1 }
 0x1d4   : > { %v1674_v43 = vpop.f32.mrf.mxu0 }
 0x1d5   : > { %v5209_v49 = vadd.f32 %v4557_v44, %v1674_v43 }
 0x1d6   : > { %v5226_v0 = vpop.f32.mrf.mxu1 }
 0x1d7   : > { %6355 = vst [vmem:[#allocation36_spill] sm:$0xff] %v5209_v49 }
 0x1dc   : > { %v1676_v47 = vpop.f32.mrf.mxu0 }
 0x1dd   : > { %v5211_v50 = vadd.f32 %v4557_v44, %v1676_v47 }
 0x1de   : > { %v5232_v2 = vpop.f32.mrf.mxu1 }
 0x1df   : > { %6356 = vst [vmem:[#allocation37_spill] sm:$0xff] %v5211_v50  ;;  %v1754_v51 = vpack.c.bf16 %v5211_v50, %v5209_v49 }
 0x1e1   : > { %1791 = vrot.lane.b32.xlu0 %v1754_v51, %s4736_s22  ;;  %2007 = vmatpush.bf16.msra.mxu3 %v1754_v51 }
 0x1e4   : > { %4349 = vmatmul.msk.bf16.vlgmr.msra.gmra.mxu3 %vm1794_vm10, %v5218_v56 }
 0x1e6   : > { %v5234_v3 = vpop.f32.mrf.mxu1 }
 0x1ee   : > { %v5240_v5 = vpop.f32.mrf.mxu1 }
 0x1f4   : > { %4350 = vmatmul.msk.bf16.gmra.mxu3 %vm1794_vm10, %v5228_v1 }
 0x1f6   : > { %v5242_v8 = vpop.f32.mrf.mxu1 }
 0x1fe   : > { %v5249_v54 = vpop.f32.mrf.mxu1 }
 0x1ff   : > { %1900 = vrot.lane.b32.xlu0 %v5249_v54, %s4737_s25 }
 0x204   : > { %4351 = vmatmul.msk.bf16.gmra.mxu3 %vm1794_vm10, %v5236_v4 }
 0x206   : > { %v5253_v38 = vpop.f32.mrf.mxu1 }
 0x20e   : > { %v5260_v12 = vpop.f32.mrf.mxu1 }
 0x20f   : > { %1904 = vrot.lane.b32.xlu1 %v5260_v12, %s4737_s25 }
 0x214   : > { %4352 = vmatmul.msk.bf16.gmra.mxu3 %vm1794_vm10, %v5245_v9 }
 0x216   : > { %v5264_v14 = vpop.f32.mrf.mxu1 }
 0x217   : > { %1906 = vrot.lane.b32.xlu1 %v5264_v14, %s4737_s25 }
 0x21e   : > { %v5273_v16 = vpop.f32.mrf.mxu1 }
 0x21f   : > { %1908 = vrot.lane.b32.xlu0 %v5273_v16, %s4737_s25 }
 0x224   : > { %4353 = vmatmul.msk.bf16.gmra.mxu3 %vm1794_vm10, %v5256_v11 }
 0x226   : > { %v5277_v18 = vpop.f32.mrf.mxu1 }
 0x227   : > { %1910 = vrot.lane.b32.xlu1 %v5277_v18, %s4737_s25 }
 0x22e   : > { %v5282_v19 = vpop.f32.mrf.mxu1 }
 0x22f   : > { %1912 = vrot.lane.b32.xlu2 %v5282_v19, %s4737_s25 }
 0x234   : > { %4354 = vmatmul.msk.bf16.gmra.mxu3 %vm1794_vm10, %v5269_v15 }
 0x236   : > { %v5286_v21 = vpop.f32.mrf.mxu1 }
 0x237   : > { %1914 = vrot.lane.b32.xlu0 %v5286_v21, %s4737_s25 }
 0x244   : > { %4355 = vmatmul.msk.bf16.gmra.mxu3 %vm1794_vm10, %v5291_v22 }
 0x253   : > { %v1792_v6 = vpop.permute.xlu0 %1791 }
 0x254   : > { %1823 = vmatpush.bf16.msra.mxu2 %v1792_v6 }
 0x257   : > { %4314 = vmatmul.msk.bf16.vlgmr.msra.gmra.mxu2 %vm1794_vm10, %v4471_v7 }
 0x267   : > { %4315 = vmatmul.msk.bf16.gmra.mxu2 %vm1794_vm10, %v4472_v10  ;;  %v2009_v25 = vpop.f32.mrf.mxu3 }
 0x26f   : > { %v2011_v26 = vpop.f32.mrf.mxu3 }
 0x277   : > { %4316 = vmatmul.msk.bf16.gmra.mxu2 %vm1794_vm10, %v4473_v13  ;;  %v2014_v27 = vpop.f32.mrf.mxu3 }
 0x27f   : > { %v2016_v32 = vpop.f32.mrf.mxu3 }
 0x287   : > { %4317 = vmatmul.msk.bf16.gmra.mxu2 %vm1794_vm10, %v4474_v17  ;;  %v2019_v40 = vpop.f32.mrf.mxu3 }
 0x28f   : > { %v2021_v46 = vpop.f32.mrf.mxu3 }
 0x297   : > { %4318 = vmatmul.msk.bf16.gmra.mxu2 %vm1794_vm10, %v4475_v20  ;;  %v2024_v55 = vpop.f32.mrf.mxu3 }
 0x29f   : > { %v2026_v61 = vpop.f32.mrf.mxu3 }
 0x2a7   : > { %4319 = vmatmul.msk.bf16.gmra.mxu2 %vm1794_vm10, %v4476_v23  ;;  %v2029_v17 = vpop.f32.mrf.mxu3  ;;  %v5338_v23 = vpop.permute.xlu1 %1904 }
 0x2b7   : > { %4320 = vmatmul.msk.bf16.gmra.mxu2 %vm1794_vm10, %v4477_v24 }
 0x2da   : > { %v5297_v28 = vpop.f32.mrf.mxu2 }
 0x2db   : > { %6364 = vst [vmem:[#allocation45_spill] sm:$0xff] %v5297_v28  ;;  %v1860_v29 = vadd.f32 %v5297_v28, %v5224_v63 }
 0x2dd   : > { %v2044_v30 = vmul.f32 %v2009_v25, %v1860_v29 }
 0x2df   : > { %v2058_v31 = vsel %vm1688_vm9, %v2044_v30, 0.0  ;;  %v5346_v30 = vpop.permute.xlu0 %1900 }
 0x2e0   : > { %2059 = vadd.xlane.f32.xlu0 %v2058_v31  ;;  %6370 = vst [vmem:[#allocation51_spill] sm:$0xff] %v5346_v30  ;;  %v1907_v31 = vpop.permute.xlu1 %1906 }
 0x2e2   : > { %v5302_v33 = vpop.f32.mrf.mxu2 }
 0x2e3   : > { %6365 = vst [vmem:[#allocation46_spill] sm:$0xff] %v5302_v33  ;;  %v1861_v34 = vadd.f32 %v5302_v33, %v5226_v0 }
 0x2e5   : > { %v2045_v35 = vmul.f32 %v2011_v26, %v1861_v34  ;;  %v2031_v26 = vpop.f32.mrf.mxu3 }
 0x2e7   : > { %v2061_v36 = vsel %vm1688_vm9, %v2045_v35, 0.0 }
 0x2e8   : > { %2062 = vadd.xlane.f32.xlu1 %v2061_v36 }
 0x2ea   : > { %v5307_v37 = vpop.f32.mrf.mxu2 }
 0x2eb   : > { %6366 = vst [vmem:[#allocation47_spill] sm:$0xff] %v5307_v37  ;;  %v1862_v39 = vadd.f32 %v5307_v37, %v5232_v2 }
 0x2ed   : > { %v2046_v41 = vmul.f32 %v2014_v27, %v1862_v39  ;;  %v2034_v39 = vpop.f32.mrf.mxu3 }
 0x2ef   : > { %v2064_v42 = vsel %vm1688_vm9, %v2046_v41, 0.0  ;;  %v1909_v41 = vpop.permute.xlu0 %1908 }
 0x2f0   : > { %2065 = vadd.xlane.f32.xlu2 %v2064_v42 }
 0x2f2   : > { %v5312_v43 = vpop.f32.mrf.mxu2 }
 0x2f3   : > { %6367 = vst [vmem:[#allocation48_spill] sm:$0xff] %v5312_v43  ;;  %v1863_v44 = vadd.f32 %v5312_v43, %v5234_v3 }
 0x2f4   : > { %1892 = vrot.lane.b32.xlu0 %v5232_v2, %s4737_s25 }
 0x2f5   : > { %v2047_v45 = vmul.f32 %v2016_v32, %v1863_v44 }
 0x2f7   : > { %v2067_v47 = vsel %vm1688_vm9, %v2047_v45, 0.0 }
 0x2f8   : > { %2068 = vadd.xlane.f32.xlu1 %v2067_v47  ;;  %v1911_v47 = vpop.permute.xlu1 %1910 }
 0x2fa   : > { %v5319_v48 = vpop.f32.mrf.mxu2 }
 0x2fb   : > { %v1864_v51 = vadd.f32 %v5319_v48, %v5240_v5 }
 0x2fd   : > { %v2048_v52 = vmul.f32 %v2019_v40, %v1864_v51  ;;  %v2036_v51 = vpop.f32.mrf.mxu3 }
 0x2ff   : > { %v2070_v53 = vsel %vm1688_vm9, %v2048_v52, 0.0 }
 0x300   : > { %2071 = vadd.xlane.f32.xlu1 %v2070_v53 }
 0x302   : > { %v5324_v57 = vpop.f32.mrf.mxu2 }
 0x303   : > { %v1865_v58 = vadd.f32 %v5324_v57, %v5242_v8 }
 0x305   : > { %v2049_v59 = vmul.f32 %v2021_v46, %v1865_v58 }
 0x307   : > { %v2073_v60 = vsel %vm1688_vm9, %v2049_v59, 0.0  ;;  %v2039_v59 = vpop.f32.mrf.mxu3 }
 0x308   : > { %2074 = vadd.xlane.f32.xlu2 %v2073_v60 }
 0x30a   : > { %v5329_v62 = vpop.f32.mrf.mxu2 }
 0x30b   : > { %6368 = vst [vmem:[#allocation49_spill] sm:$0xff] %v5329_v62  ;;  %v1866_v2 = vadd.f32 %v5329_v62, %v5249_v54 }
 0x30d   : > { %v2050_v6 = vmul.f32 %v2024_v55, %v1866_v2 }
 0x30f   : > { %v2076_v7 = vsel %vm1688_vm9, %v2050_v6, 0.0 }
 0x310   : > { %2077 = vadd.xlane.f32.xlu2 %v2076_v7 }
 0x312   : > { %v5334_v10 = vpop.f32.mrf.mxu2 }
 0x313   : > { %6369 = vst [vmem:[#allocation50_spill] sm:$0xff] %v5334_v10  ;;  %v1867_v13 = vadd.f32 %v5334_v10, %v5253_v38 }
 0x315   : > { %v2051_v20 = vmul.f32 %v2026_v61, %v1867_v13 }
 0x317   : > { %v2079_v24 = vsel %vm1688_vm9, %v2051_v20, 0.0 }
 0x318   : > { %2080 = vadd.xlane.f32.xlu1 %v2079_v24 }
 0x31a   : > { %v5341_v25 = vpop.f32.mrf.mxu2 }
 0x31b   : > { %v1868_v54 = vadd.f32 %v5341_v25, %v5260_v12 }
 0x31d   : > { %v2052_v27 = vmul.f32 %v2029_v17, %v1868_v54  ;;  %v2041_v17 = vpop.f32.mrf.mxu3 }
 0x31f   : > { %v2082_v29 = vsel %vm1688_vm9, %v2052_v27, 0.0 }
 0x320   : > { %2083 = vadd.xlane.f32.xlu2 %v2082_v29  ;;  %v5375_v29 = vpop.permute.xlu0 %1914 }
 0x322   : > { %v1847_v32 = vpop.f32.mrf.mxu2 }
 0x323   : > { %v1869_v34 = vadd.f32 %v1847_v32, %v5264_v14  ;;  %v5349_v35 = vadd.f32 %v1907_v31, %v1847_v32  ;;  %v5377_v32 = vld [vmem:[#allocation9] sm:$0xff]  }
 0x325   : > { %v2053_v36 = vmul.f32 %v2031_v26, %v1869_v34 }
 0x327   : > { %v2085_v40 = vsel %vm1688_vm9, %v2053_v36, 0.0  ;;  %v6296_v36 = vunpack.c.l.bf16 %v5377_v32 }
 0x328   : > { %2086 = vadd.xlane.f32.xlu1 %v2085_v40  ;;  %v6295_v40 = vunpack.c.h.bf16 %v5377_v32 }
 0x329   : > { %vm5389_vm11 = vcmp.ne.f32.partialorder %v6296_v36, 0.0 }
 0x32a   : > { %v1850_v12 = vpop.f32.mrf.mxu2  ;;  %vm5398_vm12 = vcmp.ne.f32.partialorder %v6295_v40, 0.0 }
 0x32b   : > { %v1870_v42 = vadd.f32 %v1850_v12, %v5273_v16  ;;  %v5353_v44 = vadd.f32 %v1909_v41, %v1850_v12  ;;  %v1913_v16 = vpop.permute.xlu2 %1912  ;;  %v5381_v41 = vld [vmem:[#allocation9 + $0x8] sm:$0xff]   ;;  %v5385_v12 = vld [vmem:[#allocation9 + $0x10] sm:$0xff]  }
 0x32d   : > { %v2054_v45 = vmul.f32 %v2034_v39, %v1870_v42 }
 0x32f   : > { %v2088_v46 = vsel %vm1688_vm9, %v2054_v45, 0.0 }
 0x330   : > { %2089 = vadd.xlane.f32.xlu2 %v2088_v46  ;;  %v6294_v46 = vunpack.c.l.bf16 %v5381_v41 }
 0x332   : > { %v1852_v14 = vpop.f32.mrf.mxu2  ;;  %vm5419_vm13 = vcmp.ne.f32.partialorder %v6294_v46, 0.0  ;;  %v5453_v46 = vld [vmem:[#allocation9 + $0x30] sm:$0xff]  }
 0x333   : > { %v1871_v52 = vadd.f32 %v1852_v14, %v5277_v18  ;;  %v5357_v53 = vadd.f32 %v1911_v47, %v1852_v14  ;;  %v6298_v14 = vunpack.c.l.bf16 %v5385_v12  ;;  %v2127_v1 = vunpack.c.h.bf16 %v5453_v46 }
 0x335   : > { %v2055_v55 = vmul.f32 %v2036_v51, %v1871_v52  ;;  %v6297_v51 = vunpack.c.h.bf16 %v5381_v41  ;;  %v5404_v52 = vld [vmem:[#allocation9 + $0x18] sm:$0xff]   ;;  %vm5436_vm15 = vcmp.ne.f32.partialorder %v6298_v14, 0.0 }
 0x337   : > { %v2091_v58 = vsel %vm1688_vm9, %v2055_v55, 0.0  ;;  %vm5430_vm14 = vcmp.ne.f32.partialorder %v6297_v51, 0.0  ;;  %v2126_v51 = vunpack.c.l.bf16 %v5453_v46 }
 0x338   : > { %2092 = vadd.xlane.f32.xlu1 %v2091_v58 }
 0x339   : > { %vm5528_vm7 = vcmp.ne.f32.partialorder %v2126_v51, 0.0 }
 0x33a   : > { %v1855_v60 = vpop.f32.mrf.mxu2 }
 0x33b   : > { %v1872_v61 = vadd.f32 %v1855_v60, %v5282_v19  ;;  %v5361_v2 = vadd.f32 %v1913_v16, %v1855_v60  ;;  %v6299_v16 = vunpack.c.h.bf16 %v5385_v12 }
 0x33d   : > { %v2056_v6 = vmul.f32 %v2039_v59, %v1872_v61  ;;  %v5412_v61 = vld [vmem:[#allocation9 + $0x20] sm:$0xff]   ;;  %vm5447_vm0 = vcmp.ne.f32.partialorder %v6299_v16, 0.0 }
 0x33e   : > { %v6390_v11 = vunpack.c.h.bf16 %v5412_v61 }
 0x33f   : > { %v2094_v7 = vsel %vm1688_vm9, %v2056_v6, 0.0 }
 0x340   : > { %2095 = vadd.xlane.f32.xlu2 %v2094_v7  ;;  %vm5504_vm4 = vcmp.ne.f32.partialorder %v6390_v11, 0.0 }
 0x342   : > { %v5368_v18 = vpop.f32.mrf.mxu2 }
 0x343   : > { %v1873_v13 = vadd.f32 %v5368_v18, %v5286_v21 }
 0x345   : > { %v2057_v20 = vmul.f32 %v2041_v17, %v1873_v13  ;;  %v6300_v17 = vunpack.c.l.bf16 %v5404_v52 }
 0x347   : > { %v2097_v19 = vsel %vm1688_vm9, %v2057_v20, 0.0  ;;  %v6302_v20 = vunpack.c.h.bf16 %v5404_v52  ;;  %vm5466_vm1 = vcmp.ne.f32.partialorder %v6300_v17, 0.0 }
 0x349   : > { %vm5472_vm2 = vcmp.ne.f32.partialorder %v6302_v20, 0.0 }
 0x351   : > { %1896 = vrot.lane.b32.xlu1 %v5240_v5, %s4737_s25 }
 0x353   : > { %v2060_v39 = vpop.xlane.xlu0 %2059 }
 0x358   : > { %1902 = vrot.lane.b32.xlu2 %v5253_v38, %s4737_s25 }
 0x35b   : > { %v2063_v24 = vpop.xlane.xlu1 %2062 }
 0x35c   : > { %v5393_v45 = vmul.f32 0.17677669, %v2063_v24 }
 0x35e   : > { %v2143_v6 = vsel %vm5398_vm12, %v5393_v45, -1e+30  ;;  %vm2341_vm12 = vcmask 916480  }
 0x363   : > { %v2066_v54 = vpop.xlane.xlu2 %2065 }
 0x364   : > { %v5409_v60 = vmul.f32 0.17677669, %v2066_v54 }
 0x366   : > { %6375 = vst [vmem:[#allocation52_spill] sm:$0xff] %v5409_v60  ;;  %v2144_v42 = vsel %vm5419_vm13, %v5409_v60, -1e+30  ;;  %vm2616_vm13 = vcmask 1041408  }
 0x36b   : > { %v2069_v26 = vpop.xlane.xlu1 %2068 }
 0x36c   : > { %v5423_v13 = vmul.f32 0.17677669, %v2069_v26  ;;  %v6304_v26 = vunpack.c.l.bf16 %v5412_v61 }
 0x36e   : > { %v2145_v7 = vsel %vm5430_vm14, %v5423_v13, -1e+30  ;;  %vm5482_vm3 = vcmp.ne.f32.partialorder %v6304_v26, 0.0  ;;  %vm2609_vm14 = vcmask 15360  }
 0x36f   : > { %v2159_v50 = vsel %vm1794_vm10, %v2145_v7, -inf }
 0x373   : > { %v2072_v27 = vpop.xlane.xlu1 %2071 }
 0x374   : > { %v5455_v40 = vmul.f32 0.17677669, %v2072_v27  ;;  %v2158_v27 = vsel %vm1794_vm10, %v2144_v42, -inf }
 0x37b   : > { %2098 = vadd.xlane.f32.xlu1 %v2097_v19  ;;  %v2075_v5 = vpop.xlane.xlu2 %2074 }
 0x37c   : > { %v5457_v36 = vmul.f32 0.17677669, %v2075_v5 }
 0x37e   : > { %v2147_v26 = vsel %vm5447_vm0, %v5457_v36, -1e+30 }
 0x37f   : > { %v2162_v56 = vsel %vm1794_vm10, %v2147_v26, -inf }
 0x383   : > { %v2078_v38 = vpop.xlane.xlu2 %2077 }
 0x384   : > { %v5478_v16 = vmul.f32 0.17677669, %v2078_v38  ;;  %v2146_v38 = vsel %vm5436_vm15, %v5455_v40, -1e+30 }
 0x385   : > { %v2160_v49 = vsel %vm1794_vm10, %v2146_v38, -inf }
 0x386   : > { %v2148_v11 = vsel %vm5466_vm1, %v5478_v16, -1e+30 }
 0x387   : > { %v2164_v24 = vsel %vm1794_vm10, %v2148_v11, -inf }
 0x388   : > { %v2165_v37 = vmax.f32 %v2158_v27, %v2164_v24 }
 0x38b   : > { %v2081_v31 = vpop.xlane.xlu1 %2080 }
 0x38c   : > { %v5476_v5 = vmul.f32 0.17677669, %v2081_v31 }
 0x393   : > { %v2084_v21 = vpop.xlane.xlu2 %2083 }
 0x394   : > { %1898 = vrot.lane.b32.xlu1 %v5242_v8, %s4737_s25  ;;  %v5383_v8 = vmul.f32 0.17677669, %v2060_v39  ;;  %v2157_v39 = vsel %vm1794_vm10, %v2143_v6, -inf  ;;  %v5490_v20 = vmul.f32 0.17677669, %v2084_v21 }
 0x395   : > { %v2163_v7 = vmax.f32 %v2157_v39, %v2162_v56 }
 0x396   : > { %v2142_v59 = vsel %vm5389_vm11, %v5383_v8, -1e+30  ;;  %vm2141_vm11 = vcmp.ne.f32.partialorder %v2127_v1, 0.0 }
 0x397   : > { %v2156_v19 = vsel %vm1794_vm10, %v2142_v59, -inf  ;;  %v5451_v59 = vld [vmem:[#allocation9 + $0x28] sm:$0xff]  }
 0x398   : > { %v2124_v17 = vunpack.c.l.bf16 %v5451_v59  ;;  %v6393_v21 = vunpack.c.h.bf16 %v5451_v59  ;;  %v2161_v33 = vmax.f32 %v2156_v19, %v2160_v49 }
 0x39a   : > { %vm5510_vm5 = vcmp.ne.f32.partialorder %v6393_v21, 0.0  ;;  %vm5524_vm6 = vcmp.ne.f32.partialorder %v2124_v17, 0.0 }
 0x39b   : > { %v2087_v34 = vpop.xlane.xlu1 %2086 }
 0x39c   : > { %v5492_v15 = vmul.f32 0.17677669, %v2087_v34 }
 0x3a3   : > { %v2090_v55 = vpop.xlane.xlu2 %2089 }
 0x3a4   : > { %v5517_v54 = vmul.f32 0.17677669, %v2090_v55  ;;  %v2150_v55 = vsel %vm5482_vm3, %v5490_v20, -1e+30 }
 0x3a5   : > { %v2168_v42 = vsel %vm1794_vm10, %v2150_v55, -inf }
 0x3a6   : > { %v2152_v9 = vsel %vm5524_vm6, %v5517_v54, -1e+30  ;;  %v2169_v21 = vmax.f32 %v2161_v33, %v2168_v42 }
 0x3a7   : > { %v2172_v4 = vsel %vm1794_vm10, %v2152_v9, -inf }
 0x3ab   : > { %v2093_v58 = vpop.xlane.xlu1 %2092 }
 0x3ac   : > { %v5494_v31 = vmul.f32 0.17677669, %v2093_v58  ;;  %v2149_v58 = vsel %vm5472_vm2, %v5476_v5, -1e+30 }
 0x3ad   : > { %v2166_v46 = vsel %vm1794_vm10, %v2149_v58, -inf }
 0x3ae   : > { %v2153_v14 = vsel %vm5510_vm5, %v5494_v31, -1e+30  ;;  %v2167_v28 = vmax.f32 %v2159_v50, %v2166_v46  ;;  %vm2936_vm5 = vcmask 259072  }
 0x3af   : > { %v2174_v26 = vsel %vm1794_vm10, %v2153_v14, -inf  ;;  %v2173_v14 = vmax.f32 %v2165_v37, %v2172_v4 }
 0x3b0   : > { %v2175_v30 = vmax.f32 %v2167_v28, %v2174_v26 }
 0x3b2   : > { %v2181_v49 = vmax.f32 %v2173_v14, %v2175_v30 }
 0x3b3   : > { %v2096_v6 = vpop.xlane.xlu2 %2095 }
 0x3b4   : > { %v5519_v47 = vmul.f32 0.17677669, %v2096_v6  ;;  %v2151_v6 = vsel %vm5504_vm4, %v5492_v15, -1e+30 }
 0x3b5   : > { %v2170_v38 = vsel %vm1794_vm10, %v2151_v6, -inf }
 0x3b6   : > { %v2154_v34 = vsel %vm5528_vm7, %v5519_v47, -1e+30  ;;  %v2171_v10 = vmax.f32 %v2163_v7, %v2170_v38 }
 0x3b7   : > { %v2176_v43 = vsel %vm1794_vm10, %v2154_v34, -inf }
 0x3b8   : > { %v2177_v62 = vmax.f32 %v2169_v21, %v2176_v43  ;;  %v6400_v43 = vunpack.c.h.bf16 %v5451_v59  ;;  %v6404_v59 = vunpack.c.l.bf16 %v5385_v12  ;;  %v6405_v21 = vunpack.c.l.bf16 %v5404_v52 }
 0x3c3   : > { %v5488_v22 = vpop.permute.xlu1 %1896 }
 0x3ee   : > { %v2099_v58 = vpop.xlane.xlu1 %2098 }
 0x3ef   : > { %v5557_v11 = vmul.f32 0.17677669, %v2099_v58  ;;  %v6403_v58 = vunpack.c.h.bf16 %v5385_v12  ;;  %v6408_v12 = vunpack.c.h.bf16 %v5404_v52 }
 0x3f1   : > { %v2155_v55 = vsel %vm2141_vm11, %v5557_v11, -1e+30  ;;  %vm2964_vm11 = vcmask 128000  }
 0x3f2   : > { %v2178_v6 = vsel %vm1794_vm10, %v2155_v55, -inf }
 0x3f3   : > { %v2179_v60 = vmax.f32 %v2171_v10, %v2178_v6  ;;  %v6401_v10 = vunpack.c.l.bf16 %v5412_v61 }
 0x3f5   : > { %v2180_v56 = vmax.f32 %v2177_v62, %v2179_v60  ;;  %v6402_v60 = vunpack.c.h.bf16 %v5412_v61 }
 0x3f7   : > { %v2182_v50 = vmax.f32 %v2180_v56, %v2181_v49  ;;  %v6406_v49 = vunpack.c.h.bf16 %v5381_v41 }
 0x3f9   : > { %v2183_v19 = vrot.slane %v2182_v50, 4 }
 0x3fb   : > { %v2184_v39 = vmax.f32 %v2182_v50, %v2183_v19  ;;  %v6407_v50 = vunpack.c.l.bf16 %v5377_v32 }
 0x3fd   : > { %v2185_v27 = vrot.slane %v2184_v39, 2 }
 0x3ff   : > { %v2186_v46 = vmax.f32 %v2184_v39, %v2185_v27 }
 0x401   : > { %v2187_v24 = vrot.slane %v2186_v46, 1 }
 0x403   : > { %v2188_v9 = vmax.f32 %v2186_v46, %v2187_v24 }
 0x405   : > { %v2202_v34 = vmul.f32 %v2188_v9, %v2127_v1  ;;  %v2201_v33 = vmul.f32 %v2188_v9, %v2126_v51  ;;  %v2199_v42 = vmul.f32 %v2188_v9, %v2124_v17  ;;  %v2200_v62 = vmul.f32 %v2188_v9, %v6400_v43 }
 0x406   : > { %v2197_v30 = vmul.f32 %v2188_v9, %v6401_v10  ;;  %v2198_v1 = vmul.f32 %v2188_v9, %v6402_v60  ;;  %v2194_v7 = vmul.f32 %v2188_v9, %v6403_v58  ;;  %v2193_v4 = vmul.f32 %v2188_v9, %v6404_v59 }
 0x407   : > { %v2242_v28 = vsel %vm1794_vm10, %v2202_v34, 0.0  ;;  %v2239_v38 = vsel %vm1794_vm10, %v2201_v33, 0.0  ;;  %v2233_v37 = vsel %vm1794_vm10, %v2199_v42, 0.0  ;;  %v2236_v51 = vsel %vm1794_vm10, %v2200_v62, 0.0 }
 0x408   : > { %2243 = vadd.xlane.f32.xlu0 %v2242_v28  ;;  %2240 = vadd.xlane.f32.xlu2 %v2239_v38  ;;  %v2227_v17 = vsel %vm1794_vm10, %v2197_v30, 0.0  ;;  %v2230_v26 = vsel %vm1794_vm10, %v2198_v1, 0.0  ;;  %v2195_v55 = vmul.f32 %v2188_v9, %v6405_v21  ;;  %v2218_v61 = vsel %vm1794_vm10, %v2194_v7, 0.0 }
 0x409   : > { %2234 = vadd.xlane.f32.xlu1 %v2233_v37  ;;  %v2215_v6 = vsel %vm1794_vm10, %v2193_v4, 0.0  ;;  %v2192_v56 = vmul.f32 %v2188_v9, %v6406_v49  ;;  %v2189_v19 = vmul.f32 %v2188_v9, %v6407_v50  ;;  %v2196_v39 = vmul.f32 %v2188_v9, %v6408_v12  ;;  %v5607_v37 = vpop.permute.xlu2 %1902 }
 0x40a   : > { %v2221_v14 = vsel %vm1794_vm10, %v2195_v55, 0.0  ;;  %v6409_v34 = vunpack.c.h.bf16 %v5377_v32  ;;  %v6410_v42 = vunpack.c.l.bf16 %v5381_v41  ;;  %v5605_v32 = vpop.permute.xlu0 %1892  ;;  %v1899_v41 = vpop.permute.xlu1 %1898 }
 0x40b   : > { %v2212_v27 = vsel %vm1794_vm10, %v2192_v56, 0.0  ;;  %v2203_v46 = vsel %vm1794_vm10, %v2189_v19, 0.0  ;;  %v2224_v24 = vsel %vm1794_vm10, %v2196_v39, 0.0  ;;  %v1938_v56 = vadd.f32 %v5338_v23, %v5341_v25 }
 0x40c   : > { %v2190_v33 = vmul.f32 %v2188_v9, %v6409_v34  ;;  %v2191_v28 = vmul.f32 %v2188_v9, %v6410_v42 }
 0x40e   : > { %v2206_v38 = vsel %vm1794_vm10, %v2190_v33, 0.0  ;;  %v2209_v52 = vsel %vm1794_vm10, %v2191_v28, 0.0  ;;  %v1935_v28 = vadd.f32 %v1899_v41, %v5324_v57 }
 0x410   : > { %2237 = vadd.xlane.f32.xlu2 %v2236_v51  ;;  %2228 = vadd.xlane.f32.xlu0 %v2227_v17 }
 0x411   : > { %2231 = vadd.xlane.f32.xlu1 %v2230_v26 }
 0x418   : > { %2219 = vadd.xlane.f32.xlu0 %v2218_v61  ;;  %2216 = vadd.xlane.f32.xlu2 %v2215_v6 }
 0x419   : > { %2222 = vadd.xlane.f32.xlu1 %v2221_v14 }
 0x420   : > { %2213 = vadd.xlane.f32.xlu2 %v2212_v27  ;;  %2204 = vadd.xlane.f32.xlu0 %v2203_v46 }
 0x421   : > { %2225 = vadd.xlane.f32.xlu1 %v2224_v24 }
 0x428   : > { %2207 = vadd.xlane.f32.xlu2 %v2206_v38 }
 0x429   : > { %2210 = vadd.xlane.f32.xlu1 %v2209_v52  ;;  %v1934_v52 = vadd.f32 %v5488_v22, %v5319_v48 }
 0x440   : > { %1894 = vrot.lane.b32.xlu2 %v5234_v3, %s4737_s25 }
 0x442   : > { %1888 = vrot.lane.b32.xlu1 %v5224_v63, %s4737_s25 }
 0x44a   : > { %1890 = vrot.lane.b32.xlu1 %v5226_v0, %s4737_s25 }
 0x47b   : > { %v2244_v9 = vpop.xlane.xlu0 %2243  ;;  %v2241_v43 = vpop.xlane.xlu2 %2240 }
 0x47c   : > { %v2258_v62 = vsub.f32 %v5557_v11, %v2244_v9  ;;  %v2257_v10 = vsub.f32 %v5519_v47, %v2241_v43  ;;  %v2235_v30 = vpop.xlane.xlu1 %2234  ;;  %v1943_v11 = vadd.f32 %v5375_v29, %v5368_v18 }
 0x47d   : > { %v2255_v1 = vsub.f32 %v5517_v54, %v2235_v30 }
 0x47e   : > { %v2285_v60 = vmul.f32 1.442695, %v2258_v62  ;;  %v2283_v3 = vmul.f32 1.442695, %v2257_v10 }
 0x47f   : > { %v2279_v63 = vmul.f32 1.442695, %v2255_v1 }
 0x480   : > { %4559 = vpow2.f32 %v2285_v60 }
 0x481   : > { %4561 = vpow2.f32 %v2283_v3  ;;  %v6411_v3 = vld [vmem:[#allocation52_spill] sm:$0xff] }
 0x482   : > { %4563 = vpow2.f32 %v2279_v63 }
 0x483   : > { %v2238_v0 = vpop.xlane.xlu2 %2237  ;;  %v2229_v51 = vpop.xlane.xlu0 %2228 }
 0x484   : > { %v2256_v17 = vsub.f32 %v5494_v31, %v2238_v0  ;;  %v2253_v26 = vsub.f32 %v5490_v20, %v2229_v51  ;;  %v2232_v58 = vpop.xlane.xlu1 %2231  ;;  %v6412_v51 = vld [vmem:[#allocation49_spill] sm:$0xff] }
 0x485   : > { %v2254_v47 = vsub.f32 %v5492_v15, %v2232_v58  ;;  %v6414_v58 = vld [vmem:[#allocation50_spill] sm:$0xff] }
 0x486   : > { %v5617_v7 = vpop.eup %4559  ;;  %v2281_v59 = vmul.f32 1.442695, %v2256_v17  ;;  %v2275_v54 = vmul.f32 1.442695, %v2253_v26  ;;  %v6413_v17 = vld [vmem:[#allocation51_spill] sm:$0xff] }
 0x487   : > { %v5619_v4 = vpop.eup %4561  ;;  %v2277_v21 = vmul.f32 1.442695, %v2254_v47  ;;  %v5622_v55 = vmul.f32 %v5617_v7, %v1943_v11  ;;  %v1936_v26 = vadd.f32 %v6413_v17, %v6412_v51  ;;  %v1937_v11 = vadd.f32 %v5607_v37, %v6414_v58  ;;  %v6424_v51 = vld [vmem:[#allocation40_spill] sm:$0xff]  ;;  %v6425_v17 = vld [vmem:[#allocation41_spill] sm:$0xff]  ;;  %v6427_v58 = vld [vmem:[#allocation43_spill] sm:$0xff] }
 0x488   : > { %4565 = vpow2.f32 %v2281_v59  ;;  %v5626_v20 = vmul.f32 %v5619_v4, %v5361_v2  ;;  %v2365_v18 = vpack.c.bf16 %v5617_v7, %v5619_v4  ;;  %v5632_v61 = vpop.eup %4563 }
 0x489   : > { %4567 = vpow2.f32 %v2275_v54  ;;  %v5645_v39 = vmul.f32 %v5632_v61, %v5353_v44 }
 0x48a   : > { %4569 = vpow2.f32 %v2277_v21  ;;  %v2307_v15 = vpack.c.bf16 %v5622_v55, %v5626_v20 }
 0x48b   : > { %v2220_v29 = vpop.xlane.xlu0 %2219  ;;  %v2217_v31 = vpop.xlane.xlu2 %2216 }
 0x48c   : > { %v2250_v6 = vsub.f32 %v5457_v36, %v2220_v29  ;;  %v2249_v14 = vsub.f32 %v5455_v40, %v2217_v31  ;;  %2332 = vrot.lane.b32.xlu0 %v2307_v15, %s4736_s22  ;;  %v2223_v2 = vpop.xlane.xlu1 %2222 }
 0x48d   : > { %v2251_v23 = vsub.f32 %v5478_v16, %v2223_v2 }
 0x48e   : > { %v5637_v49 = vpop.eup %4565  ;;  %v2269_v50 = vmul.f32 1.442695, %v2250_v6  ;;  %v2267_v19 = vmul.f32 1.442695, %v2249_v14  ;;  %v6415_v6 = vld [vmem:[#allocation48_spill] sm:$0xff] }
 0x48f   : > { %v5641_v12 = vpop.eup %4567  ;;  %v5649_v36 = vmul.f32 %v5637_v49, %v5357_v53  ;;  %v2364_v40 = vpack.c.bf16 %v5637_v49, %v5632_v61  ;;  %v2271_v34 = vmul.f32 1.442695, %v2251_v23 }
 0x490   : > { %v5653_v27 = vpop.eup %4569  ;;  %4571 = vpow2.f32 %v2269_v50  ;;  %v5657_v25 = vmul.f32 %v5641_v12, %v1938_v56  ;;  %v6416_v56 = vld [vmem:[#allocation47_spill] sm:$0xff] }
 0x491   : > { %4573 = vpow2.f32 %v2267_v19  ;;  %v2306_v44 = vpack.c.bf16 %v5649_v36, %v5645_v39  ;;  %v5663_v46 = vmul.f32 %v5653_v27, %v5349_v35  ;;  %v2363_v53 = vpack.c.bf16 %v5653_v27, %v5641_v12 }
 0x492   : > { %4575 = vpow2.f32 %v2271_v34  ;;  %v1932_v50 = vadd.f32 %v5605_v32, %v6416_v56  ;;  %v5762_v56 = vld [vmem:[#allocation7] sm:$0x3] }
 0x493   : > { %v2214_v24 = vpop.xlane.xlu2 %2213  ;;  %2330 = vrot.lane.b32.xlu1 %v2306_v44, %s4736_s22  ;;  %v2305_v16 = vpack.c.bf16 %v5663_v46, %v5657_v25  ;;  %v2205_v33 = vpop.xlane.xlu0 %2204 }
 0x494   : > { %v2226_v42 = vpop.xlane.xlu1 %2225  ;;  %v2248_v9 = vsub.f32 %v5423_v13, %v2214_v24  ;;  %v2245_v62 = vsub.f32 %v5383_v8, %v2205_v33 }
 0x495   : > { %2328 = vrot.lane.b32.xlu0 %v2305_v16, %s4736_s22  ;;  %v2252_v38 = vsub.f32 %v5476_v5, %v2226_v42  ;;  %v6417_v42 = vld [vmem:[#allocation45_spill] sm:$0xff] }
 0x496   : > { %v5673_v35 = vpop.eup %4571  ;;  %v2265_v41 = vmul.f32 1.442695, %v2248_v9  ;;  %v2259_v48 = vmul.f32 1.442695, %v2245_v62 }
 0x497   : > { %v5678_v43 = vpop.eup %4573  ;;  %v2273_v10 = vmul.f32 1.442695, %v2252_v38  ;;  %v5682_v30 = vmul.f32 %v5673_v35, %v1935_v28 }
 0x498   : > { %v5685_v57 = vmul.f32 %v5678_v43, %v1934_v52  ;;  %v2361_v5 = vpack.c.bf16 %v5673_v35, %v5678_v43  ;;  %v4576_v63 = vpop.eup %4575  ;;  %v6418_v52 = vld [vmem:[#allocation46_spill] sm:$0xff]  ;;  %v6422_v43 = vld [vmem:[#allocation36_spill] sm:$0xff] }
 0x499   : > { %4577 = vpow2.f32 %v2273_v10 }
 0x49a   : > { %v2303_v22 = vpack.c.bf16 %v5682_v30, %v5685_v57  ;;  %4579 = vpow2.f32 %v2265_v41  ;;  %v6419_v41 = vld [vmem:[#allocation37_spill] sm:$0xff] }
 0x49b   : > { %v2208_v13 = vpop.xlane.xlu2 %2207  ;;  %4581 = vpow2.f32 %v2259_v48 }
 0x49c   : > { %v2246_v8 = vsub.f32 %v5393_v45, %v2208_v13  ;;  %2324 = vrot.lane.b32.xlu1 %v2303_v22, %s4736_s22  ;;  %v2211_v60 = vpop.xlane.xlu1 %2210  ;;  %v5698_v45 = vmul.f32 %v4576_v63, %v1936_v26  ;;  %v6426_v26 = vld [vmem:[#allocation42_spill] sm:$0xff] }
 0x49d   : > { %v2247_v1 = vsub.f32 %v6411_v3, %v2211_v60 }
 0x49e   : > { %v2261_v0 = vmul.f32 1.442695, %v2246_v8 }
 0x49f   : > { %v2263_v47 = vmul.f32 1.442695, %v2247_v1  ;;  %v4578_v59 = vpop.eup %4577 }
 0x4a0   : > { %4583 = vpow2.f32 %v2261_v0  ;;  %v5700_v54 = vmul.f32 %v4578_v59, %v1937_v11  ;;  %v2362_v21 = vpack.c.bf16 %v4578_v59, %v4576_v63  ;;  %v4580_v31 = vpop.eup %4579  ;;  %v4485_v63 = vld [vmem:[#allocation10] sm:$0xff]  ;;  %v4738_v0 = vmov 0  }
 0x4a1   : > { %4585 = vpow2.f32 %v2263_v47  ;;  %v4582_v2 = vpop.eup %4581  ;;  %4554 = vset.pattern.permute.xlu0 %v4738_v0  ;;  %4555 = vset.pattern.permute.xlu1 %v4738_v0  ;;  %v6428_v11 = vld [vmem:[#allocation44_spill] sm:$0xff]  ;;  %v1585_v47 = vld [vmem:[%s6420_s15] sm:$0x3] }
 0x4a2   : > { %v2304_v29 = vpack.c.bf16 %v5700_v54, %v5698_v45  ;;  %4556 = vset.pattern.permute.xlu2 %v4738_v0 }
 0x4a3   : > { %v1895_v15 = vpop.permute.xlu2 %1894 }
 0x4a4   : > { %v1933_v14 = vadd.f32 %v1895_v15, %v6415_v6  ;;  %2326 = vrot.lane.b32.xlu2 %v2304_v29, %s4736_s22 }
 0x4a6   : > { %v4584_v37 = vpop.eup %4583  ;;  %v5708_v19 = vmul.f32 %v4580_v31, %v1933_v14 }
 0x4a7   : > { %v4586_v23 = vpop.eup %4585  ;;  %v2359_v44 = vpack.c.bf16 %v4584_v37, %v4582_v2 }
 0x4a8   : > { %v5710_v24 = vmul.f32 %v4586_v23, %v1932_v50  ;;  %v2360_v16 = vpack.c.bf16 %v4580_v31, %v4586_v23  ;;  %v5774_v23 = vld [vmem:[%s1097_s26] sm:$0x7]  ;;  %s6429_s26 = scalar_lea.vmem %s4833_s4, %s4937_s7  ;;  %s6432_s7 = scalar_lea.vmem %s4843_s13, %s4950_s23 }
 0x4aa   : > { %v2302_v34 = vpack.c.bf16 %v5708_v19, %v5710_v24 }
 0x4ac   : > { %2322 = vrot.lane.b32.xlu0 %v2302_v34, %s4736_s22  ;;  %v2725_v34 = vld [vmem:[%s4955_s28 + $0x38] sm:$0xff] }
 0x4b4   : > { %v1889_v33 = vpop.permute.xlu1 %1888 }
 0x4b5   : > { %v1930_v28 = vadd.f32 %v1889_v33, %v6417_v42  ;;  %v2604_v33 = vsub.f32 2.0, %v5774_v23 }
 0x4b7   : > { %v5717_v62 = vmul.f32 %v4582_v2, %v1930_v28 }
 0x4bc   : > { %v1891_v38 = vpop.permute.xlu1 %1890 }
 0x4bd   : > { %v1931_v9 = vadd.f32 %v1891_v38, %v6418_v52  ;;  %v5783_v38 = vperm.slane %v5774_v23, 2  ;;  %v5785_v52 = vld [vmem:[#allocation6] sm:$0xff] }
 0x4bf   : > { %v5719_v32 = vmul.f32 %v4584_v37, %v1931_v9 }
 0x4c1   : > { %v2301_v10 = vpack.c.bf16 %v5719_v32, %v5717_v62 }
 0x4c3   : > { %2320 = vrot.lane.b32.xlu2 %v2301_v10, %s4736_s22  ;;  %v2722_v10 = vld [vmem:[%s4955_s28 + $0x20] sm:$0xff] }
 0x4cb   : > { %2400 = vrot.lane.b32.xlu2 %v6419_v41, %s4737_s25  ;;  %v2723_v41 = vld [vmem:[%s4955_s28 + $0x28] sm:$0xff] }
 0x4d3   : > { %2574 = vperm.xlu2 %4556, %v1585_v47  }
 0x4fe   : > { %v2333_v22 = vpop.permute.xlu0 %2332  ;;  %v2327_v8 = vpop.permute.xlu2 %2326 }
 0x4ff   : > { %2346 = vmatpush.bf16.msrb.mxu0 %v2333_v22 }
 0x505   : > { %v2331_v48 = vpop.permute.xlu1 %2330 }
 0x506   : > { %2347 = vmatpush.bf16.msrb.mxu0 %v2331_v48  ;;  %v2605_v48 = vperm.slane %v2604_v33, 2 }
 0x507   : > { %v2329_v13 = vpop.permute.xlu0 %2328 }
 0x50a   : > { %2348 = vmatpush.bf16.msrb.mxu0 %v2329_v13 }
 0x50e   : > { %2349 = vmatpush.bf16.msrb.mxu0 %v2327_v8  ;;  %v2325_v60 = vpop.permute.xlu1 %2324 }
 0x512   : > { %2350 = vmatpush.bf16.msrb.mxu0 %v2325_v60  ;;  %v2735_v60 = vpack.c.bf16 %v2723_v41, %v2722_v10 }
 0x51d   : > { %v2321_v1 = vpop.permute.xlu2 %2320 }
 0x51e   : > { %v2323_v3 = vpop.permute.xlu0 %2322 }
 0x51f   : > { %2351 = vmatpush.bf16.msrb.mxu0 %v2323_v3  ;;  %v2720_v3 = vld [vmem:[%s4955_s28 + $0x10] sm:$0xff] }
 0x523   : > { %2352 = vmatpush.bf16.msrb.mxu0 %v2321_v1  ;;  %v2721_v1 = vld [vmem:[%s4955_s28 + $0x18] sm:$0xff] }
 0x525   : > { %v2401_v15 = vpop.permute.xlu2 %2400 }
 0x526   : > { %4360 = vmatmul.msk.bf16.vlgmr.msrb.gmra.mxu0 %vm2341_vm12, %v4485_v63 }
 0x527   : > { %2367 = vmatpush.bf16.msra.mxu0 %v2365_v18 }
 0x52b   : > { %2368 = vmatpush.bf16.msra.mxu0 %v2364_v40 }
 0x52f   : > { %2369 = vmatpush.bf16.msra.mxu0 %v2363_v53  ;;  %v6421_v53 = vld [vmem:[#allocation38_spill] sm:$0xff] }
 0x533   : > { %2370 = vmatpush.bf16.msra.mxu0 %v2362_v21 }
 0x537   : > { %2371 = vmatpush.bf16.msra.mxu0 %v2361_v5  ;;  %v6423_v5 = vld [vmem:[#allocation39_spill] sm:$0xff] }
 0x53b   : > { %2372 = vmatpush.bf16.msra.mxu0 %v2360_v16  ;;  %v2724_v16 = vld [vmem:[%s4955_s28 + $0x30] sm:$0xff] }
 0x53c   : > { %v2736_v9 = vpack.c.bf16 %v2725_v34, %v2724_v16 }
 0x53f   : > { %2373 = vmatpush.bf16.msra.mxu0 %v2359_v44  ;;  %v5776_v44 = vpop.permute.xlu2 %2574 }
 0x542   : > { %4361 = vmatmul.msk.bf16.vlgmr.msra.gmra.mxu0 %vm2341_vm12, %v4485_v63 }
 0x5a3   : > { %v2354_v7 = vpop.f32.mrf.mxu0 }
 0x5ab   : > { %v2356_v4 = vpop.f32.mrf.mxu0 }
 0x5bf   : > { %v2375_v18 = vpop.f32.mrf.mxu0 }
 0x5c0   : > { %v2380_v61 = vmax.f32 %v2375_v18, 1e-20 }
 0x5c2   : > { %4587 = vrcp.f32 %v2380_v61  ;;  %v2718_v61 = vld [vmem:[%s4955_s28] sm:$0xff] }
 0x5c7   : > { %v2377_v49 = vpop.f32.mrf.mxu0 }
 0x5c8   : > { %v4588_v12 = vpop.eup %4587  ;;  %v2381_v40 = vmax.f32 %v2377_v49, 1e-20  ;;  %v2406_v27 = vpack.c.bf16 %v2377_v49, %v2375_v18  ;;  %v2734_v18 = vpack.c.bf16 %v2721_v1, %v2720_v3  ;;  %v2719_v49 = vld [vmem:[%s4955_s28 + $0x8] sm:$0xff]  ;;  %v2695_v3 = vperm.slane %v5774_v23, 0  ;;  %s6437_s28 = sld [smem:[#allocation32_spill]] (!%p4433_p2) }
 0x5c9   : > { %2386 = vperm.xlu0 %4554, %v4588_v12  }
 0x5ca   : > { %4589 = vrcp.f32 %v2381_v40  ;;  %2414 = vmatpush.bf16.msrb.mxu0 %v2406_v27  ;;  %v2733_v40 = vpack.c.bf16 %v2719_v49, %v2718_v61  ;;  %v4651_v27 = vld [vmem:[#allocation2] sm:$0xff] }
 0x5cd   : > { %4362 = vmatmul.msk.bf16.vlgmr.msrb.gmra.mxu0 %vm1794_vm10, %v6421_v53  ;;  %v4652_v53 = vld [vmem:[#allocation2 + $0x8] sm:$0xff] }
 0x5d0   : > { %v4590_v35 = vpop.eup %4589 }
 0x5d1   : > { %2391 = vperm.xlu1 %4555, %v4590_v35   ;;  %v2732_v35 = vpack.c.bf16 %v4652_v53, %v4651_v27 }
 0x5d9   : > { %2398 = vrot.lane.b32.xlu1 %v6422_v43, %s4737_s25 }
 0x5dd   : > { %4363 = vmatmul.msk.bf16.gmra.mxu0 %vm1794_vm10, %v6423_v5  ;;  %v2729_v5 = vld [vmem:[%s4960_s2 + $0x10] sm:$0xff] }
 0x5ed   : > { %4364 = vmatmul.msk.bf16.gmra.mxu0 %vm1794_vm10, %v6424_v51  ;;  %v2730_v51 = vld [vmem:[%s4960_s2 + $0x18] sm:$0xff] }
 0x5fd   : > { %4365 = vmatmul.msk.bf16.gmra.mxu0 %vm1794_vm10, %v6425_v17 }
 0x60d   : > { %4366 = vmatmul.msk.bf16.gmra.mxu0 %vm1794_vm10, %v6426_v26  ;;  %v2761_v26 = vpack.c.bf16 %v2730_v51, %v2729_v5  ;;  %v2701_v5 = vld [vmem:[#allocation5] sm:$0xff]  ;;  %v2702_v51 = vld [vmem:[#allocation5 + $0x8] sm:$0xff] }
 0x60f   : > { %2777 = vmatpush.bf16.msrb.mxu1 %v2761_v26  ;;  %v2757_v26 = vpack.c.bf16 %v2702_v51, %v2701_v5 }
 0x61d   : > { %4367 = vmatmul.msk.bf16.gmra.mxu0 %vm1794_vm10, %v6427_v58  ;;  %v2727_v58 = vld [vmem:[%s4960_s2] sm:$0xff] }
 0x62d   : > { %4368 = vmatmul.msk.bf16.gmra.mxu0 %vm1794_vm10, %v6428_v11  ;;  %v2728_v11 = vld [vmem:[%s4960_s2 + $0x8] sm:$0xff]  ;;  %s6438_s2 = sld [smem:[#allocation34_spill]] (!%p4433_p2) }
 0x63b   : > { %v2387_v31 = vpop.permute.xlu0 %2386 }
 0x63c   : > { %v2394_v14 = vmul.f32 %v2387_v31, %v2354_v7 }
 0x643   : > { %v2392_v59 = vpop.permute.xlu1 %2391 }
 0x644   : > { %v2395_v21 = vmul.f32 %v2392_v59, %v2356_v4  ;;  %v5796_v4 = vld [vmem:[#allocation6 + $0x8] sm:$0xff]  ;;  %v2760_v59 = vpack.c.bf16 %v2728_v11, %v2727_v58 }
 0x645   : > { %v5840_v11 = vld [vmem:[#allocation12 + $0x10] sm:$0x7] }
 0x646   : > { %v5755_v29 = vadd.f32 %v2401_v15, %v2395_v21  ;;  %2778 = vmatpush.bf16.msrb.mxu1 %v2760_v59 }
 0x648   : > { %2566 = vmatpush.msrb.mxu2 %v5755_v29  ;;  %v2579_v6 = vmul.f32 %v5755_v29, %v5755_v29 }
 0x649   : > { %4378 = vmatmul.msk.bf16.vlgmr.msrb.gmra.mxu1 %vm1688_vm9, %v2757_v26 }
 0x64a   : > { %2594 = vmatpush.msrb.mxu3 %v2579_v6 }
 0x64b   : > { %v2399_v2 = vpop.permute.xlu1 %2398 }
 0x64c   : > { %v5760_v37 = vadd.f32 %v2399_v2, %v2394_v14 }
 0x64e   : > { %2567 = vmatpush.msrb.mxu2 %v5760_v37  ;;  %v2578_v50 = vmul.f32 %v5760_v37, %v5760_v37 }
 0x64f   : > { %4369 = vmatmul.msk.f32.vlgmr.msrb.gmra.mxu2 %vm1794_vm10, %v5762_v56 }
 0x650   : > { %2595 = vmatpush.msrb.mxu3 %v2578_v50  ;;  %v4558_v50 = vld [vmem:[%s6429_s26] ss:$0 sm:$0xff] }
 0x651   : > { %4370 = vmatmul.msk.f32.vlgmr.msrb.gmra.mxu3 %vm1794_vm10, %v5762_v56 }
 0x6d2   : > { %v2569_v42 = vpop.f32.mrf.mxu2 }
 0x6d3   : > { %v2577_v28 = vmul.f32 %v5776_v44, %v2569_v42 }
 0x6d4   : > { %v2597_v13 = vpop.f32.mrf.mxu3 }
 0x6d5   : > { %v2601_v22 = vmul.f32 %v2577_v28, %v2577_v28  ;;  %4371 = vmatpush.msk.msra.mxu3 %vm2616_vm13, %v2577_v28  ;;  %v2600_v63 = vmul.f32 %v2597_v13, %v5776_v44 }
 0x6d6   : > { %4372 = vmatmul.msk.f32.vlgmr.msra.gmra.mxu3 %vm2609_vm14, %v5785_v52 }
 0x6d7   : > { %v2603_v8 = vmul.f32 %v5783_v38, %v2601_v22  ;;  %2747 = vmatpush.bf16.msrb.mxu3 %v2736_v9 }
 0x6d9   : > { %v2606_v0 = vmul.f32 %v2605_v48, %v2603_v8  ;;  %v5822_v8 = vld [vmem:[#allocation12] sm:$0xff] }
 0x6db   : > { %v2607_v7 = vsub.f32 %v2600_v63, %v2606_v0  ;;  %2748 = vmatpush.bf16.msrb.mxu3 %v2735_v60 }
 0x6dd   : > { %v2608_v12 = vmax.f32 %v2607_v7, 0.0  ;;  %v2698_v7 = vperm.slane %v5774_v23, 1 }
 0x6de   : > { %4373 = vmatmul.msk.f32.gmra.mxu3 %vm2609_vm14, %v5796_v4 }
 0x6df   : > { %4374 = vmatpush.msk.msra.mxu2 %vm2616_vm13, %v2608_v12  ;;  %2749 = vmatpush.bf16.msrb.mxu3 %v2734_v18 }
 0x6e0   : > { %4375 = vmatmul.msk.f32.vlgmr.msra.gmra.mxu2 %vm2609_vm14, %v5785_v52 }
 0x6e3   : > { %2750 = vmatpush.bf16.msrb.mxu3 %v2733_v40 }
 0x6e6   : > { %4377 = vmatmul.msk.bf16.vlgmr.msrb.gmra.mxu3 %vm1661_vm8, %v2732_v35 }
 0x6e8   : > { %4376 = vmatmul.msk.f32.gmra.mxu2 %vm2609_vm14, %v5796_v4 }
 0x759   : > { %v2637_v43 = vpop.f32.mrf.mxu3 }
 0x75a   : > { %v2643_v42 = vmul.f32 %v2637_v43, %v5783_v38 }
 0x75c   : > { %v2645_v60 = vsub.f32 %v5760_v37, %v2643_v42 }
 0x761   : > { %v2640_v17 = vpop.f32.mrf.mxu3 }
 0x762   : > { %v2644_v61 = vmul.f32 %v2640_v17, %v5783_v38  ;;  %v5835_v38 = vld [vmem:[#allocation12 + $0x8] sm:$0xff] }
 0x763   : > { %v2667_v47 = vpop.f32.mrf.mxu2  ;;  %v2703_v17 = vld [vmem:[#allocation5 + $0x10] sm:$0xff] }
 0x764   : > { %v2668_v21 = vadd.f32 1e-05, %v2667_v47  ;;  %v2646_v27 = vsub.f32 %v5755_v29, %v2644_v61  ;;  %v2704_v29 = vld [vmem:[#allocation5 + $0x18] sm:$0xff]  ;;  %v2883_v47 = vunpack.c.l.b16 %v5840_v11 }
 0x765   : > { %v2758_v58 = vpack.c.bf16 %v2704_v29, %v2703_v17 }
 0x766   : > { %4591 = vrsqrt.f32 %v2668_v21  ;;  %vm2679_vm15 = vweird.f32 %v2668_v21  ;;  %v5843_v59 = vpack.c.b16 %v2883_v47, %v2883_v47 }
 0x767   : > { %4379 = vmatmul.msk.bf16.gmra.mxu1 %vm1688_vm9, %v2758_v58 }
 0x769   : > { %v2752_v15 = vpop.f32.mrf.mxu3 }
 0x76a   : > { %v5816_v28 = vadd.f32 %v4558_v50, %v2752_v15 }
 0x76b   : > { %v2670_v31 = vpop.f32.mrf.mxu2 }
 0x76c   : > { %v4592_v6 = vpop.eup %4591  ;;  %v2671_v14 = vadd.f32 1e-05, %v2670_v31  ;;  %v4486_v31 = vld [vmem:[#allocation11] sm:$0xff] }
 0x76d   : > { %v2674_v2 = vmul.f32 %v4592_v6, %v2668_v21  ;;  %vm2680_vm0 = vweird.f32 %v4592_v6  ;;  %v2705_v21 = vld [vmem:[#allocation5 + $0x20] sm:$0x3f] }
 0x76e   : > { %4593 = vrsqrt.f32 %v2671_v14  ;;  %vm2681_vm1 = vmor %vm2679_vm15, %vm2680_vm0  ;;  %vm2689_vm2 = vweird.f32 %v2671_v14 }
 0x76f   : > { %v2675_v16 = vmul.f32 %v4592_v6, %v2674_v2  ;;  %v2710_v2 = vld [vmem:[#allocation11 + $0x10] sm:$0x7] }
 0x771   : > { %v2676_v34 = vmul.f32 0.5, %v2675_v16  ;;  %v2754_v33 = vpop.f32.mrf.mxu3 }
 0x772   : > { %v5818_v9 = vadd.f32 %v4558_v50, %v2754_v33  ;;  %v2804_v50 = vunpack.c.l.b16 %v2710_v2  ;;  %v5851_v33 = vpop.f32.mrf.mxu1  ;;  %v2714_v2 = vld [vmem:[#allocation12 + $0x8] sm:$0xff]  }
 0x773   : > { %v2677_v10 = vsub.f32 1.5, %v2676_v34 }
 0x774   : > { %v4594_v41 = vpop.eup %4593  ;;  %v2794_v22 = vpack.c.bf16 %v5818_v9, %v5816_v28  ;;  %v2807_v16 = vpack.c.b16 %v2804_v50, %v2804_v50 }
 0x775   : > { %v2678_v48 = vmul.f32 %v4592_v6, %v2677_v10  ;;  %v2684_v13 = vmul.f32 %v4594_v41, %v2671_v14  ;;  %vm2690_vm3 = vweird.f32 %v4594_v41  ;;  %v4487_v14 = vld [vmem:[#allocation11 + $0x8] sm:$0xff] }
 0x776   : > { %2809 = vrot.lane.b32.xlu1 %v2794_v22, %s4736_s22  ;;  %2903 = vmatpush.bf16.msra.mxu3 %v2794_v22  ;;  %vm2691_vm4 = vmor %vm2689_vm2, %vm2690_vm3  ;;  %vm3035_vm2 = vcmask 310272  }
 0x777   : > { %v2682_v1 = vsel %vm2681_vm1, %v4592_v6, %v2678_v48  ;;  %v2685_v63 = vmul.f32 %v4594_v41, %v2684_v13  ;;  %v2759_v6 = vpack.c.bf16 %v2705_v21, %v2705_v21  ;;  %vm3039_vm1 = vcmask 1042432  }
 0x778   : > { %v2693_v0 = vmul.f32 %v2682_v1, %v2645_v60 }
 0x779   : > { %v2686_v18 = vmul.f32 0.5, %v2685_v63  ;;  %4400 = vmatmul.msk.bf16.vlgmr.msra.gmra.mxu3 %vm1794_vm10, %v5822_v8  ;;  %4380 = vmatmul.msk.bf16.gmra.mxu1 %vm1688_vm9, %v2759_v6  ;;  %v2949_v6 = vunpack.c.l.bf16 %v5840_v11  ;;  %v2947_v11 = vunpack.c.l.bf16 %v2714_v2 }
 0x77a   : > { %v2696_v49 = vmul.f32 %v2695_v3, %v2693_v0  ;;  %v5853_v10 = vpop.f32.mrf.mxu1 }
 0x77b   : > { %v2687_v37 = vsub.f32 1.5, %v2686_v18  ;;  %vm5883_vm6 = vcmp.ne.f32.partialorder %v2949_v6, 0.0  ;;  %vm2952_vm0 = vcmp.ne.f32.partialorder %v2947_v11, 0.0 }
 0x77c   : > { %v2699_v12 = vadd.f32 %v2698_v7, %v2696_v49 }
 0x77d   : > { %v2688_v40 = vmul.f32 %v4594_v41, %v2687_v37 }
 0x77e   : > { %3298 = vst.msk [vmem:[#allocation2] sm:$0xff] %vm1688_vm9, %v2699_v12 }
 0x77f   : > { %v2692_v53 = vsel %vm2691_vm4, %v4594_v41, %v2688_v40 }
 0x780   : > { %v2694_v35 = vmul.f32 %v2692_v53, %v2646_v27 }
 0x782   : > { %v2697_v23 = vmul.f32 %v2695_v3, %v2694_v35 }
 0x784   : > { %v2700_v43 = vadd.f32 %v2698_v7, %v2697_v23 }
 0x786   : > { %3299 = vst.msk [vmem:[#allocation2 + $0x8] sm:$0xff] %vm1688_vm9, %v2700_v43 }
 0x789   : > { %4401 = vmatmul.msk.bf16.gmra.mxu3 %vm1794_vm10, %v5835_v38 }
 0x799   : > { %4402 = vmatmul.msk.bf16.gmra.mxu3 %vm1794_vm10, %v5843_v59 }
 0x7e4   : > { %v2785_v22 = vpop.f32.mrf.mxu1 }
 0x7e8   : > { %v2810_v15 = vpop.permute.xlu1 %2809 }
 0x7e9   : > { %2828 = vmatpush.bf16.msrb.mxu2 %v2810_v15 }
 0x7ec   : > { %4389 = vmatmul.msk.bf16.vlgmr.msrb.gmra.mxu2 %vm1794_vm10, %v4486_v31  ;;  %v5855_v13 = vpop.f32.mrf.mxu1  ;;  %v2711_v31 = vld [vmem:[#allocation12] sm:$0xff]  }
 0x7f6   : > { %v2790_v3 = vpop.f32.mrf.mxu1 }
 0x7fc   : > { %4390 = vmatmul.msk.bf16.gmra.mxu2 %vm1794_vm10, %v4487_v14  ;;  %v2905_v34 = vpop.f32.mrf.mxu3  ;;  %v2945_v14 = vunpack.c.l.bf16 %v2711_v31 }
 0x7fe   : > { %v2792_v7 = vpop.f32.mrf.mxu1  ;;  %vm2950_vm7 = vcmp.ne.f32.partialorder %v2945_v14, 0.0 }
 0x804   : > { %v2907_v42 = vpop.f32.mrf.mxu3 }
 0x80c   : > { %4391 = vmatmul.msk.bf16.gmra.mxu2 %vm1794_vm10, %v2807_v16  ;;  %v2910_v41 = vpop.f32.mrf.mxu3 }
 0x814   : > { %v2912_v48 = vpop.f32.mrf.mxu3 }
 0x81c   : > { %v2915_v60 = vpop.f32.mrf.mxu3 }
 0x824   : > { %v2917_v0 = vpop.f32.mrf.mxu3 }
 0x86f   : > { %v5857_v1 = vpop.f32.mrf.mxu2 }
 0x870   : > { %v2844_v63 = vadd.f32 %v5857_v1, %v5851_v33 }
 0x872   : > { %v2919_v18 = vmul.f32 %v2905_v34, %v2844_v63 }
 0x874   : > { %v2924_v61 = vsel %vm1688_vm9, %v2919_v18, 0.0 }
 0x875   : > { %2925 = vadd.xlane.f32.xlu0 %v2924_v61 }
 0x877   : > { %v5862_v49 = vpop.f32.mrf.mxu2 }
 0x878   : > { %v2845_v37 = vadd.f32 %v5862_v49, %v5853_v10 }
 0x87a   : > { %v2920_v12 = vmul.f32 %v2907_v42, %v2845_v37 }
 0x87c   : > { %v2927_v40 = vsel %vm1688_vm9, %v2920_v12, 0.0 }
 0x87d   : > { %2928 = vadd.xlane.f32.xlu1 %v2927_v40 }
 0x87f   : > { %v5867_v27 = vpop.f32.mrf.mxu2 }
 0x880   : > { %v2846_v17 = vadd.f32 %v5867_v27, %v2785_v22 }
 0x882   : > { %v2921_v47 = vmul.f32 %v2910_v41, %v2846_v17  ;;  %v2946_v41 = vunpack.c.h.bf16 %v2711_v31 }
 0x884   : > { %v2930_v21 = vsel %vm1688_vm9, %v2921_v47, 0.0  ;;  %vm2951_vm12 = vcmp.ne.f32.partialorder %v2946_v41, 0.0 }
 0x887   : > { %v5869_v53 = vpop.f32.mrf.mxu2 }
 0x888   : > { %v2847_v35 = vadd.f32 %v5869_v53, %v5855_v13 }
 0x88a   : > { %v2922_v23 = vmul.f32 %v2912_v48, %v2847_v35  ;;  %v2948_v48 = vunpack.c.h.bf16 %v2714_v2 }
 0x88c   : > { %v2933_v43 = vsel %vm1688_vm9, %v2922_v23, 0.0  ;;  %vm2953_vm15 = vcmp.ne.f32.partialorder %v2948_v48, 0.0 }
 0x88d   : > { %2934 = vadd.xlane.f32.xlu0 %v2933_v43 }
 0x88f   : > { %v5874_v5 = vpop.f32.mrf.mxu2 }
 0x890   : > { %v2848_v51 = vadd.f32 %v5874_v5, %v2790_v3 }
 0x892   : > { %v2923_v26 = vmul.f32 %v2915_v60, %v2848_v51 }
 0x894   : > { %v2937_v29 = vsel %vm2936_vm5, %v2923_v26, 0.0 }
 0x895   : > { %2938 = vadd.xlane.f32.xlu2 %v2937_v29 }
 0x896   : > { %2858 = vrot.lane.b32.xlu1 %v2785_v22, %s4737_s25 }
 0x897   : > { %v2842_v58 = vpop.f32.mrf.mxu2 }
 0x89d   : > { %2931 = vadd.xlane.f32.xlu2 %v2930_v21 }
 0x8a1   : > { %2862 = vrot.lane.b32.xlu0 %v2790_v3, %s4737_s25 }
 0x8e8   : > { %v2926_v15 = vpop.xlane.xlu0 %2925 }
 0x8e9   : > { %v5887_v34 = vmul.f32 0.17677669, %v2926_v15 }
 0x8eb   : > { %v2955_v63 = vsel %vm2950_vm7, %v5887_v34, -1e+30 }
 0x8ec   : > { %v2960_v61 = vsel %vm1794_vm10, %v2955_v63, -inf }
 0x8f0   : > { %v2929_v22 = vpop.xlane.xlu1 %2928 }
 0x8f1   : > { %v5892_v0 = vmul.f32 0.17677669, %v2929_v22 }
 0x8f3   : > { %v2956_v12 = vsel %vm2951_vm12, %v5892_v0, -1e+30 }
 0x8f4   : > { %v2961_v51 = vsel %vm1794_vm10, %v2956_v12, -inf }
 0x900   : > { %v2935_v60 = vpop.xlane.xlu0 %2934 }
 0x901   : > { %v2943_v7 = vmul.f32 0.17677669, %v2935_v60 }
 0x903   : > { %v2958_v40 = vsel %vm2953_vm15, %v2943_v7, -1e+30  ;;  %vm3308_vm15 = vcmask 523520  }
 0x904   : > { %v2963_v26 = vsel %vm1794_vm10, %v2958_v40, -inf }
 0x908   : > { %v2939_v16 = vpop.xlane.xlu2 %2938 }
 0x909   : > { %v2944_v42 = vmul.f32 0.17677669, %v2939_v16 }
 0x90b   : > { %v2959_v3 = vsel %vm5883_vm6, %v2944_v42, -1e+30 }
 0x90c   : > { %v2965_v18 = vsel %vm2964_vm11, %v2959_v3, -inf }
 0x90d   : > { %v2966_v23 = vmax.f32 %v2960_v61, %v2965_v18 }
 0x90f   : > { %v2967_v58 = vmax.f32 %v2966_v23, %v2961_v51 }
 0x910   : > { %v2932_v37 = vpop.xlane.xlu2 %2931 }
 0x911   : > { %v2942_v35 = vmul.f32 0.17677669, %v2932_v37 }
 0x913   : > { %v2957_v43 = vsel %vm2952_vm0, %v2942_v35, -1e+30 }
 0x914   : > { %v2962_v17 = vsel %vm1794_vm10, %v2957_v43, -inf }
 0x915   : > { %v2968_v29 = vmax.f32 %v2962_v17, %v2963_v26 }
 0x917   : > { %v2969_v47 = vmax.f32 %v2967_v58, %v2968_v29 }
 0x919   : > { %v2970_v21 = vrot.slane %v2969_v47, 4 }
 0x91b   : > { %v2971_v15 = vmax.f32 %v2969_v47, %v2970_v21 }
 0x91d   : > { %v2972_v31 = vrot.slane %v2971_v15, 2 }
 0x91f   : > { %v2973_v2 = vmax.f32 %v2971_v15, %v2972_v31 }
 0x921   : > { %v2974_v50 = vrot.slane %v2973_v2, 1 }
 0x923   : > { %v2975_v16 = vmax.f32 %v2973_v2, %v2974_v50 }
 0x925   : > { %v2980_v22 = vmul.f32 %v2975_v16, %v2949_v6  ;;  %v2979_v60 = vmul.f32 %v2975_v16, %v2948_v48  ;;  %v2978_v3 = vmul.f32 %v2975_v16, %v2947_v11  ;;  %v2976_v37 = vmul.f32 %v2975_v16, %v2945_v14  ;;  %v2859_v6 = vpop.permute.xlu1 %2858  ;;  %v2863_v48 = vpop.permute.xlu0 %2862 }
 0x926   : > { %v2977_v12 = vmul.f32 %v2975_v16, %v2946_v41 }
 0x927   : > { %v2993_v63 = vsel %vm2964_vm11, %v2980_v22, 0.0  ;;  %v2990_v18 = vsel %vm1794_vm10, %v2979_v60, 0.0  ;;  %v2987_v61 = vsel %vm1794_vm10, %v2978_v3, 0.0  ;;  %v2981_v40 = vsel %vm1794_vm10, %v2976_v37, 0.0 }
 0x928   : > { %2994 = vadd.xlane.f32.xlu1 %v2993_v63  ;;  %2991 = vadd.xlane.f32.xlu0 %v2990_v18  ;;  %v2984_v23 = vsel %vm1794_vm10, %v2977_v12, 0.0  ;;  %v2871_v22 = vadd.f32 %v2859_v6, %v5867_v27 }
 0x929   : > { %2988 = vadd.xlane.f32.xlu2 %v2987_v61 }
 0x930   : > { %2982 = vadd.xlane.f32.xlu1 %v2981_v40  ;;  %v4490_v40 = vld [vmem:[#allocation13] sm:$0xff] }
 0x931   : > { %2985 = vadd.xlane.f32.xlu2 %v2984_v23 }
 0x93c   : > { %2854 = vrot.lane.b32.xlu0 %v5851_v33, %s4737_s25 }
 0x949   : > { %2860 = vrot.lane.b32.xlu2 %v5855_v13, %s4737_s25  ;;  %2856 = vrot.lane.b32.xlu1 %v5853_v10, %s4737_s25  ;;  %v2873_v10 = vadd.f32 %v2863_v48, %v5874_v5 }
 0x99b   : > { %v2995_v11 = vpop.xlane.xlu1 %2994  ;;  %v2992_v14 = vpop.xlane.xlu0 %2991 }
 0x99c   : > { %v3000_v41 = vsub.f32 %v2944_v42, %v2995_v11  ;;  %v2999_v43 = vsub.f32 %v2943_v7, %v2992_v14  ;;  %v2989_v51 = vpop.xlane.xlu2 %2988 }
 0x99d   : > { %v2998_v26 = vsub.f32 %v2942_v35, %v2989_v51 }
 0x99e   : > { %v3009_v17 = vmul.f32 1.442695, %v3000_v41  ;;  %v3007_v29 = vmul.f32 1.442695, %v2999_v43 }
 0x99f   : > { %v3005_v58 = vmul.f32 1.442695, %v2998_v26 }
 0x9a0   : > { %4595 = vpow2.f32 %v3009_v17 }
 0x9a1   : > { %4597 = vpow2.f32 %v3007_v29 }
 0x9a2   : > { %4599 = vpow2.f32 %v3005_v58 }
 0x9a3   : > { %v2983_v33 = vpop.xlane.xlu1 %2982 }
 0x9a4   : > { %v2986_v47 = vpop.xlane.xlu2 %2985  ;;  %v2996_v13 = vsub.f32 %v5887_v34, %v2983_v33 }
 0x9a5   : > { %v2997_v21 = vsub.f32 %v5892_v0, %v2986_v47 }
 0x9a6   : > { %v4596_v15 = vpop.eup %4595  ;;  %v3001_v31 = vmul.f32 1.442695, %v2996_v13 }
 0x9a7   : > { %v3003_v42 = vmul.f32 1.442695, %v2997_v21  ;;  %v3059_v7 = vpack.c.bf16 %v4596_v15, %v4596_v15  ;;  %v5914_v35 = vmul.f32 %v4596_v15, %v2873_v10  ;;  %v4598_v2 = vpop.eup %4597 }
 0x9a8   : > { %4601 = vpow2.f32 %v3001_v31  ;;  %v4600_v50 = vpop.eup %4599 }
 0x9a9   : > { %4603 = vpow2.f32 %v3003_v42  ;;  %v3061_v16 = vsel %vm3039_vm1, %v3059_v7, 0  ;;  %v3018_v34 = vpack.c.bf16 %v5914_v35, %v5914_v35  ;;  %v3058_v0 = vpack.c.bf16 %v4598_v2, %v4600_v50 }
 0x9aa   : > { %3068 = vmatpush.bf16.msra.mxu2 %v3061_v16  ;;  %v5924_v61 = vmul.f32 %v4600_v50, %v2871_v22 }
 0x9ab   : > { %3031 = vrot.lane.b32.xlu0 %v3018_v34, %s4736_s22 }
 0x9ac   : > { %v2861_v5 = vpop.permute.xlu2 %2860 }
 0x9ad   : > { %v2872_v60 = vadd.f32 %v2861_v5, %v5869_v53 }
 0x9ae   : > { %v4602_v3 = vpop.eup %4601  ;;  %3069 = vmatpush.bf16.msra.mxu2 %v3058_v0  ;;  %v2855_v27 = vpop.permute.xlu0 %2854 }
 0x9af   : > { %v4604_v63 = vpop.eup %4603  ;;  %v5922_v18 = vmul.f32 %v4598_v2, %v2872_v60  ;;  %v2869_v53 = vadd.f32 %v2855_v27, %v5857_v1 }
 0x9b0   : > { %v3057_v37 = vpack.c.bf16 %v4604_v63, %v4602_v3 }
 0x9b1   : > { %v3017_v12 = vpack.c.bf16 %v5922_v18, %v5924_v61  ;;  %v5932_v48 = vmul.f32 %v4602_v3, %v2869_v53 }
 0x9b2   : > { %3070 = vmatpush.bf16.msra.mxu2 %v3057_v37  ;;  %v2416_v37 = vpop.f32.mrf.mxu0 }
 0x9b3   : > { %3029 = vrot.lane.b32.xlu2 %v3017_v12, %s4736_s22 }
 0x9b5   : > { %4408 = vmatmul.msk.bf16.vlgmr.msra.gmra.mxu2 %vm3035_vm2, %v4490_v40 }
 0x9ba   : > { %v5965_v12 = vpop.f32.mrf.mxu0 }
 0x9bb   : > { %v2857_v23 = vpop.permute.xlu1 %2856 }
 0x9bc   : > { %v2870_v6 = vadd.f32 %v2857_v23, %v5862_v49 }
 0x9be   : > { %v5934_v11 = vmul.f32 %v4604_v63, %v2870_v6  ;;  %v5976_v6 = vld [vmem:[%s6432_s7] sm:$0x7] }
 0x9c0   : > { %v3016_v14 = vpack.c.bf16 %v5934_v11, %v5932_v48 }
 0x9c2   : > { %3027 = vrot.lane.b32.xlu1 %v3016_v14, %s4736_s22 }
 0x9ca   : > { %3097 = vrot.lane.b32.xlu1 %v5818_v9, %s4737_s25 }
 0xa0d   : > { %v3030_v1 = vpop.permute.xlu2 %3029 }
 0xa1d   : > { %v3032_v41 = vpop.permute.xlu0 %3031 }
 0xa1e   : > { %v3041_v43 = vsel %vm3039_vm1, %v3032_v41, 0 }
 0xa1f   : > { %3048 = vmatpush.bf16.msra.mxu1 %v3041_v43  ;;  %v3209_v43 = vsub.f32 2.0, %v5976_v6 }
 0xa23   : > { %3049 = vmatpush.bf16.msra.mxu1 %v3030_v1 }
 0xa34   : > { %v3028_v51 = vpop.permute.xlu1 %3027 }
 0xa35   : > { %3050 = vmatpush.bf16.msra.mxu1 %v3028_v51 }
 0xa38   : > { %4407 = vmatmul.msk.bf16.vlgmr.msra.gmra.mxu1 %vm3035_vm2, %v4490_v40  ;;  %v3072_v49 = vpop.f32.mrf.mxu2  ;;  %v5967_v40 = vpop.f32.mrf.mxu0 }
 0xa39   : > { %v3077_v26 = vmax.f32 %v3072_v49, 1e-20 }
 0xa3b   : > { %4605 = vrcp.f32 %v3077_v26 }
 0xa3c   : > { %v3098_v15 = vpop.permute.xlu1 %3097 }
 0xa40   : > { %v3074_v17 = vpop.f32.mrf.mxu2  ;;  %v2423_v27 = vpop.f32.mrf.mxu0 }
 0xa41   : > { %v4606_v29 = vpop.eup %4605  ;;  %v3078_v58 = vmax.f32 %v3074_v17, 1e-20  ;;  %v3103_v33 = vpack.c.bf16 %v3074_v17, %v3072_v49 }
 0xa42   : > { %3083 = vperm.xlu2 %4556, %v4606_v29   ;;  %v5983_v29 = vperm.slane %v5976_v6, 2 }
 0xa43   : > { %4607 = vrcp.f32 %v3078_v58  ;;  %3111 = vmatpush.bf16.msrb.mxu3 %v3103_v33 }
 0xa46   : > { %4409 = vmatmul.msk.bf16.vlgmr.msrb.gmra.mxu3 %vm1794_vm10, %v5822_v8 }
 0xa48   : > { %v5969_v53 = vpop.f32.mrf.mxu0 }
 0xa49   : > { %v4608_v9 = vpop.eup %4607 }
 0xa4a   : > { %3088 = vperm.xlu0 %4554, %v4608_v9   ;;  %v3210_v9 = vperm.slane %v3209_v43, 2 }
 0xa50   : > { %v5971_v23 = vpop.f32.mrf.mxu0 }
 0xa52   : > { %3095 = vrot.lane.b32.xlu0 %v5816_v28, %s4737_s25 }
 0xa56   : > { %4410 = vmatmul.msk.bf16.gmra.mxu3 %vm1794_vm10, %v5835_v38 }
 0xa58   : > { %v2431_v14 = vpop.f32.mrf.mxu0 }
 0xa66   : > { %4411 = vmatmul.msk.bf16.gmra.mxu3 %vm1794_vm10, %v5843_v59 }
 0xa9c   : > { %v3084_v42 = vpop.permute.xlu2 %3083 }
 0xab5   : > { %v3052_v47 = vpop.f32.mrf.mxu1 }
 0xab6   : > { %v3091_v28 = vmul.f32 %v3084_v42, %v3052_v47 }
 0xabc   : > { %v3089_v13 = vpop.permute.xlu0 %3088 }
 0xabd   : > { %v3054_v10 = vpop.f32.mrf.mxu1 }
 0xabe   : > { %v3092_v21 = vmul.f32 %v3089_v13, %v3054_v10 }
 0xac0   : > { %v5951_v31 = vadd.f32 %v3098_v15, %v3092_v21  ;;  %v5991_v21 = vpop.f32.mrf.mxu0 }
 0xac2   : > { %v3184_v8 = vmul.f32 %v5951_v31, %v5951_v31  ;;  %3176 = vmatpush.msra.mxu3 %v5951_v31 }
 0xac4   : > { %3199 = vmatpush.msrb.mxu1 %v3184_v8  ;;  %v3096_v7 = vpop.permute.xlu0 %3095 }
 0xac5   : > { %v5956_v38 = vadd.f32 %v3096_v7, %v3091_v28 }
 0xac7   : > { %3177 = vmatpush.msra.mxu3 %v5956_v38  ;;  %v3183_v59 = vmul.f32 %v5956_v38, %v5956_v38 }
 0xac8   : > { %4412 = vmatmul.msk.f32.vlgmr.msra.gmra.mxu3 %vm1794_vm10, %v5762_v56 }
 0xac9   : > { %v3113_v2 = vpop.f32.mrf.mxu3  ;;  %3200 = vmatpush.msrb.mxu1 %v3183_v59 }
 0xaca   : > { %4609 = vrcp.f32 %v3113_v2  ;;  %4413 = vmatmul.msk.f32.vlgmr.msrb.gmra.mxu1 %vm1794_vm10, %v5762_v56  ;;  %v6001_v2 = vpop.f32.mrf.mxu0 }
 0xad0   : > { %v4610_v50 = vpop.eup %4609 }
 0xad1   : > { %3134 = vperm.xlu2 %4556, %v4610_v50   ;;  %v3115_v16 = vpop.f32.mrf.mxu3 }
 0xad2   : > { %4611 = vrcp.f32 %v3115_v16  ;;  %v2438_v16 = vpop.f32.mrf.mxu0 }
 0xad8   : > { %v4612_v34 = vpop.eup %4611 }
 0xad9   : > { %3139 = vperm.xlu1 %4555, %v4612_v34   ;;  %v3118_v5 = vpop.f32.mrf.mxu3 }
 0xada   : > { %4613 = vrcp.f32 %v3118_v5  ;;  %v6007_v5 = vpop.f32.mrf.mxu0 }
 0xae0   : > { %v4614_v0 = vpop.eup %4613 }
 0xae1   : > { %v3120_v22 = vpop.f32.mrf.mxu3  ;;  %3144 = vperm.xlu0 %4554, %v4614_v0  }
 0xae2   : > { %4615 = vrcp.f32 %v3120_v22 }
 0xae8   : > { %v4616_v60 = vpop.eup %4615 }
 0xae9   : > { %3149 = vperm.xlu2 %4556, %v4616_v60   ;;  %v3123_v3 = vpop.f32.mrf.mxu3 }
 0xaea   : > { %4617 = vrcp.f32 %v3123_v3  ;;  %v3435_v3 = vld [vmem:[%s4965_s19 + $0x10] sm:$0xff] }
 0xaeb   : > { %4619 = vrcp.f32 %v2416_v37 }
 0xaec   : > { %4621 = vrcp.f32 %v2423_v27  ;;  %v3434_v27 = vld [vmem:[%s4965_s19 + $0x8] sm:$0xff] }
 0xaed   : > { %4623 = vrcp.f32 %v2431_v14 }
 0xaee   : > { %4625 = vrcp.f32 %v2438_v16  ;;  %v3295_v16 = vperm.slane %v5976_v6, 1 }
 0xaf0   : > { %v4618_v63 = vpop.eup %4617 }
 0xaf1   : > { %3154 = vperm.xlu0 %4554, %v4618_v63   ;;  %v3125_v56 = vpop.f32.mrf.mxu3  ;;  %v4620_v34 = vpop.eup %4619  ;;  %v3436_v63 = vld [vmem:[%s4965_s19 + $0x18] sm:$0xff] }
 0xaf2   : > { %v3433_v56 = vld [vmem:[%s4965_s19] sm:$0xff]  ;;  %v3449_v37 = vpack.c.bf16 %v3436_v63, %v3435_v3  ;;  %s6433_s19 = scalar_lea.vmem %s4863_s29, %s4950_s23  ;;  %s6436_s23 = sld [smem:[#allocation19_spill]] (!%p4433_p2) }
 0xaf3   : > { %v3448_v14 = vpack.c.bf16 %v3434_v27, %v3433_v56 }
 0xb2b   : > { %v3135_v41 = vpop.permute.xlu2 %3134 }
 0xb2c   : > { %v3157_v49 = vmul.f32 %v3135_v41, %v5932_v48 }
 0xb43   : > { %v3150_v48 = vpop.permute.xlu2 %3149 }
 0xb44   : > { %v3160_v42 = vmul.f32 %v3150_v48, %v5922_v18 }
 0xb47   : > { %v3202_v47 = vpop.f32.mrf.mxu1 }
 0xb4b   : > { %v3140_v1 = vpop.permute.xlu1 %3139  ;;  %v3179_v51 = vpop.f32.mrf.mxu3 }
 0xb4c   : > { %v3158_v26 = vmul.f32 %v3140_v1, %v5934_v11  ;;  %v3182_v17 = vmul.f32 %v3179_v51, %v5776_v44  ;;  %v3205_v11 = vmul.f32 %v3202_v47, %v5776_v44 }
 0xb4e   : > { %v3445_v58 = vpack.c.bf16 %v3158_v26, %v3157_v49  ;;  %v3206_v33 = vmul.f32 %v3182_v17, %v3182_v17  ;;  %4414 = vmatpush.msk.msrb.mxu2 %vm2616_vm13, %v3182_v17 }
 0xb4f   : > { %4415 = vmatmul.msk.f32.vlgmr.msrb.gmra.mxu2 %vm2609_vm14, %v5785_v52 }
 0xb50   : > { %v3208_v13 = vmul.f32 %v5983_v29, %v3206_v33  ;;  %3454 = vrot.lane.b32.xlu1 %v3445_v58, %s4736_s22  ;;  %3475 = vmatpush.bf16.msra.mxu2 %v3449_v37 }
 0xb52   : > { %v3211_v10 = vmul.f32 %v3210_v9, %v3208_v13 }
 0xb53   : > { %v3145_v15 = vpop.permute.xlu0 %3144 }
 0xb54   : > { %v3212_v8 = vsub.f32 %v3205_v11, %v3211_v10  ;;  %v3159_v28 = vmul.f32 %v3145_v15, %v5924_v61  ;;  %3476 = vmatpush.bf16.msra.mxu2 %v3448_v14 }
 0xb56   : > { %v3213_v7 = vmax.f32 %v3212_v8, 0.0  ;;  %v3446_v59 = vpack.c.bf16 %v3160_v42, %v3159_v28 }
 0xb57   : > { %4416 = vmatmul.msk.f32.gmra.mxu2 %vm2609_vm14, %v5796_v4 }
 0xb58   : > { %4417 = vmatpush.msk.msra.mxu0 %vm2616_vm13, %v3213_v7  ;;  %3456 = vrot.lane.b32.xlu2 %v3446_v59, %s4736_s22  ;;  %v3292_v7 = vperm.slane %v5976_v6, 0 }
 0xb59   : > { %4418 = vmatmul.msk.f32.vlgmr.msra.gmra.mxu0 %vm2609_vm14, %v5785_v52  ;;  %v4622_v52 = vpop.eup %4621 }
 0xb61   : > { %4419 = vmatmul.msk.f32.gmra.mxu0 %vm2609_vm14, %v5796_v4  ;;  %v6009_v4 = vpop.f32.mrf.mxu0 }
 0xb63   : > { %v3155_v18 = vpop.permute.xlu0 %3154 }
 0xb64   : > { %v3161_v61 = vmul.f32 %v3155_v18, %v5914_v35  ;;  %v4624_v35 = vpop.eup %4623 }
 0xb65   : > { %v4626_v22 = vpop.eup %4625 }
 0xb66   : > { %v3447_v50 = vpack.c.bf16 %v3161_v61, %v3161_v61 }
 0xb68   : > { %3458 = vrot.lane.b32.xlu1 %v3447_v50, %s4736_s22 }
 0xb69   : > { %v2446_v0 = vpop.f32.mrf.mxu0 }
 0xb6a   : > { %4627 = vrcp.f32 %v2446_v0 }
 0xb70   : > { %2467 = vperm.xlu1 %4555, %v4620_v34   ;;  %v4628_v60 = vpop.eup %4627 }
 0xb71   : > { %v6016_v43 = vpop.f32.mrf.mxu0 }
 0xb78   : > { %2482 = vperm.xlu1 %4555, %v4622_v52  }
 0xb80   : > { %2497 = vperm.xlu1 %4555, %v4624_v35  }
 0xb88   : > { %2512 = vperm.xlu1 %4555, %v4626_v22  }
 0xb90   : > { %2527 = vperm.xlu1 %4555, %v4628_v60  }
 0xbb2   : > { %v3457_v1 = vpop.permute.xlu2 %3456 }
 0xbc2   : > { %v3455_v41 = vpop.permute.xlu1 %3454 }
 0xbc3   : > { %4424 = vmatmul.msk.bf16.vlgmr.msra.gmra.mxu2 %vm1688_vm9, %v3455_v41 }
 0xbd2   : > { %v3234_v33 = vpop.f32.mrf.mxu2 }
 0xbd3   : > { %4425 = vmatmul.msk.bf16.gmra.mxu2 %vm1688_vm9, %v3457_v1  ;;  %v3240_v11 = vmul.f32 %v3234_v33, %v5983_v29 }
 0xbd5   : > { %v3242_v28 = vsub.f32 %v5956_v38, %v3240_v11 }
 0xbd6   : > { %v3264_v51 = vpop.f32.mrf.mxu0 }
 0xbd7   : > { %v3265_v49 = vadd.f32 1e-05, %v3264_v51  ;;  %v3440_v51 = vld [vmem:[%s4968_s16 + $0x18] sm:$0xff] }
 0xbd9   : > { %4629 = vrsqrt.f32 %v3265_v49  ;;  %vm3276_vm4 = vweird.f32 %v3265_v49 }
 0xbda   : > { %v3459_v13 = vpop.permute.xlu1 %3458  ;;  %v3237_v18 = vpop.f32.mrf.mxu2 }
 0xbdb   : > { %v3241_v52 = vmul.f32 %v3237_v18, %v5983_v29 }
 0xbdd   : > { %v3243_v38 = vsub.f32 %v5951_v31, %v3241_v52 }
 0xbde   : > { %v3267_v26 = vpop.f32.mrf.mxu0 }
 0xbdf   : > { %v4630_v17 = vpop.eup %4629  ;;  %v3268_v58 = vadd.f32 1e-05, %v3267_v26  ;;  %v3437_v26 = vld [vmem:[%s4968_s16] sm:$0xff] }
 0xbe0   : > { %v3271_v9 = vmul.f32 %v4630_v17, %v3265_v49  ;;  %vm3277_vm3 = vweird.f32 %v4630_v17 }
 0xbe1   : > { %4631 = vrsqrt.f32 %v3268_v58  ;;  %vm3278_vm6 = vmor %vm3276_vm4, %vm3277_vm3  ;;  %vm3286_vm11 = vweird.f32 %v3268_v58 }
 0xbe2   : > { %v3272_v47 = vmul.f32 %v4630_v17, %v3271_v9  ;;  %4633 = vrcp.f32 %v5967_v40 }
 0xbe3   : > { %4426 = vmatmul.msk.bf16.gmra.mxu2 %vm1688_vm9, %v3459_v13  ;;  %4635 = vrcp.f32 %v5965_v12  ;;  %v2468_v12 = vpop.permute.xlu1 %2467 }
 0xbe4   : > { %v3273_v48 = vmul.f32 0.5, %v3272_v47  ;;  %4637 = vrcp.f32 %v5971_v23  ;;  %v6037_v23 = vmul.f32 %v2468_v12, %v5717_v62 }
 0xbe5   : > { %4639 = vrcp.f32 %v5969_v53 }
 0xbe6   : > { %v3274_v10 = vsub.f32 1.5, %v3273_v48  ;;  %4641 = vrcp.f32 %v6001_v2 }
 0xbe7   : > { %v4632_v15 = vpop.eup %4631  ;;  %4643 = vrcp.f32 %v5991_v21 }
 0xbe8   : > { %v3275_v42 = vmul.f32 %v4630_v17, %v3274_v10  ;;  %v3281_v8 = vmul.f32 %v4632_v15, %v3268_v58  ;;  %vm3287_vm7 = vweird.f32 %v4632_v15  ;;  %v4634_v37 = vpop.eup %4633  ;;  %4645 = vrcp.f32 %v6009_v4 }
 0xbe9   : > { %vm3288_vm12 = vmor %vm3286_vm11, %vm3287_vm7  ;;  %v4636_v29 = vpop.eup %4635  ;;  %4647 = vrcp.f32 %v6007_v5 }
 0xbea   : > { %v3279_v59 = vsel %vm3278_vm6, %v4630_v17, %v3275_v42  ;;  %v3282_v61 = vmul.f32 %v4632_v15, %v3281_v8  ;;  %v4638_v27 = vpop.eup %4637  ;;  %4649 = vrcp.f32 %v6016_v43  ;;  %v3438_v17 = vld [vmem:[%s4968_s16 + $0x8] sm:$0xff] }
 0xbeb   : > { %v3290_v50 = vmul.f32 %v3279_v59, %v3242_v28  ;;  %v4640_v31 = vpop.eup %4639  ;;  %v2483_v53 = vpop.permute.xlu1 %2482  ;;  %v3500_v58 = vpack.c.bf16 %v3438_v17, %v3437_v26 }
 0xbec   : > { %v3283_v34 = vmul.f32 0.5, %v3282_v61  ;;  %v4642_v40 = vpop.eup %4641  ;;  %v6043_v21 = vmul.f32 %v2483_v53, %v5708_v19  ;;  %v3439_v19 = vld [vmem:[%s4968_s16 + $0x10] sm:$0xff]  ;;  %s6435_s16 = sld [smem:[#allocation31_spill]] (!%p4433_p2) }
 0xbed   : > { %v3293_v35 = vmul.f32 %v3292_v7, %v3290_v50  ;;  %v4644_v14 = vpop.eup %4643  ;;  %v3501_v49 = vpack.c.bf16 %v3440_v51, %v3439_v19 }
 0xbee   : > { %v3284_v0 = vsub.f32 1.5, %v3283_v34  ;;  %v4646_v41 = vpop.eup %4645 }
 0xbef   : > { %v3296_v22 = vadd.f32 %v3295_v16, %v3293_v35  ;;  %v4648_v2 = vpop.eup %4647  ;;  %3518 = vmatpush.bf16.msrb.mxu0 %v3501_v49 }
 0xbf0   : > { %v3285_v60 = vmul.f32 %v4632_v15, %v3284_v0  ;;  %v4650_v4 = vpop.eup %4649 }
 0xbf1   : > { %3302 = vrot.lane.b32.xlu2 %v3296_v22, %s4737_s25 }
 0xbf2   : > { %v3289_v3 = vsel %vm3288_vm12, %v4632_v15, %v3285_v60 }
 0xbf3   : > { %v3291_v63 = vmul.f32 %v3289_v3, %v3243_v38  ;;  %v2498_v5 = vpop.permute.xlu1 %2497  ;;  %3519 = vmatpush.bf16.msrb.mxu0 %v3500_v58 }
 0xbf4   : > { %v6048_v62 = vmul.f32 %v2498_v5, %v5698_v45 }
 0xbf5   : > { %v3294_v56 = vmul.f32 %v3292_v7, %v3291_v63 }
 0xbf7   : > { %v3297_v6 = vadd.f32 %v3295_v16, %v3294_v56 }
 0xbf9   : > { %3304 = vrot.lane.b32.xlu0 %v3297_v6, %s4737_s25  ;;  %2477 = vperm.xlu2 %4556, %v4634_v37  }
 0xbfb   : > { %v2513_v1 = vpop.permute.xlu1 %2512 }
 0xbfc   : > { %v6053_v43 = vmul.f32 %v2513_v1, %v5663_v46  ;;  %v6069_v46 = vld [vmem:[%s6433_s19] sm:$0x7] }
 0xbfd   : > { %v3450_v47 = vperm.slane %v6069_v46, 0 }
 0xc01   : > { %2472 = vperm.xlu0 %4554, %v4636_v29   ;;  %2492 = vperm.xlu2 %4556, %v4638_v27  }
 0xc03   : > { %v2528_v45 = vpop.permute.xlu1 %2527 }
 0xc04   : > { %v6062_v33 = vmul.f32 %v2528_v45, %v5626_v20 }
 0xc09   : > { %2487 = vperm.xlu0 %4554, %v4640_v31   ;;  %2507 = vperm.xlu2 %4556, %v4642_v40   ;;  %v4653_v31 = vld [vmem:[#allocation7] sm:$0x3] }
 0xc11   : > { %2502 = vperm.xlu0 %4554, %v4644_v14   ;;  %2522 = vperm.xlu2 %4556, %v4646_v41  }
 0xc19   : > { %2517 = vperm.xlu0 %4554, %v4648_v2   ;;  %3376 = vrot.lane.b32.xlu2 %v6037_v23, %s4736_s22 }
 0xc21   : > { %2532 = vperm.xlu0 %4554, %v4650_v4   ;;  %3382 = vrot.lane.b32.xlu2 %v6043_v21, %s4736_s22 }
 0xc29   : > { %3388 = vrot.lane.b32.xlu2 %v6048_v62, %s4736_s22 }
 0xc31   : > { %3394 = vrot.lane.b32.xlu2 %v6053_v43, %s4736_s22 }
 0xc39   : > { %3400 = vrot.lane.b32.xlu2 %v6062_v33, %s4736_s22 }
 0xc46   : > { %v3478_v9 = vpop.f32.mrf.mxu2 }
 0xc47   : > { %v3479_v48 = vadd.f32 %v3478_v9, %v3450_v47 }
 0xc49   : > { %v3492_v15 = vmax.f32 %v3479_v48, 0.0  ;;  %v3444_v48 = vld [vmem:[%s4971_s30 + $0x18] sm:$0xff] }
 0xc4b   : > { %v3303_v13 = vpop.permute.xlu2 %3302 }
 0xc4c   : > { %3309 = vst.msk [vmem:[#allocation2] sm:$0xff] %vm3308_vm15, %v3303_v13  ;;  %v3443_v13 = vld [vmem:[%s4971_s30 + $0x10] sm:$0xff] }
 0xc4e   : > { %v3480_v11 = vpop.f32.mrf.mxu2 }
 0xc4f   : > { %v3481_v10 = vadd.f32 %v3480_v11, %v3450_v47 }
 0xc51   : > { %v3493_v42 = vmax.f32 %v3481_v10, 0.0 }
 0xc53   : > { %v3497_v20 = vpack.c.bf16 %v3493_v42, %v3492_v15  ;;  %v2478_v8 = vpop.permute.xlu2 %2477  ;;  %v3544_v15 = vpack.c.bf16 %v3444_v48, %v3443_v13  ;;  %v3441_v42 = vld [vmem:[%s4971_s30] sm:$0xff] }
 0xc54   : > { %v6074_v28 = vmul.f32 %v2478_v8, %v5710_v24 }
 0xc55   : > { %4427 = vmatmul.msk.bf16.vlgmr.msrb.gmra.mxu0 %vm1688_vm9, %v3497_v20  ;;  %v3442_v20 = vld [vmem:[%s4971_s30 + $0x8] sm:$0xff]  ;;  %s6434_s30 = sld [smem:[#allocation20_spill]] }
 0xc56   : > { %v3483_v7 = vpop.f32.mrf.mxu2  ;;  %3380 = vrot.lane.b32.xlu0 %v6074_v28, %s4736_s22 }
 0xc57   : > { %v3484_v61 = vadd.f32 %v3483_v7, %v3450_v47  ;;  %v4654_v7 = vld [vmem:[#allocation6] sm:$0xff] }
 0xc59   : > { %v3494_v34 = vmax.f32 %v3484_v61, 0.0 }
 0xc5b   : > { %v2493_v59 = vpop.permute.xlu2 %2492 }
 0xc5c   : > { %v6080_v18 = vmul.f32 %v2493_v59, %v5682_v30  ;;  %v3543_v59 = vpack.c.bf16 %v3442_v20, %v3441_v42 }
 0xc5e   : > { %v3485_v50 = vpop.f32.mrf.mxu2  ;;  %3386 = vrot.lane.b32.xlu0 %v6080_v18, %s4736_s22 }
 0xc5f   : > { %v3486_v16 = vadd.f32 %v3485_v50, %v3450_v47  ;;  %v3502_v50 = vperm.slane %v6069_v46, 1 }
 0xc61   : > { %v3495_v52 = vmax.f32 %v3486_v16, 0.0 }
 0xc63   : > { %v3498_v24 = vpack.c.bf16 %v3495_v52, %v3494_v34  ;;  %v2508_v35 = vpop.permute.xlu2 %2507  ;;  %v4655_v52 = vld [vmem:[#allocation6 + $0x8] sm:$0xff] }
 0xc64   : > { %v6085_v0 = vmul.f32 %v2508_v35, %v5657_v25 }
 0xc65   : > { %4428 = vmatmul.msk.bf16.gmra.mxu0 %vm1688_vm9, %v3498_v24 }
 0xc66   : > { %3392 = vrot.lane.b32.xlu0 %v6085_v0, %s4736_s22  ;;  %v3488_v30 = vpop.f32.mrf.mxu2 }
 0xc67   : > { %v3489_v22 = vadd.f32 %v3488_v30, %v3450_v47 }
 0xc69   : > { %v3496_v25 = vmax.f32 %v3489_v22, 0.0 }
 0xc6b   : > { %v2523_v60 = vpop.permute.xlu2 %2522  ;;  %v3305_v38 = vpop.permute.xlu0 %3304  ;;  %v3499_v56 = vpack.c.bf16 %v3496_v25, %v3496_v25 }
 0xc6c   : > { %v6091_v3 = vmul.f32 %v2523_v60, %v5649_v36  ;;  %3310 = vst.msk [vmem:[#allocation2 + $0x8] sm:$0xff] %vm3308_vm15, %v3305_v38  ;;  %v3311_v36 = vld [vmem:[#allocation2] sm:$0xff] }
 0xc6e   : > { %3398 = vrot.lane.b32.xlu0 %v6091_v3, %s4736_s22  ;;  %v3490_v63 = vpop.f32.mrf.mxu2 }
 0xc73   : > { %v3377_v6 = vpop.permute.xlu2 %3376  ;;  %v2473_v37 = vpop.permute.xlu0 %2472  ;;  %v3312_v29 = vld [vmem:[#allocation2 + $0x8] sm:$0xff] }
 0xc74   : > { %3418 = vst.msk [vmem:[#allocation4] sm:$0xff] %vm1688_vm9, %v3377_v6  ;;  %v6098_v27 = vmul.f32 %v2473_v37, %v5719_v32  ;;  %3327 = vmatpush.msra.mxu1 %v3312_v29 }
 0xc75   : > { %4429 = vmatmul.msk.bf16.gmra.mxu0 %vm1688_vm9, %v3499_v56 }
 0xc76   : > { %3378 = vrot.lane.b32.xlu1 %v6098_v27, %s4736_s22  ;;  %3328 = vmatpush.msra.mxu1 %v3311_v36 }
 0xc77   : > { %4420 = vmatmul.msk.f32.vlgmr.msra.gmra.mxu1 %vm1794_vm10, %v4653_v31 }
 0xc7b   : > { %v3383_v40 = vpop.permute.xlu2 %3382  ;;  %v2488_v12 = vpop.permute.xlu0 %2487 }
 0xc7c   : > { %3421 = vst.msk [vmem:[#allocation4 + $0x18] sm:$0xff] %vm1688_vm9, %v3383_v40  ;;  %v6106_v14 = vmul.f32 %v2488_v12, %v5685_v57  ;;  %v3545_v40 = vperm.slane %v6069_v46, 2 }
 0xc7e   : > { %3384 = vrot.lane.b32.xlu1 %v6106_v14, %s4736_s22 }
 0xc83   : > { %v3389_v32 = vpop.permute.xlu2 %3388  ;;  %v2503_v41 = vpop.permute.xlu0 %2502 }
 0xc84   : > { %3424 = vst.msk [vmem:[#allocation4 + $0x30] sm:$0xff] %vm1688_vm9, %v3389_v32  ;;  %v6112_v53 = vmul.f32 %v2503_v41, %v5700_v54  ;;  %v3578_v32 = vld [vmem:[%s6434_s30] sm:$0xff] }
 0xc86   : > { %3390 = vrot.lane.b32.xlu1 %v6112_v53, %s4736_s22 }
 0xc8b   : > { %v3395_v2 = vpop.permute.xlu2 %3394  ;;  %v2518_v4 = vpop.permute.xlu0 %2517 }
 0xc8c   : > { %3427 = vst.msk [vmem:[#allocation4 + $0x48] sm:$0xff] %vm1688_vm9, %v3395_v2  ;;  %v6118_v57 = vmul.f32 %v2518_v4, %v5645_v39 }
 0xc8e   : > { %3396 = vrot.lane.b32.xlu1 %v6118_v57, %s4736_s22 }
 0xc93   : > { %v3401_v5 = vpop.permute.xlu2 %3400  ;;  %v2533_v1 = vpop.permute.xlu0 %2532 }
 0xc94   : > { %3430 = vst.msk [vmem:[#allocation4 + $0x60] sm:$0xff] %vm1688_vm9, %v3401_v5  ;;  %v6124_v54 = vmul.f32 %v2533_v1, %v5622_v55  ;;  %v3579_v5 = vld [vmem:[%s6434_s30 + $0x8] sm:$0xff] }
 0xc96   : > { %3402 = vrot.lane.b32.xlu1 %v6124_v54, %s4736_s22 }
 0xcc8   : > { %v3381_v19 = vpop.permute.xlu0 %3380 }
 0xcc9   : > { %3420 = vst.msk [vmem:[#allocation4 + $0x10] sm:$0xff] %vm1688_vm9, %v3381_v19 }
 0xcd0   : > { %v3387_v51 = vpop.permute.xlu0 %3386 }
 0xcd1   : > { %3423 = vst.msk [vmem:[#allocation4 + $0x28] sm:$0xff] %vm1688_vm9, %v3387_v51 }
 0xcd2   : > { %v3521_v39 = vpop.f32.mrf.mxu0 }
 0xcd3   : > { %v3522_v34 = vadd.f32 %v3521_v39, %v3502_v50  ;;  %v3580_v39 = vld [vmem:[%s6434_s30 + $0x10] sm:$0xff] }
 0xcd5   : > { %v3535_v35 = vmax.f32 %v3522_v34, 0.0 }
 0xcd8   : > { %v3393_v49 = vpop.permute.xlu0 %3392 }
 0xcd9   : > { %3426 = vst.msk [vmem:[#allocation4 + $0x40] sm:$0xff] %vm1688_vm9, %v3393_v49 }
 0xcda   : > { %v3523_v26 = vpop.f32.mrf.mxu0 }
 0xcdb   : > { %v3524_v16 = vadd.f32 %v3523_v26, %v3502_v50 }
 0xcdd   : > { %v3536_v24 = vmax.f32 %v3524_v16, 0.0 }
 0xcdf   : > { %v3540_v30 = vpack.c.bf16 %v3536_v24, %v3535_v35 }
 0xce0   : > { %v3399_v55 = vpop.permute.xlu0 %3398 }
 0xce1   : > { %3429 = vst.msk [vmem:[#allocation4 + $0x58] sm:$0xff] %vm1688_vm9, %v3399_v55  ;;  %v3581_v55 = vld [vmem:[%s6434_s30 + $0x18] sm:$0xff] }
 0xce2   : > { %v3526_v17 = vpop.f32.mrf.mxu0 }
 0xce3   : > { %v3527_v38 = vadd.f32 %v3526_v17, %v3502_v50 }
 0xce5   : > { %v3537_v25 = vmax.f32 %v3527_v38, 0.0 }
 0xce8   : > { %v3379_v45 = vpop.permute.xlu1 %3378 }
 0xce9   : > { %3419 = vst.msk [vmem:[#allocation4 + $0x8] sm:$0xff] %vm1688_vm9, %v3379_v45 }
 0xcea   : > { %v3528_v58 = vpop.f32.mrf.mxu0 }
 0xceb   : > { %v3529_v60 = vadd.f32 %v3528_v58, %v3502_v50 }
 0xced   : > { %v3538_v63 = vmax.f32 %v3529_v60, 0.0 }
 0xcef   : > { %v3541_v56 = vpack.c.bf16 %v3538_v63, %v3537_v25 }
 0xcf0   : > { %v3385_v9 = vpop.permute.xlu1 %3384 }
 0xcf1   : > { %3422 = vst.msk [vmem:[#allocation4 + $0x20] sm:$0xff] %vm1688_vm9, %v3385_v9  ;;  %v3582_v9 = vld [vmem:[%s6434_s30 + $0x20] sm:$0x3f] }
 0xcf2   : > { %v3531_v47 = vpop.f32.mrf.mxu0 }
 0xcf3   : > { %v3532_v6 = vadd.f32 %v3531_v47, %v3502_v50 }
 0xcf4   : > { %v3330_v11 = vpop.f32.mrf.mxu1 }
 0xcf5   : > { %v3333_v10 = vmul.f32 %v3330_v11, %v5776_v44  ;;  %v3539_v37 = vmax.f32 %v3532_v6, 0.0 }
 0xcf7   : > { %4421 = vmatpush.msk.msrb.mxu1 %vm2616_vm13, %v3333_v10  ;;  %v3542_v29 = vpack.c.bf16 %v3539_v37, %v3539_v37 }
 0xcf8   : > { %v3391_v8 = vpop.permute.xlu1 %3390  ;;  %4422 = vmatmul.msk.f32.vlgmr.msrb.gmra.mxu1 %vm2609_vm14, %v4654_v7 }
 0xcf9   : > { %3425 = vst.msk [vmem:[#allocation4 + $0x38] sm:$0xff] %vm1688_vm9, %v3391_v8  ;;  %3561 = vmatpush.bf16.msra.mxu1 %v3544_v15 }
 0xcfa   : > { %v3533_v61 = vpop.f32.mrf.mxu0 }
 0xcfd   : > { %3562 = vmatpush.bf16.msra.mxu1 %v3543_v59 }
 0xd00   : > { %v3397_v44 = vpop.permute.xlu1 %3396  ;;  %4423 = vmatmul.msk.f32.gmra.mxu1 %vm2609_vm14, %v4655_v52 }
 0xd01   : > { %3428 = vst.msk [vmem:[#allocation4 + $0x50] sm:$0xff] %vm1688_vm9, %v3397_v44 }
 0xd08   : > { %v3403_v22 = vpop.permute.xlu1 %3402  ;;  %4430 = vmatmul.msk.bf16.vlgmr.msra.gmra.mxu1 %vm1688_vm9, %v3540_v30 }
 0xd09   : > { %3431 = vst.msk [vmem:[#allocation4 + $0x68] sm:$0xff] %vm1688_vm9, %v3403_v22 }
 0xd18   : > { %4431 = vmatmul.msk.bf16.gmra.mxu1 %vm1688_vm9, %v3541_v56 }
 0xd28   : > { %4432 = vmatmul.msk.bf16.gmra.mxu1 %vm1688_vm9, %v3542_v29 }
 0xd75   : > { %v3354_v36 = vpop.f32.mrf.mxu1 }
 0xd76   : > { %3360 = vst.msk [vmem:[#allocation3] sm:$0xff] %vm1661_vm8, %v3354_v36 }
 0xd7d   : > { %v3357_v31 = vpop.f32.mrf.mxu1 }
 0xd7e   : > { %3361 = vst.msk [vmem:[#allocation3 + $0x8] sm:$0xff] %vm1661_vm8, %v3357_v31 }
 0xd85   : > { %v3564_v12 = vpop.f32.mrf.mxu1 }
 0xd86   : > { %v3565_v41 = vadd.f32 %v3564_v12, %v3545_v40 }
 0xd88   : > { %v3583_v2 = vadd.f32 %v3578_v32, %v3565_v41 }
 0xd8a   : > { %3588 = vst.msk [vmem:[#allocation5] sm:$0xff] %vm1688_vm9, %v3583_v2 }
 0xd8d   : > { %v3566_v4 = vpop.f32.mrf.mxu1 }
 0xd8e   : > { %v3567_v1 = vadd.f32 %v3566_v4, %v3545_v40 }
 0xd90   : > { %v3584_v19 = vadd.f32 %v3579_v5, %v3567_v1 }
 0xd92   : > { %3589 = vst.msk [vmem:[#allocation5 + $0x8] sm:$0xff] %vm1688_vm9, %v3584_v19 }
 0xd95   : > { %v3569_v51 = vpop.f32.mrf.mxu1 }
 0xd96   : > { %v3570_v49 = vadd.f32 %v3569_v51, %v3545_v40 }
 0xd98   : > { %v3585_v26 = vadd.f32 %v3580_v39, %v3570_v49 }
 0xd9a   : > { %3590 = vst.msk [vmem:[#allocation5 + $0x10] sm:$0xff] %vm1688_vm9, %v3585_v26 }
 0xd9d   : > { %v3571_v46 = vpop.f32.mrf.mxu1 }
 0xd9e   : > { %v3572_v17 = vadd.f32 %v3571_v46, %v3545_v40 }
 0xda0   : > { %v3586_v45 = vadd.f32 %v3581_v55, %v3572_v17 }
 0xda2   : > { %3591 = vst.msk [vmem:[#allocation5 + $0x18] sm:$0xff] %vm1688_vm9, %v3586_v45 }
 0xda5   : > { %v3574_v58 = vpop.f32.mrf.mxu1 }
 0xda6   : > { %v3575_v47 = vadd.f32 %v3574_v58, %v3545_v40 }
 0xda8   : > { %v3587_v13 = vadd.f32 %v3582_v9, %v3575_v47 }
 0xda9   : > { %3596 = sbr.rel (%p4433_p2) target bundleno = 4146 (0x1032), region = 152 }
 0xdaa   : > { %3592 = vst.msk [vmem:[#allocation5 + $0x20] sm:$0x3f] %vm2936_vm5, %v3587_v13 }
 0xdad   : > { %v3576_v48 = vpop.f32.mrf.mxu1 }
 0xdae   : > { %v3605_v11 = vpack.c.bf16 %v6098_v27, %v6037_v23  ;;  %v3607_v10 = vpack.c.bf16 %v6080_v18, %v6106_v14  ;;  %v3603_v15 = vld [vmem:[%s6435_s16 + $0x30] sm:$0xff]  ;;  %v3604_v42 = vld [vmem:[%s6435_s16 + $0x38] sm:$0xff]  ;;  %v3601_v20 = vld [vmem:[%s6435_s16 + $0x20] sm:$0xff]  ;;  %v3609_v8 = vpack.c.bf16 %v6053_v43, %v6085_v0  ;;  %v3606_v43 = vpack.c.bf16 %v6043_v21, %v6074_v28 }
 0xdaf   : > { %v3636_v7 = vpack.c.bf16 %v3604_v42, %v3603_v15  ;;  %v3602_v59 = vld [vmem:[%s6435_s16 + $0x28] sm:$0xff]  ;;  %v3599_v61 = vld [vmem:[%s6435_s16 + $0x10] sm:$0xff]  ;;  %v3600_v23 = vld [vmem:[%s6435_s16 + $0x18] sm:$0xff]  ;;  %v3608_v0 = vpack.c.bf16 %v6112_v53, %v6048_v62  ;;  %v3610_v52 = vpack.c.bf16 %v6091_v3, %v6118_v57  ;;  %v3611_v21 = vpack.c.bf16 %v6124_v54, %v6062_v33 }
 0xdb0   : > { %3709 = vrot.lane.b32.xlu0 %v3605_v11, %s4739_s18  ;;  %3713 = vrot.lane.b32.xlu1 %v3607_v10, %s4739_s18  ;;  %v3635_v18 = vpack.c.bf16 %v3602_v59, %v3601_v20  ;;  %v3613_v27 = vpack.c.bf16 %v3600_v23, %v3599_v61  ;;  %v3597_v14 = vld [vmem:[%s6435_s16] sm:$0xff]  ;;  %v3598_v50 = vld [vmem:[%s6435_s16 + $0x8] sm:$0xff]  ;;  %v3820_v51 = vld [vmem:[#allocation15] sm:$0xff]  ;;  %vm3998_vm8 = vcmask 7168  }
 0xdb1   : > { %3717 = vrot.lane.b32.xlu2 %v3609_v8, %s4739_s18  ;;  %3664 = vmatpush.bf16.msra.mxu0 %v3636_v7  ;;  %v3614_v16 = vld [vmem:[%s6436_s23] sm:$0xff]  ;;  %v3615_v34 = vld [vmem:[%s6436_s23 + $0x8] sm:$0xff]  ;;  %v3612_v44 = vpack.c.bf16 %v3598_v50, %v3597_v14  ;;  %v3616_v28 = vld [vmem:[%s6436_s23 + $0x10] sm:$0xff] }
 0xdb2   : > { %3750 = vmatpush.bf16.msra.mxu1 %v3613_v27  ;;  %v3628_v24 = vpack.c.bf16 %v3615_v34, %v3614_v16  ;;  %v3617_v62 = vld [vmem:[%s6436_s23 + $0x18] sm:$0xff]  ;;  %v3618_v3 = vld [vmem:[%s6436_s23 + $0x20] sm:$0xff]  ;;  %v3619_v57 = vld [vmem:[%s6436_s23 + $0x28] sm:$0xff] }
 0xdb3   : > { %v3629_v53 = vpack.c.bf16 %v3617_v62, %v3616_v28  ;;  %v3630_v35 = vpack.c.bf16 %v3619_v57, %v3618_v3  ;;  %v3620_v22 = vld [vmem:[%s6436_s23 + $0x30] sm:$0xff]  ;;  %v3621_v33 = vld [vmem:[%s6436_s23 + $0x38] sm:$0xff]  ;;  %v3622_v38 = vld [vmem:[%s6436_s23 + $0x40] sm:$0xff] }
 0xdb4   : > { %v3631_v54 = vpack.c.bf16 %v3621_v33, %v3620_v22  ;;  %v3623_v63 = vld [vmem:[%s6436_s23 + $0x48] sm:$0xff]  ;;  %v3624_v6 = vld [vmem:[%s6436_s23 + $0x50] sm:$0xff]  ;;  %v3625_v37 = vld [vmem:[%s6436_s23 + $0x58] sm:$0xff] }
 0xdb5   : > { %3665 = vmatpush.bf16.msra.mxu0 %v3635_v18  ;;  %v3632_v25 = vpack.c.bf16 %v3623_v63, %v3622_v38  ;;  %v3633_v29 = vpack.c.bf16 %v3625_v37, %v3624_v6  ;;  %v3626_v31 = vld [vmem:[%s6436_s23 + $0x60] sm:$0xff]  ;;  %v3627_v40 = vld [vmem:[%s6436_s23 + $0x68] sm:$0xff] }
 0xdb6   : > { %3751 = vmatpush.bf16.msra.mxu1 %v3612_v44  ;;  %v3634_v12 = vpack.c.bf16 %v3627_v40, %v3626_v31  ;;  %v3822_v5 = vld [vmem:[#allocation15 + $0x10] sm:$0xff]  ;;  %v3823_v1 = vld [vmem:[#allocation15 + $0x18] sm:$0xff]  ;;  %v3821_v39 = vld [vmem:[#allocation15 + $0x8] sm:$0xff] }
 0xdb7   : > { %v3832_v19 = vpack.c.bf16 %v3823_v1, %v3822_v5  ;;  %v3831_v49 = vpack.c.bf16 %v3821_v39, %v3820_v51  ;;  %v6214_v58 = vld [vmem:[%s6437_s28] ss:$0 sm:$0xff] }
 0xdb8   : > { %3711 = vrot.lane.b32.xlu0 %v3606_v43, %s4739_s18  ;;  %3715 = vrot.lane.b32.xlu1 %v3608_v0, %s4739_s18 }
 0xdb9   : > { %3719 = vrot.lane.b32.xlu2 %v3610_v52, %s4739_s18  ;;  %4434 = vmatmul.msk.bf16.vlgmr.msra.gmra.mxu0 %vm1688_vm9, %v3628_v24 }
 0xdba   : > { %3864 = vmatpush.bf16.msra.mxu2 %v3832_v19 }
 0xdbe   : > { %3865 = vmatpush.bf16.msra.mxu2 %v3831_v49 }
 0xdc0   : > { %3721 = vrot.lane.b32.xlu0 %v3611_v21, %s4739_s18 }
 0xdc9   : > { %4435 = vmatmul.msk.bf16.gmra.mxu0 %vm1688_vm9, %v3629_v53 }
 0xdd9   : > { %4436 = vmatmul.msk.bf16.gmra.mxu0 %vm1688_vm9, %v3630_v35 }
 0xde9   : > { %4437 = vmatmul.msk.bf16.gmra.mxu0 %vm1688_vm9, %v3631_v54 }
 0xdf9   : > { %4438 = vmatmul.msk.bf16.gmra.mxu0 %vm1688_vm9, %v3632_v25 }
 0xe09   : > { %4439 = vmatmul.msk.bf16.gmra.mxu0 %vm1688_vm9, %v3633_v29 }
 0xe0b   : > { %v3718_v32 = vpop.permute.xlu2 %3717 }
 0xe13   : > { %v3720_v41 = vpop.permute.xlu2 %3719 }
 0xe19   : > { %4440 = vmatmul.msk.bf16.gmra.mxu0 %vm1688_vm9, %v3634_v12 }
 0xe22   : > { %v3710_v30 = vpop.permute.xlu0 %3709  ;;  %v3714_v56 = vpop.permute.xlu1 %3713 }
 0xe23   : > { %4441 = vmatmul.msk.bf16.vlgmr.msra.gmra.mxu1 %vm1688_vm9, %v3710_v30 }
 0xe2a   : > { %v3712_v60 = vpop.permute.xlu0 %3711  ;;  %v3716_v36 = vpop.permute.xlu1 %3715 }
 0xe32   : > { %v3722_v2 = vpop.permute.xlu0 %3721 }
 0xe33   : > { %4442 = vmatmul.msk.bf16.gmra.mxu1 %vm1688_vm9, %v3712_v60 }
 0xe36   : > { %v3667_v4 = vpop.f32.mrf.mxu0 }
 0xe3e   : > { %v3669_v26 = vpop.f32.mrf.mxu0 }
 0xe43   : > { %4443 = vmatmul.msk.bf16.gmra.mxu1 %vm1688_vm9, %v3714_v56 }
 0xe46   : > { %v3672_v46 = vpop.f32.mrf.mxu0 }
 0xe4e   : > { %v3674_v17 = vpop.f32.mrf.mxu0 }
 0xe53   : > { %4444 = vmatmul.msk.bf16.gmra.mxu1 %vm1688_vm9, %v3716_v36 }
 0xe56   : > { %v3677_v15 = vpop.f32.mrf.mxu0 }
 0xe5e   : > { %v3679_v59 = vpop.f32.mrf.mxu0 }
 0xe63   : > { %4445 = vmatmul.msk.bf16.gmra.mxu1 %vm1688_vm9, %v3718_v32 }
 0xe66   : > { %v3682_v34 = vpop.f32.mrf.mxu0 }
 0xe6e   : > { %v3684_v21 = vpop.f32.mrf.mxu0 }
 0xe73   : > { %4446 = vmatmul.msk.bf16.gmra.mxu1 %vm1688_vm9, %v3720_v41 }
 0xe76   : > { %v3687_v35 = vpop.f32.mrf.mxu0 }
 0xe7e   : > { %v3689_v25 = vpop.f32.mrf.mxu0 }
 0xe83   : > { %4447 = vmatmul.msk.bf16.gmra.mxu1 %vm1688_vm9, %v3722_v2 }
 0xe86   : > { %v3692_v31 = vpop.f32.mrf.mxu0 }
 0xea0   : > { %v3753_v55 = vpop.f32.mrf.mxu1 }
 0xea1   : > { %v3754_v45 = vadd.f32 %v3753_v55, %v3667_v4  ;;  %v3694_v4 = vpop.f32.mrf.mxu0 }
 0xea3   : > { %v3792_v47 = vadd.f32 %v6214_v58, %v3754_v45 }
 0xea5   : > { %v3806_v11 = vmax.f32 %v3792_v47, 0.0 }
 0xea8   : > { %v3755_v9 = vpop.f32.mrf.mxu1 }
 0xea9   : > { %v3756_v13 = vadd.f32 %v3755_v9, %v3669_v26 }
 0xeab   : > { %v3793_v48 = vadd.f32 %v6214_v58, %v3756_v13 }
 0xead   : > { %v3807_v10 = vmax.f32 %v3793_v48, 0.0 }
 0xeaf   : > { %v3824_v42 = vpack.c.bf16 %v3807_v10, %v3806_v11 }
 0xeb0   : > { %v3758_v20 = vpop.f32.mrf.mxu1 }
 0xeb1   : > { %4448 = vmatmul.msk.bf16.vlgmr.msra.gmra.mxu2 %vm1688_vm9, %v3824_v42  ;;  %v3759_v8 = vadd.f32 %v3758_v20, %v3672_v46  ;;  %v3697_v46 = vpop.f32.mrf.mxu0  ;;  %v3918_v20 = vld [vmem:[%s4888_s8 + $0x10] sm:$0xff] }
 0xeb3   : > { %v3794_v61 = vadd.f32 %v6214_v58, %v3759_v8  ;;  %v3919_v8 = vld [vmem:[%s4888_s8 + $0x18] sm:$0xff] }
 0xeb5   : > { %v3808_v27 = vmax.f32 %v3794_v61, 0.0  ;;  %v3917_v61 = vld [vmem:[%s4888_s8 + $0x8] sm:$0xff] }
 0xeb8   : > { %v3760_v7 = vpop.f32.mrf.mxu1 }
 0xeb9   : > { %v3761_v23 = vadd.f32 %v3760_v7, %v3674_v17  ;;  %v3699_v9 = vpop.f32.mrf.mxu0  ;;  %v3928_v7 = vpack.c.bf16 %v3919_v8, %v3918_v20 }
 0xebb   : > { %v3795_v18 = vadd.f32 %v6214_v58, %v3761_v23  ;;  %3960 = vmatpush.bf16.msra.mxu3 %v3928_v7 }
 0xebd   : > { %v3809_v14 = vmax.f32 %v3795_v18, 0.0 }
 0xebf   : > { %v3825_v50 = vpack.c.bf16 %v3809_v14, %v3808_v27  ;;  %v4657_v27 = vld [vmem:[%s4883_s21] ss:$0 sm:$0xff] }
 0xec0   : > { %v3763_v16 = vpop.f32.mrf.mxu1 }
 0xec1   : > { %4449 = vmatmul.msk.bf16.gmra.mxu2 %vm1688_vm9, %v3825_v50  ;;  %v3764_v44 = vadd.f32 %v3763_v16, %v3677_v15 }
 0xec3   : > { %v3796_v0 = vadd.f32 %v6214_v58, %v3764_v44 }
 0xec5   : > { %v3810_v28 = vmax.f32 %v3796_v0, 0.0 }
 0xec8   : > { %v3765_v43 = vpop.f32.mrf.mxu1 }
 0xec9   : > { %v3766_v52 = vadd.f32 %v3765_v43, %v3679_v59  ;;  %v3916_v59 = vld [vmem:[%s4888_s8] sm:$0xff] }
 0xeca   : > { %v3927_v23 = vpack.c.bf16 %v3917_v61, %v3916_v59 }
 0xecb   : > { %v3797_v24 = vadd.f32 %v6214_v58, %v3766_v52 }
 0xecc   : > { %3961 = vmatpush.bf16.msra.mxu3 %v3927_v23 }
 0xecd   : > { %v3811_v62 = vmax.f32 %v3797_v24, 0.0 }
 0xecf   : > { %v3826_v53 = vpack.c.bf16 %v3811_v62, %v3810_v28 }
 0xed0   : > { %v3768_v3 = vpop.f32.mrf.mxu1 }
 0xed1   : > { %4450 = vmatmul.msk.bf16.gmra.mxu2 %vm1688_vm9, %v3826_v53  ;;  %v3769_v57 = vadd.f32 %v3768_v3, %v3682_v34 }
 0xed3   : > { %v3798_v22 = vadd.f32 %v6214_v58, %v3769_v57 }
 0xed5   : > { %v3812_v60 = vmax.f32 %v3798_v22, 0.0 }
 0xed8   : > { %v3770_v30 = vpop.f32.mrf.mxu1 }
 0xed9   : > { %v3771_v33 = vadd.f32 %v3770_v30, %v3684_v21 }
 0xedb   : > { %v3799_v54 = vadd.f32 %v6214_v58, %v3771_v33 }
 0xedd   : > { %v3813_v38 = vmax.f32 %v3799_v54, 0.0 }
 0xedf   : > { %v3827_v63 = vpack.c.bf16 %v3813_v38, %v3812_v60 }
 0xee0   : > { %v3773_v56 = vpop.f32.mrf.mxu1 }
 0xee1   : > { %4451 = vmatmul.msk.bf16.gmra.mxu2 %vm1688_vm9, %v3827_v63  ;;  %v3774_v6 = vadd.f32 %v3773_v56, %v3687_v35 }
 0xee3   : > { %v3800_v29 = vadd.f32 %v6214_v58, %v3774_v6 }
 0xee5   : > { %v3814_v12 = vmax.f32 %v3800_v29, 0.0 }
 0xee8   : > { %v3775_v37 = vpop.f32.mrf.mxu1 }
 0xee9   : > { %v3776_v36 = vadd.f32 %v3775_v37, %v3689_v25 }
 0xeeb   : > { %v3801_v40 = vadd.f32 %v6214_v58, %v3776_v36 }
 0xeed   : > { %v3815_v32 = vmax.f32 %v3801_v40, 0.0 }
 0xeef   : > { %v3828_v41 = vpack.c.bf16 %v3815_v32, %v3814_v12 }
 0xef0   : > { %v3778_v2 = vpop.f32.mrf.mxu1 }
 0xef1   : > { %4452 = vmatmul.msk.bf16.gmra.mxu2 %vm1688_vm9, %v3828_v41  ;;  %v3779_v5 = vadd.f32 %v3778_v2, %v3692_v31 }
 0xef3   : > { %v3802_v19 = vadd.f32 %v6214_v58, %v3779_v5 }
 0xef5   : > { %v3816_v49 = vmax.f32 %v3802_v19, 0.0 }
 0xef8   : > { %v3780_v1 = vpop.f32.mrf.mxu1 }
 0xef9   : > { %v3781_v51 = vadd.f32 %v3780_v1, %v3694_v4 }
 0xefb   : > { %v3803_v39 = vadd.f32 %v6214_v58, %v3781_v51 }
 0xefd   : > { %v3817_v26 = vmax.f32 %v3803_v39, 0.0 }
 0xeff   : > { %v3829_v55 = vpack.c.bf16 %v3817_v26, %v3816_v49 }
 0xf00   : > { %v3783_v17 = vpop.f32.mrf.mxu1 }
 0xf01   : > { %4453 = vmatmul.msk.bf16.gmra.mxu2 %vm1688_vm9, %v3829_v55  ;;  %v3784_v45 = vadd.f32 %v3783_v17, %v3697_v46 }
 0xf03   : > { %v3804_v13 = vadd.f32 %v6214_v58, %v3784_v45 }
 0xf05   : > { %v3818_v10 = vmax.f32 %v3804_v13, 0.0 }
 0xf08   : > { %v3785_v47 = vpop.f32.mrf.mxu1 }
 0xf09   : > { %v3786_v48 = vadd.f32 %v3785_v47, %v3699_v9  ;;  %v4658_v9 = vld [vmem:[#allocation14] ss:$0 sm:$0xff] }
 0xf0b   : > { %v3805_v11 = vadd.f32 %v6214_v58, %v3786_v48 }
 0xf0d   : > { %v3819_v15 = vmax.f32 %v3805_v11, 0.0 }
 0xf0f   : > { %v3830_v42 = vpack.c.bf16 %v3819_v15, %v3818_v10 }
 0xf11   : > { %4454 = vmatmul.msk.bf16.gmra.mxu2 %vm1688_vm9, %v3830_v42 }
 0xf34   : > { %v3867_v18 = vpop.f32.mrf.mxu2 }
 0xf35   : > { %v3868_v14 = vadd.f32 %v4657_v27, %v3867_v18 }
 0xf37   : > { %v3902_v34 = vmax.f32 %v3868_v14, 0.0 }
 0xf3c   : > { %v3869_v50 = vpop.f32.mrf.mxu2 }
 0xf3d   : > { %v3870_v16 = vadd.f32 %v4657_v27, %v3869_v50 }
 0xf3f   : > { %v3903_v58 = vmax.f32 %v3870_v16, 0.0 }
 0xf41   : > { %v3920_v44 = vpack.c.bf16 %v3903_v58, %v3902_v34 }
 0xf43   : > { %4455 = vmatmul.msk.bf16.vlgmr.msra.gmra.mxu3 %vm1688_vm9, %v3920_v44 }
 0xf44   : > { %v3872_v43 = vpop.f32.mrf.mxu2 }
 0xf45   : > { %v3873_v0 = vadd.f32 %v4657_v27, %v3872_v43 }
 0xf47   : > { %v3904_v21 = vmax.f32 %v3873_v0, 0.0 }
 0xf4c   : > { %v3874_v52 = vpop.f32.mrf.mxu2 }
 0xf4d   : > { %v3875_v24 = vadd.f32 %v4657_v27, %v3874_v52 }
 0xf4f   : > { %v3905_v28 = vmax.f32 %v3875_v24, 0.0 }
 0xf51   : > { %v3921_v62 = vpack.c.bf16 %v3905_v28, %v3904_v21 }
 0xf53   : > { %4456 = vmatmul.msk.bf16.gmra.mxu3 %vm1688_vm9, %v3921_v62 }
 0xf54   : > { %v3877_v53 = vpop.f32.mrf.mxu2 }
 0xf55   : > { %v3878_v3 = vadd.f32 %v4657_v27, %v3877_v53 }
 0xf57   : > { %v3906_v30 = vmax.f32 %v3878_v3, 0.0 }
 0xf5c   : > { %v3879_v57 = vpop.f32.mrf.mxu2 }
 0xf5d   : > { %v3880_v35 = vadd.f32 %v4657_v27, %v3879_v57 }
 0xf5f   : > { %v3907_v22 = vmax.f32 %v3880_v35, 0.0 }
 0xf61   : > { %v3922_v33 = vpack.c.bf16 %v3907_v22, %v3906_v30 }
 0xf63   : > { %4457 = vmatmul.msk.bf16.gmra.mxu3 %vm1688_vm9, %v3922_v33 }
 0xf64   : > { %v3882_v54 = vpop.f32.mrf.mxu2 }
 0xf65   : > { %v3883_v60 = vadd.f32 %v4657_v27, %v3882_v54 }
 0xf67   : > { %v3908_v25 = vmax.f32 %v3883_v60, 0.0 }
 0xf6c   : > { %v3884_v38 = vpop.f32.mrf.mxu2 }
 0xf6d   : > { %v3885_v63 = vadd.f32 %v4657_v27, %v3884_v38 }
 0xf6f   : > { %v3909_v56 = vmax.f32 %v3885_v63, 0.0 }
 0xf71   : > { %v3923_v6 = vpack.c.bf16 %v3909_v56, %v3908_v25 }
 0xf73   : > { %4458 = vmatmul.msk.bf16.gmra.mxu3 %vm1688_vm9, %v3923_v6 }
 0xf74   : > { %v3887_v37 = vpop.f32.mrf.mxu2 }
 0xf75   : > { %v3888_v29 = vadd.f32 %v4657_v27, %v3887_v37 }
 0xf77   : > { %v3910_v40 = vmax.f32 %v3888_v29, 0.0 }
 0xf7c   : > { %v3889_v36 = vpop.f32.mrf.mxu2 }
 0xf7d   : > { %v3890_v31 = vadd.f32 %v4657_v27, %v3889_v36 }
 0xf7f   : > { %v3911_v12 = vmax.f32 %v3890_v31, 0.0 }
 0xf81   : > { %v3924_v32 = vpack.c.bf16 %v3911_v12, %v3910_v40 }
 0xf83   : > { %4459 = vmatmul.msk.bf16.gmra.mxu3 %vm1688_vm9, %v3924_v32 }
 0xf84   : > { %v3892_v41 = vpop.f32.mrf.mxu2 }
 0xf85   : > { %v3893_v2 = vadd.f32 %v4657_v27, %v3892_v41 }
 0xf87   : > { %v3912_v1 = vmax.f32 %v3893_v2, 0.0 }
 0xf8c   : > { %v3894_v4 = vpop.f32.mrf.mxu2 }
 0xf8d   : > { %v3895_v5 = vadd.f32 %v4657_v27, %v3894_v4 }
 0xf8f   : > { %v3913_v19 = vmax.f32 %v3895_v5, 0.0 }
 0xf91   : > { %v3925_v51 = vpack.c.bf16 %v3913_v19, %v3912_v1 }
 0xf93   : > { %4460 = vmatmul.msk.bf16.gmra.mxu3 %vm1688_vm9, %v3925_v51 }
 0xf94   : > { %v3897_v39 = vpop.f32.mrf.mxu2 }
 0xf95   : > { %v3898_v49 = vadd.f32 %v4657_v27, %v3897_v39 }
 0xf97   : > { %v3914_v55 = vmax.f32 %v3898_v49, 0.0 }
 0xf9c   : > { %v3899_v26 = vpop.f32.mrf.mxu2 }
 0xf9d   : > { %v3900_v46 = vadd.f32 %v4657_v27, %v3899_v26 }
 0xf9f   : > { %v3915_v17 = vmax.f32 %v3900_v46, 0.0 }
 0xfa1   : > { %v3926_v45 = vpack.c.bf16 %v3915_v17, %v3914_v55 }
 0xfa3   : > { %4461 = vmatmul.msk.bf16.gmra.mxu3 %vm1688_vm9, %v3926_v45 }
 0xfc6   : > { %v3963_v47 = vpop.f32.mrf.mxu3 }
 0xfc7   : > { %v3964_v13 = vadd.f32 %v4658_v9, %v3963_v47 }
 0xfc9   : > { %3999 = vst.msk [vmem:[%s6438_s2] sm:$0xff] %vm3998_vm8, %v3964_v13 }
 0xfce   : > { %v3965_v48 = vpop.f32.mrf.mxu3 }
 0xfcf   : > { %v3966_v11 = vadd.f32 %v4658_v9, %v3965_v48 }
 0xfd1   : > { %4000 = vst.msk [vmem:[%s6438_s2 + $0x8] sm:$0xff] %vm3998_vm8, %v3966_v11 }
 0xfd6   : > { %v3968_v10 = vpop.f32.mrf.mxu3 }
 0xfd7   : > { %v3969_v15 = vadd.f32 %v4658_v9, %v3968_v10 }
 0xfd9   : > { %4001 = vst.msk [vmem:[%s6438_s2 + $0x10] sm:$0xff] %vm3998_vm8, %v3969_v15 }
 0xfde   : > { %v3970_v42 = vpop.f32.mrf.mxu3 }
 0xfdf   : > { %v3971_v20 = vadd.f32 %v4658_v9, %v3970_v42 }
 0xfe1   : > { %4002 = vst.msk [vmem:[%s6438_s2 + $0x18] sm:$0xff] %vm3998_vm8, %v3971_v20 }
 0xfe6   : > { %v3973_v8 = vpop.f32.mrf.mxu3 }
 0xfe7   : > { %v3974_v7 = vadd.f32 %v4658_v9, %v3973_v8 }
 0xfe9   : > { %4003 = vst.msk [vmem:[%s6438_s2 + $0x20] sm:$0xff] %vm3998_vm8, %v3974_v7 }
 0xfee   : > { %v3975_v59 = vpop.f32.mrf.mxu3 }
 0xfef   : > { %v3976_v61 = vadd.f32 %v4658_v9, %v3975_v59 }
 0xff1   : > { %4004 = vst.msk [vmem:[%s6438_s2 + $0x28] sm:$0xff] %vm3998_vm8, %v3976_v61 }
 0xff6   : > { %v3978_v23 = vpop.f32.mrf.mxu3 }
 0xff7   : > { %v3979_v18 = vadd.f32 %v4658_v9, %v3978_v23 }
 0xff9   : > { %4005 = vst.msk [vmem:[%s6438_s2 + $0x30] sm:$0xff] %vm3998_vm8, %v3979_v18 }
 0xffe   : > { %v3980_v27 = vpop.f32.mrf.mxu3 }
 0xfff   : > { %v3981_v14 = vadd.f32 %v4658_v9, %v3980_v27 }
0x1001   : > { %4006 = vst.msk [vmem:[%s6438_s2 + $0x38] sm:$0xff] %vm3998_vm8, %v3981_v14 }
0x1006   : > { %v3983_v50 = vpop.f32.mrf.mxu3 }
0x1007   : > { %v3984_v16 = vadd.f32 %v4658_v9, %v3983_v50 }
0x1009   : > { %4007 = vst.msk [vmem:[%s6438_s2 + $0x40] sm:$0xff] %vm3998_vm8, %v3984_v16 }
0x100e   : > { %v3985_v34 = vpop.f32.mrf.mxu3 }
0x100f   : > { %v3986_v58 = vadd.f32 %v4658_v9, %v3985_v34 }
0x1011   : > { %4008 = vst.msk [vmem:[%s6438_s2 + $0x48] sm:$0xff] %vm3998_vm8, %v3986_v58 }
0x1016   : > { %v3988_v44 = vpop.f32.mrf.mxu3 }
0x1017   : > { %v3989_v43 = vadd.f32 %v4658_v9, %v3988_v44 }
0x1019   : > { %4009 = vst.msk [vmem:[%s6438_s2 + $0x50] sm:$0xff] %vm3998_vm8, %v3989_v43 }
0x101e   : > { %v3990_v0 = vpop.f32.mrf.mxu3 }
0x101f   : > { %v3991_v52 = vadd.f32 %v4658_v9, %v3990_v0 }
0x1021   : > { %4010 = vst.msk [vmem:[%s6438_s2 + $0x58] sm:$0xff] %vm3998_vm8, %v3991_v52 }
0x1026   : > { %v3993_v24 = vpop.f32.mrf.mxu3 }
0x1027   : > { %v3994_v21 = vadd.f32 %v4658_v9, %v3993_v24 }
0x1029   : > { %4011 = vst.msk [vmem:[%s6438_s2 + $0x60] sm:$0xff] %vm3998_vm8, %v3994_v21 }
0x102e   : > { %v3995_v28 = vpop.f32.mrf.mxu3 }
0x102f   : > { %v3996_v62 = vadd.f32 %v4658_v9, %v3995_v28 }
0x1031   : > { %4012 = vst.msk [vmem:[%s6438_s2 + $0x68] sm:$0xff] %vm3998_vm8, %v3996_v62 }
0x1032 PF: > { %s6439_s0 = sld [smem:[#allocation35_spill]] }
0x1038   : > { %s74_s15 = sadd.s32 1, %s6439_s0  }
0x1039   : > { %p71_p3 = scmp.ge.s32.totalorder %s74_s15, 4  }
0x103b   :  { %73 = sbr.rel (!%p71_p3) target bundleno = 57 (0x39), region = 242 }
0x1040   :  { %4024 = vsyncpa [#allocation16], 1 }
0x1041   :  { %4026 = vsyncpa [#allocation16 + $0x1], 1 }

</bundles_post_ra>
